<compile_context>
chip_gen: v7x
topology: tpu7x:2x2x1
jax: 0.10.0
libtpu: 0.0.40
codegen_flags: <defaults>
</compile_context>

<pallas_src>
import functools

import jax
import jax.numpy as jnp
import numpy as np
from jax import lax
from jax.experimental import pallas as pl
from jax.experimental.pallas import tpu as pltpu

INV_TEMPERATURE = 100.0


# ----------------------------------------------------------------------------
# Fused kernel: 1x1-conv heatmap head + spatial softmax + soft-argmax +
# confidence head + DLT normal-matrix (A^T A) construction.  Single grid step.
# ----------------------------------------------------------------------------
def _fused_kernel(x0_ref, x1_ref, x2_ref, proj_ref,
                  w_hm_ref, b_hm_ref, w_cf_ref, b_cf_ref,
                  kpconf_ref, ata_ref,
                  *, B, C, J, W, scale_x, scale_y):
    # per-channel images, channels-first flattened spatial: (BC, HW), lanes = HW
    x0 = x0_ref[...]
    x1 = x1_ref[...]
    x2 = x2_ref[...]
    BC, HW = x0.shape

    # coordinate grids built in-kernel (no HBM coords input).
    # p = h*W + w  ->  col = w (x coordinate), row = h (y coordinate)
    p_i = lax.broadcasted_iota(jnp.int32, (BC, HW), 1)
    p_f = p_i.astype(jnp.float32)
    row = jnp.floor(p_f / jnp.float32(W))
    col = p_f - row * jnp.float32(W)

    # per-channel spatial means for the confidence head (XLU lane reduces)
    inv_hw = jnp.float32(1.0 / float(HW))
    xm0 = jnp.sum(x0, axis=1, keepdims=True) * inv_hw      # (BC, 1)
    xm1 = jnp.sum(x1, axis=1, keepdims=True) * inv_hw
    xm2 = jnp.sum(x2, axis=1, keepdims=True) * inv_hw

    # packed per-view projection rows: PM = [P0 | P1 | P2]  -> (BC, 12)
    PM = proj_ref[...]
    P0 = PM[:, 0:4]                                         # (BC, 4)
    P1 = PM[:, 4:8]
    P2 = PM[:, 8:12]

    kpx_cols = []
    kpy_cols = []
    conf_cols = []

    for j in range(J):                                      # static, J small
        # --- 1x1-conv heatmap head: VPU FMAs with scalar weights from SMEM ---
        z = (x0 * w_hm_ref[0, j] + x1 * w_hm_ref[1, j] + x2 * w_hm_ref[2, j]
             + b_hm_ref[0, j]) * INV_TEMPERATURE            # (BC, HW)

        # --- spatial softmax + soft-argmax with deferred normalization ---
        m = jnp.max(z, axis=1, keepdims=True)               # (BC, 1)
        e = jnp.exp(z - m)                                  # (BC, HW)
        s = jnp.sum(e, axis=1, keepdims=True)               # (BC, 1)
        sx = jnp.sum(e * col, axis=1, keepdims=True)
        sy = jnp.sum(e * row, axis=1, keepdims=True)
        inv = pl.reciprocal(s, approx=True)                 # EUP slot
        inv = inv * (2.0 - s * inv)                         # 1 Newton step -> f32 accuracy
        kx = sx * inv * scale_x                             # (BC, 1)
        ky = sy * inv * scale_y

        # --- confidence head: global average pool + linear + sigmoid ---
        cl = (xm0 * w_cf_ref[0, j] + xm1 * w_cf_ref[1, j] + xm2 * w_cf_ref[2, j]
              + b_cf_ref[0, j])                             # (BC, 1)
        cj = 1.0 / (1.0 + jnp.exp(-cl))

        kpx_cols.append(kx)
        kpy_cols.append(ky)
        conf_cols.append(cj)

        # --- fused DLT: confidence-weighted rows and flattened A^T A for joint j ---
        r0 = cj * (kx * P2 - P0)                            # (BC, 4)
        r1 = cj * (ky * P2 - P1)                            # (BC, 4)
        outer_rows = []
        for a in range(4):
            outer_rows.append(r0[:, a:a + 1] * r0 + r1[:, a:a + 1] * r1)   # (BC, 4)
        full = jnp.concatenate(outer_rows, axis=1)          # (BC, 16), entry a*4+d
        # reduce over the C cameras of each batch element (static sublane slices)
        per_b = [jnp.sum(full[b * C:(b + 1) * C, :], axis=0, keepdims=True)
                 for b in range(B)]
        ata_ref[j] = jnp.concatenate(per_b, axis=0)         # (B, 16)

    # packed keypoint / confidence output slab
    kpconf_ref[0] = jnp.concatenate(kpx_cols, axis=1)       # (BC, J)
    kpconf_ref[1] = jnp.concatenate(kpy_cols, axis=1)
    kpconf_ref[2] = jnp.concatenate(conf_cols, axis=1)


def run_fused(x0, x1, x2, proj_flat, w_hm, b_hm, w_cf, b_cf,
              *, B, C, J, W, scale_x, scale_y):
    BC = x0.shape[0]
    kernel = functools.partial(_fused_kernel, B=B, C=C, J=J, W=W,
                               scale_x=scale_x, scale_y=scale_y)
    vmem = pl.BlockSpec(memory_space=pltpu.MemorySpace.VMEM)
    smem = pl.BlockSpec(memory_space=pltpu.MemorySpace.SMEM)
    kpconf, ata16 = pl.pallas_call(
        kernel,
        out_shape=(
            jax.ShapeDtypeStruct((3, BC, J), jnp.float32),   # [x; y; conf]
            jax.ShapeDtypeStruct((J, B, 16), jnp.float32),   # flattened A^T A
        ),
        in_specs=[vmem, vmem, vmem, vmem, smem, smem, smem, smem],
        out_specs=(vmem, vmem),
    )(x0, x1, x2, proj_flat, w_hm, b_hm, w_cf, b_cf)
    return kpconf, ata16


# ----------------------------------------------------------------------------
# Full forward pass (glue in plain JAX, hot path in the single fused kernel).
# ----------------------------------------------------------------------------
@functools.partial(jax.jit, static_argnames=("J",))
def algebraic_triangulation_forward(images, proj, w_hm, b_hm, w_cf, b_cf, J):
    B, C, _, H, W = images.shape
    BC, HW = B * C, H * W

    # channels-first flattened spatial: pure reshape + cheap channel slices (no transpose)
    x_cf = images.astype(jnp.float32).reshape(BC, 3, HW)
    x0 = x_cf[:, 0, :]
    x1 = x_cf[:, 1, :]
    x2 = x_cf[:, 2, :]

    # per-view projection rows packed as [P0 | P1 | P2] -> (BC, 12)
    proj_flat = proj.astype(jnp.float32).reshape(BC, 12)

    # coordinate rescaling exactly as in the PyTorch forward; the synthetic backbone
    # keeps the input resolution, so heat_h == H and heat_w == W.
    heat_h, heat_w = H, W
    scale_x = float(H) / float(heat_h)
    scale_y = float(W) / float(heat_w)

    kpconf, ata16 = run_fused(x0, x1, x2, proj_flat, w_hm, b_hm, w_cf, b_cf,
                              B=B, C=C, J=J, W=W,
                              scale_x=scale_x, scale_y=scale_y)

    kp2d_flat = jnp.stack([kpconf[0], kpconf[1]], axis=-1)       # (BC, J, 2)
    conf_flat = kpconf[2]                                        # (BC, J)
    ata = jnp.transpose(ata16, (1, 0, 2)).reshape(B, J, 4, 4)    # (B, J, 4, 4)

    # smallest eigenvector of A^T A == right singular vector of the smallest sigma
    _, eigvecs = jnp.linalg.eigh(ata)
    v = eigvecs[..., :, 0]                                       # (B, J, 4)
    keypoints_3d = v[..., :3] / v[..., 3:]
    return keypoints_3d, kp2d_flat, conf_flat, ata


# ----------------------------------------------------------------------------
# Pure-JAX reference (same math, no Pallas) used for a correctness check.
# ----------------------------------------------------------------------------
def reference_intermediates(images, proj, w_hm, b_hm, w_cf, b_cf, J):
    B, C, _, H, W = images.shape
    BC, HW = B * C, H * W
    x_flat = images.reshape(BC, 3, H, W).transpose(0, 2, 3, 1).reshape(BC, HW, 3)
    p = jnp.arange(HW, dtype=jnp.int32)
    coords = jnp.stack([p % W, p // W], axis=-1).astype(jnp.float32)

    logits = jnp.einsum('bpc,cj->bpj', x_flat, w_hm) + b_hm
    heat = jax.nn.softmax(logits * INV_TEMPERATURE, axis=1)
    kp2d_flat = jnp.einsum('bpj,pc->bjc', heat, coords)
    conf_flat = jax.nn.sigmoid(jnp.mean(x_flat, axis=1) @ w_cf + b_cf[0])

    heat_h, heat_w = H, W
    scale = jnp.array([H / heat_h, W / heat_w], dtype=jnp.float32)
    kp2d_flat = kp2d_flat * scale

    kp2d = kp2d_flat.reshape(B, C, J, 2)
    conf = conf_flat.reshape(B, C, J)
    x = kp2d[..., 0]
    y = kp2d[..., 1]
    p0 = proj[:, :, 0, :]
    p1 = proj[:, :, 1, :]
    p2 = proj[:, :, 2, :]
    r0 = conf[..., None] * (x[..., None] * p2[:, :, None, :] - p0[:, :, None, :])
    r1 = conf[..., None] * (y[..., None] * p2[:, :, None, :] - p1[:, :, None, :])
    ata = (jnp.einsum('bcja,bcjd->bjad', r0, r0)
           + jnp.einsum('bcja,bcjd->bjad', r1, r1))
    return kp2d_flat, conf_flat, ata


if __name__ == "__main__":
    B, C, J, H, W = 2, 4, 8, 16, 16

    key = jax.random.PRNGKey(0)
    k_img, k_proj, k_whm, k_bhm, k_wcf, k_bcf = jax.random.split(key, 6)

    images = jax.random.normal(k_img, (B, C, 3, H, W), dtype=jnp.float32)

    # simple, deterministic, well-conditioned camera projection matrices
    base_P = jnp.broadcast_to(
        jnp.array([[1.0, 0.0, 0.0, 0.5],
                   [0.0, 1.0, 0.0, 0.2],
                   [0.0, 0.0, 1.0, 5.0]], dtype=jnp.float32),
        (B, C, 3, 4))
    proj = base_P + 0.05 * jax.random.normal(k_proj, (B, C, 3, 4), dtype=jnp.float32)

    # deterministic synthetic backbone parameters
    w_hm = 0.5 * jax.random.normal(k_whm, (3, J), dtype=jnp.float32)
    b_hm = 0.1 * jax.random.normal(k_bhm, (1, J), dtype=jnp.float32)
    w_cf = 0.5 * jax.random.normal(k_wcf, (3, J), dtype=jnp.float32)
    b_cf = 0.1 * jax.random.normal(k_bcf, (1, J), dtype=jnp.float32)

    keypoints_3d, kp2d_flat, conf_flat, ata = algebraic_triangulation_forward(
        images, proj, w_hm, b_hm, w_cf, b_cf, J)
    keypoints_3d = jax.block_until_ready(keypoints_3d)

    # correctness check of the Pallas-produced intermediates vs pure JAX
    kp_ref, conf_ref, ata_ref = reference_intermediates(
        images, proj, w_hm, b_hm, w_cf, b_cf, J)
    np.testing.assert_allclose(np.asarray(kp2d_flat), np.asarray(kp_ref),
                               rtol=1e-3, atol=1e-3)
    np.testing.assert_allclose(np.asarray(conf_flat), np.asarray(conf_ref),
                               rtol=1e-3, atol=1e-3)
    np.testing.assert_allclose(np.asarray(ata), np.asarray(ata_ref),
                               rtol=1e-3, atol=1e-3)

    assert keypoints_3d.shape == (B, J, 3)
    assert bool(jnp.all(jnp.isfinite(keypoints_3d)))
    print("KERNEL_OK")
</pallas_src>

<mosaic_0001>
module attributes {stable_mosaic.version = 11 : i64} {
  func.func @_fused_kernel(%arg0: memref<8x256xf32, #tpu.memory_space<vmem>>, %arg1: memref<8x256xf32, #tpu.memory_space<vmem>>, %arg2: memref<8x256xf32, #tpu.memory_space<vmem>>, %arg3: memref<8x12xf32, #tpu.memory_space<vmem>>, %arg4: memref<3x8xf32, #tpu.memory_space<smem>>, %arg5: memref<1x8xf32, #tpu.memory_space<smem>>, %arg6: memref<3x8xf32, #tpu.memory_space<smem>>, %arg7: memref<1x8xf32, #tpu.memory_space<smem>>, %arg8: memref<3x8x8xf32, #tpu.memory_space<vmem>>, %arg9: memref<8x2x16xf32, #tpu.memory_space<vmem>>) attributes {dimension_semantics = [], scalar_prefetch = 0 : i64, scratch_operands = 0 : i64, tpu.core_type = #tpu.core_type<tc>} {
    %c0 = arith.constant 0 : index
    %c0_0 = arith.constant 0 : index
    %0 = vector.load %arg0[%c0, %c0_0] : memref<8x256xf32, #tpu.memory_space<vmem>>, vector<8x256xf32>
    %c0_1 = arith.constant 0 : index
    %c0_2 = arith.constant 0 : index
    %1 = vector.load %arg1[%c0_1, %c0_2] : memref<8x256xf32, #tpu.memory_space<vmem>>, vector<8x256xf32>
    %c0_3 = arith.constant 0 : index
    %c0_4 = arith.constant 0 : index
    %2 = vector.load %arg2[%c0_3, %c0_4] : memref<8x256xf32, #tpu.memory_space<vmem>>, vector<8x256xf32>
    %3 = tpu.iota {dimensions = array<i32: 1>} : vector<8x256xi32>
    %4 = arith.sitofp %3 : vector<8x256xi32> to vector<8x256xf32>
    %cst = arith.constant 1.600000e+01 : f32
    %5 = vector.broadcast %cst : f32 to vector<8x256xf32>
    %6 = arith.divf %4, %5 : vector<8x256xf32>
    %7 = math.floor %6 : vector<8x256xf32>
    %cst_5 = arith.constant 1.600000e+01 : f32
    %8 = vector.broadcast %cst_5 : f32 to vector<8x256xf32>
    %9 = arith.mulf %7, %8 : vector<8x256xf32>
    %10 = arith.subf %4, %9 : vector<8x256xf32>
    %cst_6 = arith.constant dense<0.000000e+00> : vector<8xf32>
    %11 = vector.multi_reduction <add>, %0, %cst_6 [1] : vector<8x256xf32> to vector<8xf32>
    %12 = vector.shape_cast %11 : vector<8xf32> to vector<8x1xf32>
    %cst_7 = arith.constant 3.906250e-03 : f32
    %13 = vector.broadcast %cst_7 : f32 to vector<8x1xf32>
    %14 = arith.mulf %12, %13 : vector<8x1xf32>
    %cst_8 = arith.constant dense<0.000000e+00> : vector<8xf32>
    %15 = vector.multi_reduction <add>, %1, %cst_8 [1] : vector<8x256xf32> to vector<8xf32>
    %16 = vector.shape_cast %15 : vector<8xf32> to vector<8x1xf32>
    %cst_9 = arith.constant 3.906250e-03 : f32
    %17 = vector.broadcast %cst_9 : f32 to vector<8x1xf32>
    %18 = arith.mulf %16, %17 : vector<8x1xf32>
    %cst_10 = arith.constant dense<0.000000e+00> : vector<8xf32>
    %19 = vector.multi_reduction <add>, %2, %cst_10 [1] : vector<8x256xf32> to vector<8xf32>
    %20 = vector.shape_cast %19 : vector<8xf32> to vector<8x1xf32>
    %cst_11 = arith.constant 3.906250e-03 : f32
    %21 = vector.broadcast %cst_11 : f32 to vector<8x1xf32>
    %22 = arith.mulf %20, %21 : vector<8x1xf32>
    %c0_12 = arith.constant 0 : index
    %c0_13 = arith.constant 0 : index
    %23 = vector.load %arg3[%c0_12, %c0_13] : memref<8x12xf32, #tpu.memory_space<vmem>>, vector<8x12xf32>
    %24 = vector.extract_strided_slice %23 {offsets = [0, 0], sizes = [8, 4], strides = [1, 1]} : vector<8x12xf32> to vector<8x4xf32>
    %25 = vector.extract_strided_slice %23 {offsets = [0, 4], sizes = [8, 4], strides = [1, 1]} : vector<8x12xf32> to vector<8x4xf32>
    %26 = vector.extract_strided_slice %23 {offsets = [0, 8], sizes = [8, 4], strides = [1, 1]} : vector<8x12xf32> to vector<8x4xf32>
    %c0_14 = arith.constant 0 : index
    %c0_15 = arith.constant 0 : index
    %27 = memref.load %arg4[%c0_14, %c0_15] : memref<3x8xf32, #tpu.memory_space<smem>>
    %28 = vector.broadcast %27 : f32 to vector<8x256xf32>
    %29 = arith.mulf %0, %28 : vector<8x256xf32>
    %c1 = arith.constant 1 : index
    %c0_16 = arith.constant 0 : index
    %30 = memref.load %arg4[%c1, %c0_16] : memref<3x8xf32, #tpu.memory_space<smem>>
    %31 = vector.broadcast %30 : f32 to vector<8x256xf32>
    %32 = arith.mulf %1, %31 : vector<8x256xf32>
    %33 = arith.addf %29, %32 : vector<8x256xf32>
    %c2 = arith.constant 2 : index
    %c0_17 = arith.constant 0 : index
    %34 = memref.load %arg4[%c2, %c0_17] : memref<3x8xf32, #tpu.memory_space<smem>>
    %35 = vector.broadcast %34 : f32 to vector<8x256xf32>
    %36 = arith.mulf %2, %35 : vector<8x256xf32>
    %37 = arith.addf %33, %36 : vector<8x256xf32>
    %c0_18 = arith.constant 0 : index
    %c0_19 = arith.constant 0 : index
    %38 = memref.load %arg5[%c0_18, %c0_19] : memref<1x8xf32, #tpu.memory_space<smem>>
    %39 = vector.broadcast %38 : f32 to vector<8x256xf32>
    %40 = arith.addf %37, %39 : vector<8x256xf32>
    %cst_20 = arith.constant 1.000000e+02 : f32
    %41 = vector.broadcast %cst_20 : f32 to vector<8x256xf32>
    %42 = arith.mulf %40, %41 : vector<8x256xf32>
    %cst_21 = arith.constant dense<0xFF800000> : vector<8xf32>
    %43 = vector.multi_reduction <maximumf>, %42, %cst_21 [1] : vector<8x256xf32> to vector<8xf32>
    %44 = vector.shape_cast %43 : vector<8xf32> to vector<8x1xf32>
    %45 = vector.broadcast %44 : vector<8x1xf32> to vector<8x256xf32>
    %46 = arith.subf %42, %45 : vector<8x256xf32>
    %47 = math.exp %46 : vector<8x256xf32>
    %cst_22 = arith.constant dense<0.000000e+00> : vector<8xf32>
    %48 = vector.multi_reduction <add>, %47, %cst_22 [1] : vector<8x256xf32> to vector<8xf32>
    %49 = vector.shape_cast %48 : vector<8xf32> to vector<8x1xf32>
    %50 = arith.mulf %47, %10 : vector<8x256xf32>
    %cst_23 = arith.constant dense<0.000000e+00> : vector<8xf32>
    %51 = vector.multi_reduction <add>, %50, %cst_23 [1] : vector<8x256xf32> to vector<8xf32>
    %52 = vector.shape_cast %51 : vector<8xf32> to vector<8x1xf32>
    %53 = arith.mulf %47, %7 : vector<8x256xf32>
    %cst_24 = arith.constant dense<0.000000e+00> : vector<8xf32>
    %54 = vector.multi_reduction <add>, %53, %cst_24 [1] : vector<8x256xf32> to vector<8xf32>
    %55 = vector.shape_cast %54 : vector<8xf32> to vector<8x1xf32>
    %56 = tpu.reciprocal %49 {approx = true} : vector<8x1xf32> -> vector<8x1xf32>
    %57 = arith.mulf %49, %56 : vector<8x1xf32>
    %cst_25 = arith.constant 2.000000e+00 : f32
    %58 = vector.broadcast %cst_25 : f32 to vector<8x1xf32>
    %59 = arith.subf %58, %57 : vector<8x1xf32>
    %60 = arith.mulf %56, %59 : vector<8x1xf32>
    %61 = arith.mulf %52, %60 : vector<8x1xf32>
    %cst_26 = arith.constant 1.000000e+00 : f32
    %62 = vector.broadcast %cst_26 : f32 to vector<8x1xf32>
    %63 = arith.mulf %61, %62 : vector<8x1xf32>
    %64 = arith.mulf %55, %60 : vector<8x1xf32>
    %cst_27 = arith.constant 1.000000e+00 : f32
    %65 = vector.broadcast %cst_27 : f32 to vector<8x1xf32>
    %66 = arith.mulf %64, %65 : vector<8x1xf32>
    %c0_28 = arith.constant 0 : index
    %c0_29 = arith.constant 0 : index
    %67 = memref.load %arg6[%c0_28, %c0_29] : memref<3x8xf32, #tpu.memory_space<smem>>
    %68 = vector.broadcast %67 : f32 to vector<8x1xf32>
    %69 = arith.mulf %14, %68 : vector<8x1xf32>
    %c1_30 = arith.constant 1 : index
    %c0_31 = arith.constant 0 : index
    %70 = memref.load %arg6[%c1_30, %c0_31] : memref<3x8xf32, #tpu.memory_space<smem>>
    %71 = vector.broadcast %70 : f32 to vector<8x1xf32>
    %72 = arith.mulf %18, %71 : vector<8x1xf32>
    %73 = arith.addf %69, %72 : vector<8x1xf32>
    %c2_32 = arith.constant 2 : index
    %c0_33 = arith.constant 0 : index
    %74 = memref.load %arg6[%c2_32, %c0_33] : memref<3x8xf32, #tpu.memory_space<smem>>
    %75 = vector.broadcast %74 : f32 to vector<8x1xf32>
    %76 = arith.mulf %22, %75 : vector<8x1xf32>
    %77 = arith.addf %73, %76 : vector<8x1xf32>
    %c0_34 = arith.constant 0 : index
    %c0_35 = arith.constant 0 : index
    %78 = memref.load %arg7[%c0_34, %c0_35] : memref<1x8xf32, #tpu.memory_space<smem>>
    %79 = vector.broadcast %78 : f32 to vector<8x1xf32>
    %80 = arith.addf %77, %79 : vector<8x1xf32>
    %cst_36 = arith.constant 0.000000e+00 : f32
    %81 = vector.broadcast %cst_36 : f32 to vector<8x1xf32>
    %82 = arith.subf %81, %80 : vector<8x1xf32>
    %83 = math.exp %82 : vector<8x1xf32>
    %cst_37 = arith.constant 1.000000e+00 : f32
    %84 = vector.broadcast %cst_37 : f32 to vector<8x1xf32>
    %85 = arith.addf %84, %83 : vector<8x1xf32>
    %cst_38 = arith.constant 1.000000e+00 : f32
    %86 = vector.broadcast %cst_38 : f32 to vector<8x1xf32>
    %87 = arith.divf %86, %85 : vector<8x1xf32>
    %88 = vector.broadcast %63 : vector<8x1xf32> to vector<8x4xf32>
    %89 = arith.mulf %88, %26 : vector<8x4xf32>
    %90 = arith.subf %89, %24 : vector<8x4xf32>
    %91 = vector.broadcast %87 : vector<8x1xf32> to vector<8x4xf32>
    %92 = arith.mulf %91, %90 : vector<8x4xf32>
    %93 = vector.broadcast %66 : vector<8x1xf32> to vector<8x4xf32>
    %94 = arith.mulf %93, %26 : vector<8x4xf32>
    %95 = arith.subf %94, %25 : vector<8x4xf32>
    %96 = vector.broadcast %87 : vector<8x1xf32> to vector<8x4xf32>
    %97 = arith.mulf %96, %95 : vector<8x4xf32>
    %98 = vector.extract_strided_slice %92 {offsets = [0, 0], sizes = [8, 1], strides = [1, 1]} : vector<8x4xf32> to vector<8x1xf32>
    %99 = vector.broadcast %98 : vector<8x1xf32> to vector<8x4xf32>
    %100 = arith.mulf %99, %92 : vector<8x4xf32>
    %101 = vector.extract_strided_slice %97 {offsets = [0, 0], sizes = [8, 1], strides = [1, 1]} : vector<8x4xf32> to vector<8x1xf32>
    %102 = vector.broadcast %101 : vector<8x1xf32> to vector<8x4xf32>
    %103 = arith.mulf %102, %97 : vector<8x4xf32>
    %104 = arith.addf %100, %103 : vector<8x4xf32>
    %105 = vector.extract_strided_slice %92 {offsets = [0, 1], sizes = [8, 1], strides = [1, 1]} : vector<8x4xf32> to vector<8x1xf32>
    %106 = vector.broadcast %105 : vector<8x1xf32> to vector<8x4xf32>
    %107 = arith.mulf %106, %92 : vector<8x4xf32>
    %108 = vector.extract_strided_slice %97 {offsets = [0, 1], sizes = [8, 1], strides = [1, 1]} : vector<8x4xf32> to vector<8x1xf32>
    %109 = vector.broadcast %108 : vector<8x1xf32> to vector<8x4xf32>
    %110 = arith.mulf %109, %97 : vector<8x4xf32>
    %111 = arith.addf %107, %110 : vector<8x4xf32>
    %112 = vector.extract_strided_slice %92 {offsets = [0, 2], sizes = [8, 1], strides = [1, 1]} : vector<8x4xf32> to vector<8x1xf32>
    %113 = vector.broadcast %112 : vector<8x1xf32> to vector<8x4xf32>
    %114 = arith.mulf %113, %92 : vector<8x4xf32>
    %115 = vector.extract_strided_slice %97 {offsets = [0, 2], sizes = [8, 1], strides = [1, 1]} : vector<8x4xf32> to vector<8x1xf32>
    %116 = vector.broadcast %115 : vector<8x1xf32> to vector<8x4xf32>
    %117 = arith.mulf %116, %97 : vector<8x4xf32>
    %118 = arith.addf %114, %117 : vector<8x4xf32>
    %119 = vector.extract_strided_slice %92 {offsets = [0, 3], sizes = [8, 1], strides = [1, 1]} : vector<8x4xf32> to vector<8x1xf32>
    %120 = vector.broadcast %119 : vector<8x1xf32> to vector<8x4xf32>
    %121 = arith.mulf %120, %92 : vector<8x4xf32>
    %122 = vector.extract_strided_slice %97 {offsets = [0, 3], sizes = [8, 1], strides = [1, 1]} : vector<8x4xf32> to vector<8x1xf32>
    %123 = vector.broadcast %122 : vector<8x1xf32> to vector<8x4xf32>
    %124 = arith.mulf %123, %97 : vector<8x4xf32>
    %125 = arith.addf %121, %124 : vector<8x4xf32>
    %126 = tpu.concatenate %104, %111, %118, %125 in 1 : vector<8x4xf32>, vector<8x4xf32>, vector<8x4xf32>, vector<8x4xf32> -> vector<8x16xf32>
    %127 = vector.extract_strided_slice %126 {offsets = [0, 0], sizes = [4, 16], strides = [1, 1]} : vector<8x16xf32> to vector<4x16xf32>
    %cst_39 = arith.constant dense<0.000000e+00> : vector<16xf32>
    %128 = vector.multi_reduction <add>, %127, %cst_39 [0] : vector<4x16xf32> to vector<16xf32>
    %129 = vector.shape_cast %128 : vector<16xf32> to vector<1x16xf32>
    %130 = vector.extract_strided_slice %126 {offsets = [4, 0], sizes = [4, 16], strides = [1, 1]} : vector<8x16xf32> to vector<4x16xf32>
    %cst_40 = arith.constant dense<0.000000e+00> : vector<16xf32>
    %131 = vector.multi_reduction <add>, %130, %cst_40 [0] : vector<4x16xf32> to vector<16xf32>
    %132 = vector.shape_cast %131 : vector<16xf32> to vector<1x16xf32>
    %133 = tpu.concatenate %129, %132 in 0 : vector<1x16xf32>, vector<1x16xf32> -> vector<2x16xf32>
    %c0_41 = arith.constant 0 : index
    %c0_42 = arith.constant 0 : index
    %c0_43 = arith.constant 0 : index
    %134 = vector.load %arg9[%c0_41, %c0_42, %c0_43] : memref<8x2x16xf32, #tpu.memory_space<vmem>>, vector<1x2x16xf32>
    %135 = vector.shape_cast %134 : vector<1x2x16xf32> to vector<2x16xf32>
    %136 = vector.shape_cast %133 : vector<2x16xf32> to vector<1x2x16xf32>
    tpu.vector_store %arg9[%c0_41, %c0_42, %c0_43], %136 {strides = array<i32>} : memref<8x2x16xf32, #tpu.memory_space<vmem>>, vector<1x2x16xf32>,
    %c0_44 = arith.constant 0 : index
    %c1_45 = arith.constant 1 : index
    %137 = memref.load %arg4[%c0_44, %c1_45] : memref<3x8xf32, #tpu.memory_space<smem>>
    %138 = vector.broadcast %137 : f32 to vector<8x256xf32>
    %139 = arith.mulf %0, %138 : vector<8x256xf32>
    %c1_46 = arith.constant 1 : index
    %c1_47 = arith.constant 1 : index
    %140 = memref.load %arg4[%c1_46, %c1_47] : memref<3x8xf32, #tpu.memory_space<smem>>
    %141 = vector.broadcast %140 : f32 to vector<8x256xf32>
    %142 = arith.mulf %1, %141 : vector<8x256xf32>
    %143 = arith.addf %139, %142 : vector<8x256xf32>
    %c2_48 = arith.constant 2 : index
    %c1_49 = arith.constant 1 : index
    %144 = memref.load %arg4[%c2_48, %c1_49] : memref<3x8xf32, #tpu.memory_space<smem>>
    %145 = vector.broadcast %144 : f32 to vector<8x256xf32>
    %146 = arith.mulf %2, %145 : vector<8x256xf32>
    %147 = arith.addf %143, %146 : vector<8x256xf32>
    %c0_50 = arith.constant 0 : index
    %c1_51 = arith.constant 1 : index
    %148 = memref.load %arg5[%c0_50, %c1_51] : memref<1x8xf32, #tpu.memory_space<smem>>
    %149 = vector.broadcast %148 : f32 to vector<8x256xf32>
    %150 = arith.addf %147, %149 : vector<8x256xf32>
    %cst_52 = arith.constant 1.000000e+02 : f32
    %151 = vector.broadcast %cst_52 : f32 to vector<8x256xf32>
    %152 = arith.mulf %150, %151 : vector<8x256xf32>
    %cst_53 = arith.constant dense<0xFF800000> : vector<8xf32>
    %153 = vector.multi_reduction <maximumf>, %152, %cst_53 [1] : vector<8x256xf32> to vector<8xf32>
    %154 = vector.shape_cast %153 : vector<8xf32> to vector<8x1xf32>
    %155 = vector.broadcast %154 : vector<8x1xf32> to vector<8x256xf32>
    %156 = arith.subf %152, %155 : vector<8x256xf32>
    %157 = math.exp %156 : vector<8x256xf32>
    %cst_54 = arith.constant dense<0.000000e+00> : vector<8xf32>
    %158 = vector.multi_reduction <add>, %157, %cst_54 [1] : vector<8x256xf32> to vector<8xf32>
    %159 = vector.shape_cast %158 : vector<8xf32> to vector<8x1xf32>
    %160 = arith.mulf %157, %10 : vector<8x256xf32>
    %cst_55 = arith.constant dense<0.000000e+00> : vector<8xf32>
    %161 = vector.multi_reduction <add>, %160, %cst_55 [1] : vector<8x256xf32> to vector<8xf32>
    %162 = vector.shape_cast %161 : vector<8xf32> to vector<8x1xf32>
    %163 = arith.mulf %157, %7 : vector<8x256xf32>
    %cst_56 = arith.constant dense<0.000000e+00> : vector<8xf32>
    %164 = vector.multi_reduction <add>, %163, %cst_56 [1] : vector<8x256xf32> to vector<8xf32>
    %165 = vector.shape_cast %164 : vector<8xf32> to vector<8x1xf32>
    %166 = tpu.reciprocal %159 {approx = true} : vector<8x1xf32> -> vector<8x1xf32>
    %167 = arith.mulf %159, %166 : vector<8x1xf32>
    %cst_57 = arith.constant 2.000000e+00 : f32
    %168 = vector.broadcast %cst_57 : f32 to vector<8x1xf32>
    %169 = arith.subf %168, %167 : vector<8x1xf32>
    %170 = arith.mulf %166, %169 : vector<8x1xf32>
    %171 = arith.mulf %162, %170 : vector<8x1xf32>
    %cst_58 = arith.constant 1.000000e+00 : f32
    %172 = vector.broadcast %cst_58 : f32 to vector<8x1xf32>
    %173 = arith.mulf %171, %172 : vector<8x1xf32>
    %174 = arith.mulf %165, %170 : vector<8x1xf32>
    %cst_59 = arith.constant 1.000000e+00 : f32
    %175 = vector.broadcast %cst_59 : f32 to vector<8x1xf32>
    %176 = arith.mulf %174, %175 : vector<8x1xf32>
    %c0_60 = arith.constant 0 : index
    %c1_61 = arith.constant 1 : index
    %177 = memref.load %arg6[%c0_60, %c1_61] : memref<3x8xf32, #tpu.memory_space<smem>>
    %178 = vector.broadcast %177 : f32 to vector<8x1xf32>
    %179 = arith.mulf %14, %178 : vector<8x1xf32>
    %c1_62 = arith.constant 1 : index
    %c1_63 = arith.constant 1 : index
    %180 = memref.load %arg6[%c1_62, %c1_63] : memref<3x8xf32, #tpu.memory_space<smem>>
    %181 = vector.broadcast %180 : f32 to vector<8x1xf32>
    %182 = arith.mulf %18, %181 : vector<8x1xf32>
    %183 = arith.addf %179, %182 : vector<8x1xf32>
    %c2_64 = arith.constant 2 : index
    %c1_65 = arith.constant 1 : index
    %184 = memref.load %arg6[%c2_64, %c1_65] : memref<3x8xf32, #tpu.memory_space<smem>>
    %185 = vector.broadcast %184 : f32 to vector<8x1xf32>
    %186 = arith.mulf %22, %185 : vector<8x1xf32>
    %187 = arith.addf %183, %186 : vector<8x1xf32>
    %c0_66 = arith.constant 0 : index
    %c1_67 = arith.constant 1 : index
    %188 = memref.load %arg7[%c0_66, %c1_67] : memref<1x8xf32, #tpu.memory_space<smem>>
    %189 = vector.broadcast %188 : f32 to vector<8x1xf32>
    %190 = arith.addf %187, %189 : vector<8x1xf32>
    %cst_68 = arith.constant 0.000000e+00 : f32
    %191 = vector.broadcast %cst_68 : f32 to vector<8x1xf32>
    %192 = arith.subf %191, %190 : vector<8x1xf32>
    %193 = math.exp %192 : vector<8x1xf32>
    %cst_69 = arith.constant 1.000000e+00 : f32
    %194 = vector.broadcast %cst_69 : f32 to vector<8x1xf32>
    %195 = arith.addf %194, %193 : vector<8x1xf32>
    %cst_70 = arith.constant 1.000000e+00 : f32
    %196 = vector.broadcast %cst_70 : f32 to vector<8x1xf32>
    %197 = arith.divf %196, %195 : vector<8x1xf32>
    %198 = vector.broadcast %173 : vector<8x1xf32> to vector<8x4xf32>
    %199 = arith.mulf %198, %26 : vector<8x4xf32>
    %200 = arith.subf %199, %24 : vector<8x4xf32>
    %201 = vector.broadcast %197 : vector<8x1xf32> to vector<8x4xf32>
    %202 = arith.mulf %201, %200 : vector<8x4xf32>
    %203 = vector.broadcast %176 : vector<8x1xf32> to vector<8x4xf32>
    %204 = arith.mulf %203, %26 : vector<8x4xf32>
    %205 = arith.subf %204, %25 : vector<8x4xf32>
    %206 = vector.broadcast %197 : vector<8x1xf32> to vector<8x4xf32>
    %207 = arith.mulf %206, %205 : vector<8x4xf32>
    %208 = vector.extract_strided_slice %202 {offsets = [0, 0], sizes = [8, 1], strides = [1, 1]} : vector<8x4xf32> to vector<8x1xf32>
    %209 = vector.broadcast %208 : vector<8x1xf32> to vector<8x4xf32>
    %210 = arith.mulf %209, %202 : vector<8x4xf32>
    %211 = vector.extract_strided_slice %207 {offsets = [0, 0], sizes = [8, 1], strides = [1, 1]} : vector<8x4xf32> to vector<8x1xf32>
    %212 = vector.broadcast %211 : vector<8x1xf32> to vector<8x4xf32>
    %213 = arith.mulf %212, %207 : vector<8x4xf32>
    %214 = arith.addf %210, %213 : vector<8x4xf32>
    %215 = vector.extract_strided_slice %202 {offsets = [0, 1], sizes = [8, 1], strides = [1, 1]} : vector<8x4xf32> to vector<8x1xf32>
    %216 = vector.broadcast %215 : vector<8x1xf32> to vector<8x4xf32>
    %217 = arith.mulf %216, %202 : vector<8x4xf32>
    %218 = vector.extract_strided_slice %207 {offsets = [0, 1], sizes = [8, 1], strides = [1, 1]} : vector<8x4xf32> to vector<8x1xf32>
    %219 = vector.broadcast %218 : vector<8x1xf32> to vector<8x4xf32>
    %220 = arith.mulf %219, %207 : vector<8x4xf32>
    %221 = arith.addf %217, %220 : vector<8x4xf32>
    %222 = vector.extract_strided_slice %202 {offsets = [0, 2], sizes = [8, 1], strides = [1, 1]} : vector<8x4xf32> to vector<8x1xf32>
    %223 = vector.broadcast %222 : vector<8x1xf32> to vector<8x4xf32>
    %224 = arith.mulf %223, %202 : vector<8x4xf32>
    %225 = vector.extract_strided_slice %207 {offsets = [0, 2], sizes = [8, 1], strides = [1, 1]} : vector<8x4xf32> to vector<8x1xf32>
    %226 = vector.broadcast %225 : vector<8x1xf32> to vector<8x4xf32>
    %227 = arith.mulf %226, %207 : vector<8x4xf32>
    %228 = arith.addf %224, %227 : vector<8x4xf32>
    %229 = vector.extract_strided_slice %202 {offsets = [0, 3], sizes = [8, 1], strides = [1, 1]} : vector<8x4xf32> to vector<8x1xf32>
    %230 = vector.broadcast %229 : vector<8x1xf32> to vector<8x4xf32>
    %231 = arith.mulf %230, %202 : vector<8x4xf32>
    %232 = vector.extract_strided_slice %207 {offsets = [0, 3], sizes = [8, 1], strides = [1, 1]} : vector<8x4xf32> to vector<8x1xf32>
    %233 = vector.broadcast %232 : vector<8x1xf32> to vector<8x4xf32>
    %234 = arith.mulf %233, %207 : vector<8x4xf32>
    %235 = arith.addf %231, %234 : vector<8x4xf32>
    %236 = tpu.concatenate %214, %221, %228, %235 in 1 : vector<8x4xf32>, vector<8x4xf32>, vector<8x4xf32>, vector<8x4xf32> -> vector<8x16xf32>
    %237 = vector.extract_strided_slice %236 {offsets = [0, 0], sizes = [4, 16], strides = [1, 1]} : vector<8x16xf32> to vector<4x16xf32>
    %cst_71 = arith.constant dense<0.000000e+00> : vector<16xf32>
    %238 = vector.multi_reduction <add>, %237, %cst_71 [0] : vector<4x16xf32> to vector<16xf32>
    %239 = vector.shape_cast %238 : vector<16xf32> to vector<1x16xf32>
    %240 = vector.extract_strided_slice %236 {offsets = [4, 0], sizes = [4, 16], strides = [1, 1]} : vector<8x16xf32> to vector<4x16xf32>
    %cst_72 = arith.constant dense<0.000000e+00> : vector<16xf32>
    %241 = vector.multi_reduction <add>, %240, %cst_72 [0] : vector<4x16xf32> to vector<16xf32>
    %242 = vector.shape_cast %241 : vector<16xf32> to vector<1x16xf32>
    %243 = tpu.concatenate %239, %242 in 0 : vector<1x16xf32>, vector<1x16xf32> -> vector<2x16xf32>
    %c1_73 = arith.constant 1 : index
    %c0_74 = arith.constant 0 : index
    %c0_75 = arith.constant 0 : index
    %244 = vector.load %arg9[%c1_73, %c0_74, %c0_75] : memref<8x2x16xf32, #tpu.memory_space<vmem>>, vector<1x2x16xf32>
    %245 = vector.shape_cast %244 : vector<1x2x16xf32> to vector<2x16xf32>
    %246 = vector.shape_cast %243 : vector<2x16xf32> to vector<1x2x16xf32>
    tpu.vector_store %arg9[%c1_73, %c0_74, %c0_75], %246 {strides = array<i32>} : memref<8x2x16xf32, #tpu.memory_space<vmem>>, vector<1x2x16xf32>,
    %c0_76 = arith.constant 0 : index
    %c2_77 = arith.constant 2 : index
    %247 = memref.load %arg4[%c0_76, %c2_77] : memref<3x8xf32, #tpu.memory_space<smem>>
    %248 = vector.broadcast %247 : f32 to vector<8x256xf32>
    %249 = arith.mulf %0, %248 : vector<8x256xf32>
    %c1_78 = arith.constant 1 : index
    %c2_79 = arith.constant 2 : index
    %250 = memref.load %arg4[%c1_78, %c2_79] : memref<3x8xf32, #tpu.memory_space<smem>>
    %251 = vector.broadcast %250 : f32 to vector<8x256xf32>
    %252 = arith.mulf %1, %251 : vector<8x256xf32>
    %253 = arith.addf %249, %252 : vector<8x256xf32>
    %c2_80 = arith.constant 2 : index
    %c2_81 = arith.constant 2 : index
    %254 = memref.load %arg4[%c2_80, %c2_81] : memref<3x8xf32, #tpu.memory_space<smem>>
    %255 = vector.broadcast %254 : f32 to vector<8x256xf32>
    %256 = arith.mulf %2, %255 : vector<8x256xf32>
    %257 = arith.addf %253, %256 : vector<8x256xf32>
    %c0_82 = arith.constant 0 : index
    %c2_83 = arith.constant 2 : index
    %258 = memref.load %arg5[%c0_82, %c2_83] : memref<1x8xf32, #tpu.memory_space<smem>>
    %259 = vector.broadcast %258 : f32 to vector<8x256xf32>
    %260 = arith.addf %257, %259 : vector<8x256xf32>
    %cst_84 = arith.constant 1.000000e+02 : f32
    %261 = vector.broadcast %cst_84 : f32 to vector<8x256xf32>
    %262 = arith.mulf %260, %261 : vector<8x256xf32>
    %cst_85 = arith.constant dense<0xFF800000> : vector<8xf32>
    %263 = vector.multi_reduction <maximumf>, %262, %cst_85 [1] : vector<8x256xf32> to vector<8xf32>
    %264 = vector.shape_cast %263 : vector<8xf32> to vector<8x1xf32>
    %265 = vector.broadcast %264 : vector<8x1xf32> to vector<8x256xf32>
    %266 = arith.subf %262, %265 : vector<8x256xf32>
    %267 = math.exp %266 : vector<8x256xf32>
    %cst_86 = arith.constant dense<0.000000e+00> : vector<8xf32>
    %268 = vector.multi_reduction <add>, %267, %cst_86 [1] : vector<8x256xf32> to vector<8xf32>
    %269 = vector.shape_cast %268 : vector<8xf32> to vector<8x1xf32>
    %270 = arith.mulf %267, %10 : vector<8x256xf32>
    %cst_87 = arith.constant dense<0.000000e+00> : vector<8xf32>
    %271 = vector.multi_reduction <add>, %270, %cst_87 [1] : vector<8x256xf32> to vector<8xf32>
    %272 = vector.shape_cast %271 : vector<8xf32> to vector<8x1xf32>
    %273 = arith.mulf %267, %7 : vector<8x256xf32>
    %cst_88 = arith.constant dense<0.000000e+00> : vector<8xf32>
    %274 = vector.multi_reduction <add>, %273, %cst_88 [1] : vector<8x256xf32> to vector<8xf32>
    %275 = vector.shape_cast %274 : vector<8xf32> to vector<8x1xf32>
    %276 = tpu.reciprocal %269 {approx = true} : vector<8x1xf32> -> vector<8x1xf32>
    %277 = arith.mulf %269, %276 : vector<8x1xf32>
    %cst_89 = arith.constant 2.000000e+00 : f32
    %278 = vector.broadcast %cst_89 : f32 to vector<8x1xf32>
    %279 = arith.subf %278, %277 : vector<8x1xf32>
    %280 = arith.mulf %276, %279 : vector<8x1xf32>
    %281 = arith.mulf %272, %280 : vector<8x1xf32>
    %cst_90 = arith.constant 1.000000e+00 : f32
    %282 = vector.broadcast %cst_90 : f32 to vector<8x1xf32>
    %283 = arith.mulf %281, %282 : vector<8x1xf32>
    %284 = arith.mulf %275, %280 : vector<8x1xf32>
    %cst_91 = arith.constant 1.000000e+00 : f32
    %285 = vector.broadcast %cst_91 : f32 to vector<8x1xf32>
    %286 = arith.mulf %284, %285 : vector<8x1xf32>
    %c0_92 = arith.constant 0 : index
    %c2_93 = arith.constant 2 : index
    %287 = memref.load %arg6[%c0_92, %c2_93] : memref<3x8xf32, #tpu.memory_space<smem>>
    %288 = vector.broadcast %287 : f32 to vector<8x1xf32>
    %289 = arith.mulf %14, %288 : vector<8x1xf32>
    %c1_94 = arith.constant 1 : index
    %c2_95 = arith.constant 2 : index
    %290 = memref.load %arg6[%c1_94, %c2_95] : memref<3x8xf32, #tpu.memory_space<smem>>
    %291 = vector.broadcast %290 : f32 to vector<8x1xf32>
    %292 = arith.mulf %18, %291 : vector<8x1xf32>
    %293 = arith.addf %289, %292 : vector<8x1xf32>
    %c2_96 = arith.constant 2 : index
    %c2_97 = arith.constant 2 : index
    %294 = memref.load %arg6[%c2_96, %c2_97] : memref<3x8xf32, #tpu.memory_space<smem>>
    %295 = vector.broadcast %294 : f32 to vector<8x1xf32>
    %296 = arith.mulf %22, %295 : vector<8x1xf32>
    %297 = arith.addf %293, %296 : vector<8x1xf32>
    %c0_98 = arith.constant 0 : index
    %c2_99 = arith.constant 2 : index
    %298 = memref.load %arg7[%c0_98, %c2_99] : memref<1x8xf32, #tpu.memory_space<smem>>
    %299 = vector.broadcast %298 : f32 to vector<8x1xf32>
    %300 = arith.addf %297, %299 : vector<8x1xf32>
    %cst_100 = arith.constant 0.000000e+00 : f32
    %301 = vector.broadcast %cst_100 : f32 to vector<8x1xf32>
    %302 = arith.subf %301, %300 : vector<8x1xf32>
    %303 = math.exp %302 : vector<8x1xf32>
    %cst_101 = arith.constant 1.000000e+00 : f32
    %304 = vector.broadcast %cst_101 : f32 to vector<8x1xf32>
    %305 = arith.addf %304, %303 : vector<8x1xf32>
    %cst_102 = arith.constant 1.000000e+00 : f32
    %306 = vector.broadcast %cst_102 : f32 to vector<8x1xf32>
    %307 = arith.divf %306, %305 : vector<8x1xf32>
    %308 = vector.broadcast %283 : vector<8x1xf32> to vector<8x4xf32>
    %309 = arith.mulf %308, %26 : vector<8x4xf32>
    %310 = arith.subf %309, %24 : vector<8x4xf32>
    %311 = vector.broadcast %307 : vector<8x1xf32> to vector<8x4xf32>
    %312 = arith.mulf %311, %310 : vector<8x4xf32>
    %313 = vector.broadcast %286 : vector<8x1xf32> to vector<8x4xf32>
    %314 = arith.mulf %313, %26 : vector<8x4xf32>
    %315 = arith.subf %314, %25 : vector<8x4xf32>
    %316 = vector.broadcast %307 : vector<8x1xf32> to vector<8x4xf32>
    %317 = arith.mulf %316, %315 : vector<8x4xf32>
    %318 = vector.extract_strided_slice %312 {offsets = [0, 0], sizes = [8, 1], strides = [1, 1]} : vector<8x4xf32> to vector<8x1xf32>
    %319 = vector.broadcast %318 : vector<8x1xf32> to vector<8x4xf32>
    %320 = arith.mulf %319, %312 : vector<8x4xf32>
    %321 = vector.extract_strided_slice %317 {offsets = [0, 0], sizes = [8, 1], strides = [1, 1]} : vector<8x4xf32> to vector<8x1xf32>
    %322 = vector.broadcast %321 : vector<8x1xf32> to vector<8x4xf32>
    %323 = arith.mulf %322, %317 : vector<8x4xf32>
    %324 = arith.addf %320, %323 : vector<8x4xf32>
    %325 = vector.extract_strided_slice %312 {offsets = [0, 1], sizes = [8, 1], strides = [1, 1]} : vector<8x4xf32> to vector<8x1xf32>
    %326 = vector.broadcast %325 : vector<8x1xf32> to vector<8x4xf32>
    %327 = arith.mulf %326, %312 : vector<8x4xf32>
    %328 = vector.extract_strided_slice %317 {offsets = [0, 1], sizes = [8, 1], strides = [1, 1]} : vector<8x4xf32> to vector<8x1xf32>
    %329 = vector.broadcast %328 : vector<8x1xf32> to vector<8x4xf32>
    %330 = arith.mulf %329, %317 : vector<8x4xf32>
    %331 = arith.addf %327, %330 : vector<8x4xf32>
    %332 = vector.extract_strided_slice %312 {offsets = [0, 2], sizes = [8, 1], strides = [1, 1]} : vector<8x4xf32> to vector<8x1xf32>
    %333 = vector.broadcast %332 : vector<8x1xf32> to vector<8x4xf32>
    %334 = arith.mulf %333, %312 : vector<8x4xf32>
    %335 = vector.extract_strided_slice %317 {offsets = [0, 2], sizes = [8, 1], strides = [1, 1]} : vector<8x4xf32> to vector<8x1xf32>
    %336 = vector.broadcast %335 : vector<8x1xf32> to vector<8x4xf32>
    %337 = arith.mulf %336, %317 : vector<8x4xf32>
    %338 = arith.addf %334, %337 : vector<8x4xf32>
    %339 = vector.extract_strided_slice %312 {offsets = [0, 3], sizes = [8, 1], strides = [1, 1]} : vector<8x4xf32> to vector<8x1xf32>
    %340 = vector.broadcast %339 : vector<8x1xf32> to vector<8x4xf32>
    %341 = arith.mulf %340, %312 : vector<8x4xf32>
    %342 = vector.extract_strided_slice %317 {offsets = [0, 3], sizes = [8, 1], strides = [1, 1]} : vector<8x4xf32> to vector<8x1xf32>
    %343 = vector.broadcast %342 : vector<8x1xf32> to vector<8x4xf32>
    %344 = arith.mulf %343, %317 : vector<8x4xf32>
    %345 = arith.addf %341, %344 : vector<8x4xf32>
    %346 = tpu.concatenate %324, %331, %338, %345 in 1 : vector<8x4xf32>, vector<8x4xf32>, vector<8x4xf32>, vector<8x4xf32> -> vector<8x16xf32>
    %347 = vector.extract_strided_slice %346 {offsets = [0, 0], sizes = [4, 16], strides = [1, 1]} : vector<8x16xf32> to vector<4x16xf32>
    %cst_103 = arith.constant dense<0.000000e+00> : vector<16xf32>
    %348 = vector.multi_reduction <add>, %347, %cst_103 [0] : vector<4x16xf32> to vector<16xf32>
    %349 = vector.shape_cast %348 : vector<16xf32> to vector<1x16xf32>
    %350 = vector.extract_strided_slice %346 {offsets = [4, 0], sizes = [4, 16], strides = [1, 1]} : vector<8x16xf32> to vector<4x16xf32>
    %cst_104 = arith.constant dense<0.000000e+00> : vector<16xf32>
    %351 = vector.multi_reduction <add>, %350, %cst_104 [0] : vector<4x16xf32> to vector<16xf32>
    %352 = vector.shape_cast %351 : vector<16xf32> to vector<1x16xf32>
    %353 = tpu.concatenate %349, %352 in 0 : vector<1x16xf32>, vector<1x16xf32> -> vector<2x16xf32>
    %c2_105 = arith.constant 2 : index
    %c0_106 = arith.constant 0 : index
    %c0_107 = arith.constant 0 : index
    %354 = vector.load %arg9[%c2_105, %c0_106, %c0_107] : memref<8x2x16xf32, #tpu.memory_space<vmem>>, vector<1x2x16xf32>
    %355 = vector.shape_cast %354 : vector<1x2x16xf32> to vector<2x16xf32>
    %356 = vector.shape_cast %353 : vector<2x16xf32> to vector<1x2x16xf32>
    tpu.vector_store %arg9[%c2_105, %c0_106, %c0_107], %356 {strides = array<i32>} : memref<8x2x16xf32, #tpu.memory_space<vmem>>, vector<1x2x16xf32>,
    %c0_108 = arith.constant 0 : index
    %c3 = arith.constant 3 : index
    %357 = memref.load %arg4[%c0_108, %c3] : memref<3x8xf32, #tpu.memory_space<smem>>
    %358 = vector.broadcast %357 : f32 to vector<8x256xf32>
    %359 = arith.mulf %0, %358 : vector<8x256xf32>
    %c1_109 = arith.constant 1 : index
    %c3_110 = arith.constant 3 : index
    %360 = memref.load %arg4[%c1_109, %c3_110] : memref<3x8xf32, #tpu.memory_space<smem>>
    %361 = vector.broadcast %360 : f32 to vector<8x256xf32>
    %362 = arith.mulf %1, %361 : vector<8x256xf32>
    %363 = arith.addf %359, %362 : vector<8x256xf32>
    %c2_111 = arith.constant 2 : index
    %c3_112 = arith.constant 3 : index
    %364 = memref.load %arg4[%c2_111, %c3_112] : memref<3x8xf32, #tpu.memory_space<smem>>
    %365 = vector.broadcast %364 : f32 to vector<8x256xf32>
    %366 = arith.mulf %2, %365 : vector<8x256xf32>
    %367 = arith.addf %363, %366 : vector<8x256xf32>
    %c0_113 = arith.constant 0 : index
    %c3_114 = arith.constant 3 : index
    %368 = memref.load %arg5[%c0_113, %c3_114] : memref<1x8xf32, #tpu.memory_space<smem>>
    %369 = vector.broadcast %368 : f32 to vector<8x256xf32>
    %370 = arith.addf %367, %369 : vector<8x256xf32>
    %cst_115 = arith.constant 1.000000e+02 : f32
    %371 = vector.broadcast %cst_115 : f32 to vector<8x256xf32>
    %372 = arith.mulf %370, %371 : vector<8x256xf32>
    %cst_116 = arith.constant dense<0xFF800000> : vector<8xf32>
    %373 = vector.multi_reduction <maximumf>, %372, %cst_116 [1] : vector<8x256xf32> to vector<8xf32>
    %374 = vector.shape_cast %373 : vector<8xf32> to vector<8x1xf32>
    %375 = vector.broadcast %374 : vector<8x1xf32> to vector<8x256xf32>
    %376 = arith.subf %372, %375 : vector<8x256xf32>
    %377 = math.exp %376 : vector<8x256xf32>
    %cst_117 = arith.constant dense<0.000000e+00> : vector<8xf32>
    %378 = vector.multi_reduction <add>, %377, %cst_117 [1] : vector<8x256xf32> to vector<8xf32>
    %379 = vector.shape_cast %378 : vector<8xf32> to vector<8x1xf32>
    %380 = arith.mulf %377, %10 : vector<8x256xf32>
    %cst_118 = arith.constant dense<0.000000e+00> : vector<8xf32>
    %381 = vector.multi_reduction <add>, %380, %cst_118 [1] : vector<8x256xf32> to vector<8xf32>
    %382 = vector.shape_cast %381 : vector<8xf32> to vector<8x1xf32>
    %383 = arith.mulf %377, %7 : vector<8x256xf32>
    %cst_119 = arith.constant dense<0.000000e+00> : vector<8xf32>
    %384 = vector.multi_reduction <add>, %383, %cst_119 [1] : vector<8x256xf32> to vector<8xf32>
    %385 = vector.shape_cast %384 : vector<8xf32> to vector<8x1xf32>
    %386 = tpu.reciprocal %379 {approx = true} : vector<8x1xf32> -> vector<8x1xf32>
    %387 = arith.mulf %379, %386 : vector<8x1xf32>
    %cst_120 = arith.constant 2.000000e+00 : f32
    %388 = vector.broadcast %cst_120 : f32 to vector<8x1xf32>
    %389 = arith.subf %388, %387 : vector<8x1xf32>
    %390 = arith.mulf %386, %389 : vector<8x1xf32>
    %391 = arith.mulf %382, %390 : vector<8x1xf32>
    %cst_121 = arith.constant 1.000000e+00 : f32
    %392 = vector.broadcast %cst_121 : f32 to vector<8x1xf32>
    %393 = arith.mulf %391, %392 : vector<8x1xf32>
    %394 = arith.mulf %385, %390 : vector<8x1xf32>
    %cst_122 = arith.constant 1.000000e+00 : f32
    %395 = vector.broadcast %cst_122 : f32 to vector<8x1xf32>
    %396 = arith.mulf %394, %395 : vector<8x1xf32>
    %c0_123 = arith.constant 0 : index
    %c3_124 = arith.constant 3 : index
    %397 = memref.load %arg6[%c0_123, %c3_124] : memref<3x8xf32, #tpu.memory_space<smem>>
    %398 = vector.broadcast %397 : f32 to vector<8x1xf32>
    %399 = arith.mulf %14, %398 : vector<8x1xf32>
    %c1_125 = arith.constant 1 : index
    %c3_126 = arith.constant 3 : index
    %400 = memref.load %arg6[%c1_125, %c3_126] : memref<3x8xf32, #tpu.memory_space<smem>>
    %401 = vector.broadcast %400 : f32 to vector<8x1xf32>
    %402 = arith.mulf %18, %401 : vector<8x1xf32>
    %403 = arith.addf %399, %402 : vector<8x1xf32>
    %c2_127 = arith.constant 2 : index
    %c3_128 = arith.constant 3 : index
    %404 = memref.load %arg6[%c2_127, %c3_128] : memref<3x8xf32, #tpu.memory_space<smem>>
    %405 = vector.broadcast %404 : f32 to vector<8x1xf32>
    %406 = arith.mulf %22, %405 : vector<8x1xf32>
    %407 = arith.addf %403, %406 : vector<8x1xf32>
    %c0_129 = arith.constant 0 : index
    %c3_130 = arith.constant 3 : index
    %408 = memref.load %arg7[%c0_129, %c3_130] : memref<1x8xf32, #tpu.memory_space<smem>>
    %409 = vector.broadcast %408 : f32 to vector<8x1xf32>
    %410 = arith.addf %407, %409 : vector<8x1xf32>
    %cst_131 = arith.constant 0.000000e+00 : f32
    %411 = vector.broadcast %cst_131 : f32 to vector<8x1xf32>
    %412 = arith.subf %411, %410 : vector<8x1xf32>
    %413 = math.exp %412 : vector<8x1xf32>
    %cst_132 = arith.constant 1.000000e+00 : f32
    %414 = vector.broadcast %cst_132 : f32 to vector<8x1xf32>
    %415 = arith.addf %414, %413 : vector<8x1xf32>
    %cst_133 = arith.constant 1.000000e+00 : f32
    %416 = vector.broadcast %cst_133 : f32 to vector<8x1xf32>
    %417 = arith.divf %416, %415 : vector<8x1xf32>
    %418 = vector.broadcast %393 : vector<8x1xf32> to vector<8x4xf32>
    %419 = arith.mulf %418, %26 : vector<8x4xf32>
    %420 = arith.subf %419, %24 : vector<8x4xf32>
    %421 = vector.broadcast %417 : vector<8x1xf32> to vector<8x4xf32>
    %422 = arith.mulf %421, %420 : vector<8x4xf32>
    %423 = vector.broadcast %396 : vector<8x1xf32> to vector<8x4xf32>
    %424 = arith.mulf %423, %26 : vector<8x4xf32>
    %425 = arith.subf %424, %25 : vector<8x4xf32>
    %426 = vector.broadcast %417 : vector<8x1xf32> to vector<8x4xf32>
    %427 = arith.mulf %426, %425 : vector<8x4xf32>
    %428 = vector.extract_strided_slice %422 {offsets = [0, 0], sizes = [8, 1], strides = [1, 1]} : vector<8x4xf32> to vector<8x1xf32>
    %429 = vector.broadcast %428 : vector<8x1xf32> to vector<8x4xf32>
    %430 = arith.mulf %429, %422 : vector<8x4xf32>
    %431 = vector.extract_strided_slice %427 {offsets = [0, 0], sizes = [8, 1], strides = [1, 1]} : vector<8x4xf32> to vector<8x1xf32>
    %432 = vector.broadcast %431 : vector<8x1xf32> to vector<8x4xf32>
    %433 = arith.mulf %432, %427 : vector<8x4xf32>
    %434 = arith.addf %430, %433 : vector<8x4xf32>
    %435 = vector.extract_strided_slice %422 {offsets = [0, 1], sizes = [8, 1], strides = [1, 1]} : vector<8x4xf32> to vector<8x1xf32>
    %436 = vector.broadcast %435 : vector<8x1xf32> to vector<8x4xf32>
    %437 = arith.mulf %436, %422 : vector<8x4xf32>
    %438 = vector.extract_strided_slice %427 {offsets = [0, 1], sizes = [8, 1], strides = [1, 1]} : vector<8x4xf32> to vector<8x1xf32>
    %439 = vector.broadcast %438 : vector<8x1xf32> to vector<8x4xf32>
    %440 = arith.mulf %439, %427 : vector<8x4xf32>
    %441 = arith.addf %437, %440 : vector<8x4xf32>
    %442 = vector.extract_strided_slice %422 {offsets = [0, 2], sizes = [8, 1], strides = [1, 1]} : vector<8x4xf32> to vector<8x1xf32>
    %443 = vector.broadcast %442 : vector<8x1xf32> to vector<8x4xf32>
    %444 = arith.mulf %443, %422 : vector<8x4xf32>
    %445 = vector.extract_strided_slice %427 {offsets = [0, 2], sizes = [8, 1], strides = [1, 1]} : vector<8x4xf32> to vector<8x1xf32>
    %446 = vector.broadcast %445 : vector<8x1xf32> to vector<8x4xf32>
    %447 = arith.mulf %446, %427 : vector<8x4xf32>
    %448 = arith.addf %444, %447 : vector<8x4xf32>
    %449 = vector.extract_strided_slice %422 {offsets = [0, 3], sizes = [8, 1], strides = [1, 1]} : vector<8x4xf32> to vector<8x1xf32>
    %450 = vector.broadcast %449 : vector<8x1xf32> to vector<8x4xf32>
    %451 = arith.mulf %450, %422 : vector<8x4xf32>
    %452 = vector.extract_strided_slice %427 {offsets = [0, 3], sizes = [8, 1], strides = [1, 1]} : vector<8x4xf32> to vector<8x1xf32>
    %453 = vector.broadcast %452 : vector<8x1xf32> to vector<8x4xf32>
    %454 = arith.mulf %453, %427 : vector<8x4xf32>
    %455 = arith.addf %451, %454 : vector<8x4xf32>
    %456 = tpu.concatenate %434, %441, %448, %455 in 1 : vector<8x4xf32>, vector<8x4xf32>, vector<8x4xf32>, vector<8x4xf32> -> vector<8x16xf32>
    %457 = vector.extract_strided_slice %456 {offsets = [0, 0], sizes = [4, 16], strides = [1, 1]} : vector<8x16xf32> to vector<4x16xf32>
    %cst_134 = arith.constant dense<0.000000e+00> : vector<16xf32>
    %458 = vector.multi_reduction <add>, %457, %cst_134 [0] : vector<4x16xf32> to vector<16xf32>
    %459 = vector.shape_cast %458 : vector<16xf32> to vector<1x16xf32>
    %460 = vector.extract_strided_slice %456 {offsets = [4, 0], sizes = [4, 16], strides = [1, 1]} : vector<8x16xf32> to vector<4x16xf32>
    %cst_135 = arith.constant dense<0.000000e+00> : vector<16xf32>
    %461 = vector.multi_reduction <add>, %460, %cst_135 [0] : vector<4x16xf32> to vector<16xf32>
    %462 = vector.shape_cast %461 : vector<16xf32> to vector<1x16xf32>
    %463 = tpu.concatenate %459, %462 in 0 : vector<1x16xf32>, vector<1x16xf32> -> vector<2x16xf32>
    %c3_136 = arith.constant 3 : index
    %c0_137 = arith.constant 0 : index
    %c0_138 = arith.constant 0 : index
    %464 = vector.load %arg9[%c3_136, %c0_137, %c0_138] : memref<8x2x16xf32, #tpu.memory_space<vmem>>, vector<1x2x16xf32>
    %465 = vector.shape_cast %464 : vector<1x2x16xf32> to vector<2x16xf32>
    %466 = vector.shape_cast %463 : vector<2x16xf32> to vector<1x2x16xf32>
    tpu.vector_store %arg9[%c3_136, %c0_137, %c0_138], %466 {strides = array<i32>} : memref<8x2x16xf32, #tpu.memory_space<vmem>>, vector<1x2x16xf32>,
    %c0_139 = arith.constant 0 : index
    %c4 = arith.constant 4 : index
    %467 = memref.load %arg4[%c0_139, %c4] : memref<3x8xf32, #tpu.memory_space<smem>>
    %468 = vector.broadcast %467 : f32 to vector<8x256xf32>
    %469 = arith.mulf %0, %468 : vector<8x256xf32>
    %c1_140 = arith.constant 1 : index
    %c4_141 = arith.constant 4 : index
    %470 = memref.load %arg4[%c1_140, %c4_141] : memref<3x8xf32, #tpu.memory_space<smem>>
    %471 = vector.broadcast %470 : f32 to vector<8x256xf32>
    %472 = arith.mulf %1, %471 : vector<8x256xf32>
    %473 = arith.addf %469, %472 : vector<8x256xf32>
    %c2_142 = arith.constant 2 : index
    %c4_143 = arith.constant 4 : index
    %474 = memref.load %arg4[%c2_142, %c4_143] : memref<3x8xf32, #tpu.memory_space<smem>>
    %475 = vector.broadcast %474 : f32 to vector<8x256xf32>
    %476 = arith.mulf %2, %475 : vector<8x256xf32>
    %477 = arith.addf %473, %476 : vector<8x256xf32>
    %c0_144 = arith.constant 0 : index
    %c4_145 = arith.constant 4 : index
    %478 = memref.load %arg5[%c0_144, %c4_145] : memref<1x8xf32, #tpu.memory_space<smem>>
    %479 = vector.broadcast %478 : f32 to vector<8x256xf32>
    %480 = arith.addf %477, %479 : vector<8x256xf32>
    %cst_146 = arith.constant 1.000000e+02 : f32
    %481 = vector.broadcast %cst_146 : f32 to vector<8x256xf32>
    %482 = arith.mulf %480, %481 : vector<8x256xf32>
    %cst_147 = arith.constant dense<0xFF800000> : vector<8xf32>
    %483 = vector.multi_reduction <maximumf>, %482, %cst_147 [1] : vector<8x256xf32> to vector<8xf32>
    %484 = vector.shape_cast %483 : vector<8xf32> to vector<8x1xf32>
    %485 = vector.broadcast %484 : vector<8x1xf32> to vector<8x256xf32>
    %486 = arith.subf %482, %485 : vector<8x256xf32>
    %487 = math.exp %486 : vector<8x256xf32>
    %cst_148 = arith.constant dense<0.000000e+00> : vector<8xf32>
    %488 = vector.multi_reduction <add>, %487, %cst_148 [1] : vector<8x256xf32> to vector<8xf32>
    %489 = vector.shape_cast %488 : vector<8xf32> to vector<8x1xf32>
    %490 = arith.mulf %487, %10 : vector<8x256xf32>
    %cst_149 = arith.constant dense<0.000000e+00> : vector<8xf32>
    %491 = vector.multi_reduction <add>, %490, %cst_149 [1] : vector<8x256xf32> to vector<8xf32>
    %492 = vector.shape_cast %491 : vector<8xf32> to vector<8x1xf32>
    %493 = arith.mulf %487, %7 : vector<8x256xf32>
    %cst_150 = arith.constant dense<0.000000e+00> : vector<8xf32>
    %494 = vector.multi_reduction <add>, %493, %cst_150 [1] : vector<8x256xf32> to vector<8xf32>
    %495 = vector.shape_cast %494 : vector<8xf32> to vector<8x1xf32>
    %496 = tpu.reciprocal %489 {approx = true} : vector<8x1xf32> -> vector<8x1xf32>
    %497 = arith.mulf %489, %496 : vector<8x1xf32>
    %cst_151 = arith.constant 2.000000e+00 : f32
    %498 = vector.broadcast %cst_151 : f32 to vector<8x1xf32>
    %499 = arith.subf %498, %497 : vector<8x1xf32>
    %500 = arith.mulf %496, %499 : vector<8x1xf32>
    %501 = arith.mulf %492, %500 : vector<8x1xf32>
    %cst_152 = arith.constant 1.000000e+00 : f32
    %502 = vector.broadcast %cst_152 : f32 to vector<8x1xf32>
    %503 = arith.mulf %501, %502 : vector<8x1xf32>
    %504 = arith.mulf %495, %500 : vector<8x1xf32>
    %cst_153 = arith.constant 1.000000e+00 : f32
    %505 = vector.broadcast %cst_153 : f32 to vector<8x1xf32>
    %506 = arith.mulf %504, %505 : vector<8x1xf32>
    %c0_154 = arith.constant 0 : index
    %c4_155 = arith.constant 4 : index
    %507 = memref.load %arg6[%c0_154, %c4_155] : memref<3x8xf32, #tpu.memory_space<smem>>
    %508 = vector.broadcast %507 : f32 to vector<8x1xf32>
    %509 = arith.mulf %14, %508 : vector<8x1xf32>
    %c1_156 = arith.constant 1 : index
    %c4_157 = arith.constant 4 : index
    %510 = memref.load %arg6[%c1_156, %c4_157] : memref<3x8xf32, #tpu.memory_space<smem>>
    %511 = vector.broadcast %510 : f32 to vector<8x1xf32>
    %512 = arith.mulf %18, %511 : vector<8x1xf32>
    %513 = arith.addf %509, %512 : vector<8x1xf32>
    %c2_158 = arith.constant 2 : index
    %c4_159 = arith.constant 4 : index
    %514 = memref.load %arg6[%c2_158, %c4_159] : memref<3x8xf32, #tpu.memory_space<smem>>
    %515 = vector.broadcast %514 : f32 to vector<8x1xf32>
    %516 = arith.mulf %22, %515 : vector<8x1xf32>
    %517 = arith.addf %513, %516 : vector<8x1xf32>
    %c0_160 = arith.constant 0 : index
    %c4_161 = arith.constant 4 : index
    %518 = memref.load %arg7[%c0_160, %c4_161] : memref<1x8xf32, #tpu.memory_space<smem>>
    %519 = vector.broadcast %518 : f32 to vector<8x1xf32>
    %520 = arith.addf %517, %519 : vector<8x1xf32>
    %cst_162 = arith.constant 0.000000e+00 : f32
    %521 = vector.broadcast %cst_162 : f32 to vector<8x1xf32>
    %522 = arith.subf %521, %520 : vector<8x1xf32>
    %523 = math.exp %522 : vector<8x1xf32>
    %cst_163 = arith.constant 1.000000e+00 : f32
    %524 = vector.broadcast %cst_163 : f32 to vector<8x1xf32>
    %525 = arith.addf %524, %523 : vector<8x1xf32>
    %cst_164 = arith.constant 1.000000e+00 : f32
    %526 = vector.broadcast %cst_164 : f32 to vector<8x1xf32>
    %527 = arith.divf %526, %525 : vector<8x1xf32>
    %528 = vector.broadcast %503 : vector<8x1xf32> to vector<8x4xf32>
    %529 = arith.mulf %528, %26 : vector<8x4xf32>
    %530 = arith.subf %529, %24 : vector<8x4xf32>
    %531 = vector.broadcast %527 : vector<8x1xf32> to vector<8x4xf32>
    %532 = arith.mulf %531, %530 : vector<8x4xf32>
    %533 = vector.broadcast %506 : vector<8x1xf32> to vector<8x4xf32>
    %534 = arith.mulf %533, %26 : vector<8x4xf32>
    %535 = arith.subf %534, %25 : vector<8x4xf32>
    %536 = vector.broadcast %527 : vector<8x1xf32> to vector<8x4xf32>
    %537 = arith.mulf %536, %535 : vector<8x4xf32>
    %538 = vector.extract_strided_slice %532 {offsets = [0, 0], sizes = [8, 1], strides = [1, 1]} : vector<8x4xf32> to vector<8x1xf32>
    %539 = vector.broadcast %538 : vector<8x1xf32> to vector<8x4xf32>
    %540 = arith.mulf %539, %532 : vector<8x4xf32>
    %541 = vector.extract_strided_slice %537 {offsets = [0, 0], sizes = [8, 1], strides = [1, 1]} : vector<8x4xf32> to vector<8x1xf32>
    %542 = vector.broadcast %541 : vector<8x1xf32> to vector<8x4xf32>
    %543 = arith.mulf %542, %537 : vector<8x4xf32>
    %544 = arith.addf %540, %543 : vector<8x4xf32>
    %545 = vector.extract_strided_slice %532 {offsets = [0, 1], sizes = [8, 1], strides = [1, 1]} : vector<8x4xf32> to vector<8x1xf32>
    %546 = vector.broadcast %545 : vector<8x1xf32> to vector<8x4xf32>
    %547 = arith.mulf %546, %532 : vector<8x4xf32>
    %548 = vector.extract_strided_slice %537 {offsets = [0, 1], sizes = [8, 1], strides = [1, 1]} : vector<8x4xf32> to vector<8x1xf32>
    %549 = vector.broadcast %548 : vector<8x1xf32> to vector<8x4xf32>
    %550 = arith.mulf %549, %537 : vector<8x4xf32>
    %551 = arith.addf %547, %550 : vector<8x4xf32>
    %552 = vector.extract_strided_slice %532 {offsets = [0, 2], sizes = [8, 1], strides = [1, 1]} : vector<8x4xf32> to vector<8x1xf32>
    %553 = vector.broadcast %552 : vector<8x1xf32> to vector<8x4xf32>
    %554 = arith.mulf %553, %532 : vector<8x4xf32>
    %555 = vector.extract_strided_slice %537 {offsets = [0, 2], sizes = [8, 1], strides = [1, 1]} : vector<8x4xf32> to vector<8x1xf32>
    %556 = vector.broadcast %555 : vector<8x1xf32> to vector<8x4xf32>
    %557 = arith.mulf %556, %537 : vector<8x4xf32>
    %558 = arith.addf %554, %557 : vector<8x4xf32>
    %559 = vector.extract_strided_slice %532 {offsets = [0, 3], sizes = [8, 1], strides = [1, 1]} : vector<8x4xf32> to vector<8x1xf32>
    %560 = vector.broadcast %559 : vector<8x1xf32> to vector<8x4xf32>
    %561 = arith.mulf %560, %532 : vector<8x4xf32>
    %562 = vector.extract_strided_slice %537 {offsets = [0, 3], sizes = [8, 1], strides = [1, 1]} : vector<8x4xf32> to vector<8x1xf32>
    %563 = vector.broadcast %562 : vector<8x1xf32> to vector<8x4xf32>
    %564 = arith.mulf %563, %537 : vector<8x4xf32>
    %565 = arith.addf %561, %564 : vector<8x4xf32>
    %566 = tpu.concatenate %544, %551, %558, %565 in 1 : vector<8x4xf32>, vector<8x4xf32>, vector<8x4xf32>, vector<8x4xf32> -> vector<8x16xf32>
    %567 = vector.extract_strided_slice %566 {offsets = [0, 0], sizes = [4, 16], strides = [1, 1]} : vector<8x16xf32> to vector<4x16xf32>
    %cst_165 = arith.constant dense<0.000000e+00> : vector<16xf32>
    %568 = vector.multi_reduction <add>, %567, %cst_165 [0] : vector<4x16xf32> to vector<16xf32>
    %569 = vector.shape_cast %568 : vector<16xf32> to vector<1x16xf32>
    %570 = vector.extract_strided_slice %566 {offsets = [4, 0], sizes = [4, 16], strides = [1, 1]} : vector<8x16xf32> to vector<4x16xf32>
    %cst_166 = arith.constant dense<0.000000e+00> : vector<16xf32>
    %571 = vector.multi_reduction <add>, %570, %cst_166 [0] : vector<4x16xf32> to vector<16xf32>
    %572 = vector.shape_cast %571 : vector<16xf32> to vector<1x16xf32>
    %573 = tpu.concatenate %569, %572 in 0 : vector<1x16xf32>, vector<1x16xf32> -> vector<2x16xf32>
    %c4_167 = arith.constant 4 : index
    %c0_168 = arith.constant 0 : index
    %c0_169 = arith.constant 0 : index
    %574 = vector.load %arg9[%c4_167, %c0_168, %c0_169] : memref<8x2x16xf32, #tpu.memory_space<vmem>>, vector<1x2x16xf32>
    %575 = vector.shape_cast %574 : vector<1x2x16xf32> to vector<2x16xf32>
    %576 = vector.shape_cast %573 : vector<2x16xf32> to vector<1x2x16xf32>
    tpu.vector_store %arg9[%c4_167, %c0_168, %c0_169], %576 {strides = array<i32>} : memref<8x2x16xf32, #tpu.memory_space<vmem>>, vector<1x2x16xf32>,
    %c0_170 = arith.constant 0 : index
    %c5 = arith.constant 5 : index
    %577 = memref.load %arg4[%c0_170, %c5] : memref<3x8xf32, #tpu.memory_space<smem>>
    %578 = vector.broadcast %577 : f32 to vector<8x256xf32>
    %579 = arith.mulf %0, %578 : vector<8x256xf32>
    %c1_171 = arith.constant 1 : index
    %c5_172 = arith.constant 5 : index
    %580 = memref.load %arg4[%c1_171, %c5_172] : memref<3x8xf32, #tpu.memory_space<smem>>
    %581 = vector.broadcast %580 : f32 to vector<8x256xf32>
    %582 = arith.mulf %1, %581 : vector<8x256xf32>
    %583 = arith.addf %579, %582 : vector<8x256xf32>
    %c2_173 = arith.constant 2 : index
    %c5_174 = arith.constant 5 : index
    %584 = memref.load %arg4[%c2_173, %c5_174] : memref<3x8xf32, #tpu.memory_space<smem>>
    %585 = vector.broadcast %584 : f32 to vector<8x256xf32>
    %586 = arith.mulf %2, %585 : vector<8x256xf32>
    %587 = arith.addf %583, %586 : vector<8x256xf32>
    %c0_175 = arith.constant 0 : index
    %c5_176 = arith.constant 5 : index
    %588 = memref.load %arg5[%c0_175, %c5_176] : memref<1x8xf32, #tpu.memory_space<smem>>
    %589 = vector.broadcast %588 : f32 to vector<8x256xf32>
    %590 = arith.addf %587, %589 : vector<8x256xf32>
    %cst_177 = arith.constant 1.000000e+02 : f32
    %591 = vector.broadcast %cst_177 : f32 to vector<8x256xf32>
    %592 = arith.mulf %590, %591 : vector<8x256xf32>
    %cst_178 = arith.constant dense<0xFF800000> : vector<8xf32>
    %593 = vector.multi_reduction <maximumf>, %592, %cst_178 [1] : vector<8x256xf32> to vector<8xf32>
    %594 = vector.shape_cast %593 : vector<8xf32> to vector<8x1xf32>
    %595 = vector.broadcast %594 : vector<8x1xf32> to vector<8x256xf32>
    %596 = arith.subf %592, %595 : vector<8x256xf32>
    %597 = math.exp %596 : vector<8x256xf32>
    %cst_179 = arith.constant dense<0.000000e+00> : vector<8xf32>
    %598 = vector.multi_reduction <add>, %597, %cst_179 [1] : vector<8x256xf32> to vector<8xf32>
    %599 = vector.shape_cast %598 : vector<8xf32> to vector<8x1xf32>
    %600 = arith.mulf %597, %10 : vector<8x256xf32>
    %cst_180 = arith.constant dense<0.000000e+00> : vector<8xf32>
    %601 = vector.multi_reduction <add>, %600, %cst_180 [1] : vector<8x256xf32> to vector<8xf32>
    %602 = vector.shape_cast %601 : vector<8xf32> to vector<8x1xf32>
    %603 = arith.mulf %597, %7 : vector<8x256xf32>
    %cst_181 = arith.constant dense<0.000000e+00> : vector<8xf32>
    %604 = vector.multi_reduction <add>, %603, %cst_181 [1] : vector<8x256xf32> to vector<8xf32>
    %605 = vector.shape_cast %604 : vector<8xf32> to vector<8x1xf32>
    %606 = tpu.reciprocal %599 {approx = true} : vector<8x1xf32> -> vector<8x1xf32>
    %607 = arith.mulf %599, %606 : vector<8x1xf32>
    %cst_182 = arith.constant 2.000000e+00 : f32
    %608 = vector.broadcast %cst_182 : f32 to vector<8x1xf32>
    %609 = arith.subf %608, %607 : vector<8x1xf32>
    %610 = arith.mulf %606, %609 : vector<8x1xf32>
    %611 = arith.mulf %602, %610 : vector<8x1xf32>
    %cst_183 = arith.constant 1.000000e+00 : f32
    %612 = vector.broadcast %cst_183 : f32 to vector<8x1xf32>
    %613 = arith.mulf %611, %612 : vector<8x1xf32>
    %614 = arith.mulf %605, %610 : vector<8x1xf32>
    %cst_184 = arith.constant 1.000000e+00 : f32
    %615 = vector.broadcast %cst_184 : f32 to vector<8x1xf32>
    %616 = arith.mulf %614, %615 : vector<8x1xf32>
    %c0_185 = arith.constant 0 : index
    %c5_186 = arith.constant 5 : index
    %617 = memref.load %arg6[%c0_185, %c5_186] : memref<3x8xf32, #tpu.memory_space<smem>>
    %618 = vector.broadcast %617 : f32 to vector<8x1xf32>
    %619 = arith.mulf %14, %618 : vector<8x1xf32>
    %c1_187 = arith.constant 1 : index
    %c5_188 = arith.constant 5 : index
    %620 = memref.load %arg6[%c1_187, %c5_188] : memref<3x8xf32, #tpu.memory_space<smem>>
    %621 = vector.broadcast %620 : f32 to vector<8x1xf32>
    %622 = arith.mulf %18, %621 : vector<8x1xf32>
    %623 = arith.addf %619, %622 : vector<8x1xf32>
    %c2_189 = arith.constant 2 : index
    %c5_190 = arith.constant 5 : index
    %624 = memref.load %arg6[%c2_189, %c5_190] : memref<3x8xf32, #tpu.memory_space<smem>>
    %625 = vector.broadcast %624 : f32 to vector<8x1xf32>
    %626 = arith.mulf %22, %625 : vector<8x1xf32>
    %627 = arith.addf %623, %626 : vector<8x1xf32>
    %c0_191 = arith.constant 0 : index
    %c5_192 = arith.constant 5 : index
    %628 = memref.load %arg7[%c0_191, %c5_192] : memref<1x8xf32, #tpu.memory_space<smem>>
    %629 = vector.broadcast %628 : f32 to vector<8x1xf32>
    %630 = arith.addf %627, %629 : vector<8x1xf32>
    %cst_193 = arith.constant 0.000000e+00 : f32
    %631 = vector.broadcast %cst_193 : f32 to vector<8x1xf32>
    %632 = arith.subf %631, %630 : vector<8x1xf32>
    %633 = math.exp %632 : vector<8x1xf32>
    %cst_194 = arith.constant 1.000000e+00 : f32
    %634 = vector.broadcast %cst_194 : f32 to vector<8x1xf32>
    %635 = arith.addf %634, %633 : vector<8x1xf32>
    %cst_195 = arith.constant 1.000000e+00 : f32
    %636 = vector.broadcast %cst_195 : f32 to vector<8x1xf32>
    %637 = arith.divf %636, %635 : vector<8x1xf32>
    %638 = vector.broadcast %613 : vector<8x1xf32> to vector<8x4xf32>
    %639 = arith.mulf %638, %26 : vector<8x4xf32>
    %640 = arith.subf %639, %24 : vector<8x4xf32>
    %641 = vector.broadcast %637 : vector<8x1xf32> to vector<8x4xf32>
    %642 = arith.mulf %641, %640 : vector<8x4xf32>
    %643 = vector.broadcast %616 : vector<8x1xf32> to vector<8x4xf32>
    %644 = arith.mulf %643, %26 : vector<8x4xf32>
    %645 = arith.subf %644, %25 : vector<8x4xf32>
    %646 = vector.broadcast %637 : vector<8x1xf32> to vector<8x4xf32>
    %647 = arith.mulf %646, %645 : vector<8x4xf32>
    %648 = vector.extract_strided_slice %642 {offsets = [0, 0], sizes = [8, 1], strides = [1, 1]} : vector<8x4xf32> to vector<8x1xf32>
    %649 = vector.broadcast %648 : vector<8x1xf32> to vector<8x4xf32>
    %650 = arith.mulf %649, %642 : vector<8x4xf32>
    %651 = vector.extract_strided_slice %647 {offsets = [0, 0], sizes = [8, 1], strides = [1, 1]} : vector<8x4xf32> to vector<8x1xf32>
    %652 = vector.broadcast %651 : vector<8x1xf32> to vector<8x4xf32>
    %653 = arith.mulf %652, %647 : vector<8x4xf32>
    %654 = arith.addf %650, %653 : vector<8x4xf32>
    %655 = vector.extract_strided_slice %642 {offsets = [0, 1], sizes = [8, 1], strides = [1, 1]} : vector<8x4xf32> to vector<8x1xf32>
    %656 = vector.broadcast %655 : vector<8x1xf32> to vector<8x4xf32>
    %657 = arith.mulf %656, %642 : vector<8x4xf32>
    %658 = vector.extract_strided_slice %647 {offsets = [0, 1], sizes = [8, 1], strides = [1, 1]} : vector<8x4xf32> to vector<8x1xf32>
    %659 = vector.broadcast %658 : vector<8x1xf32> to vector<8x4xf32>
    %660 = arith.mulf %659, %647 : vector<8x4xf32>
    %661 = arith.addf %657, %660 : vector<8x4xf32>
    %662 = vector.extract_strided_slice %642 {offsets = [0, 2], sizes = [8, 1], strides = [1, 1]} : vector<8x4xf32> to vector<8x1xf32>
    %663 = vector.broadcast %662 : vector<8x1xf32> to vector<8x4xf32>
    %664 = arith.mulf %663, %642 : vector<8x4xf32>
    %665 = vector.extract_strided_slice %647 {offsets = [0, 2], sizes = [8, 1], strides = [1, 1]} : vector<8x4xf32> to vector<8x1xf32>
    %666 = vector.broadcast %665 : vector<8x1xf32> to vector<8x4xf32>
    %667 = arith.mulf %666, %647 : vector<8x4xf32>
    %668 = arith.addf %664, %667 : vector<8x4xf32>
    %669 = vector.extract_strided_slice %642 {offsets = [0, 3], sizes = [8, 1], strides = [1, 1]} : vector<8x4xf32> to vector<8x1xf32>
    %670 = vector.broadcast %669 : vector<8x1xf32> to vector<8x4xf32>
    %671 = arith.mulf %670, %642 : vector<8x4xf32>
    %672 = vector.extract_strided_slice %647 {offsets = [0, 3], sizes = [8, 1], strides = [1, 1]} : vector<8x4xf32> to vector<8x1xf32>
    %673 = vector.broadcast %672 : vector<8x1xf32> to vector<8x4xf32>
    %674 = arith.mulf %673, %647 : vector<8x4xf32>
    %675 = arith.addf %671, %674 : vector<8x4xf32>
    %676 = tpu.concatenate %654, %661, %668, %675 in 1 : vector<8x4xf32>, vector<8x4xf32>, vector<8x4xf32>, vector<8x4xf32> -> vector<8x16xf32>
    %677 = vector.extract_strided_slice %676 {offsets = [0, 0], sizes = [4, 16], strides = [1, 1]} : vector<8x16xf32> to vector<4x16xf32>
    %cst_196 = arith.constant dense<0.000000e+00> : vector<16xf32>
    %678 = vector.multi_reduction <add>, %677, %cst_196 [0] : vector<4x16xf32> to vector<16xf32>
    %679 = vector.shape_cast %678 : vector<16xf32> to vector<1x16xf32>
    %680 = vector.extract_strided_slice %676 {offsets = [4, 0], sizes = [4, 16], strides = [1, 1]} : vector<8x16xf32> to vector<4x16xf32>
    %cst_197 = arith.constant dense<0.000000e+00> : vector<16xf32>
    %681 = vector.multi_reduction <add>, %680, %cst_197 [0] : vector<4x16xf32> to vector<16xf32>
    %682 = vector.shape_cast %681 : vector<16xf32> to vector<1x16xf32>
    %683 = tpu.concatenate %679, %682 in 0 : vector<1x16xf32>, vector<1x16xf32> -> vector<2x16xf32>
    %c5_198 = arith.constant 5 : index
    %c0_199 = arith.constant 0 : index
    %c0_200 = arith.constant 0 : index
    %684 = vector.load %arg9[%c5_198, %c0_199, %c0_200] : memref<8x2x16xf32, #tpu.memory_space<vmem>>, vector<1x2x16xf32>
    %685 = vector.shape_cast %684 : vector<1x2x16xf32> to vector<2x16xf32>
    %686 = vector.shape_cast %683 : vector<2x16xf32> to vector<1x2x16xf32>
    tpu.vector_store %arg9[%c5_198, %c0_199, %c0_200], %686 {strides = array<i32>} : memref<8x2x16xf32, #tpu.memory_space<vmem>>, vector<1x2x16xf32>,
    %c0_201 = arith.constant 0 : index
    %c6 = arith.constant 6 : index
    %687 = memref.load %arg4[%c0_201, %c6] : memref<3x8xf32, #tpu.memory_space<smem>>
    %688 = vector.broadcast %687 : f32 to vector<8x256xf32>
    %689 = arith.mulf %0, %688 : vector<8x256xf32>
    %c1_202 = arith.constant 1 : index
    %c6_203 = arith.constant 6 : index
    %690 = memref.load %arg4[%c1_202, %c6_203] : memref<3x8xf32, #tpu.memory_space<smem>>
    %691 = vector.broadcast %690 : f32 to vector<8x256xf32>
    %692 = arith.mulf %1, %691 : vector<8x256xf32>
    %693 = arith.addf %689, %692 : vector<8x256xf32>
    %c2_204 = arith.constant 2 : index
    %c6_205 = arith.constant 6 : index
    %694 = memref.load %arg4[%c2_204, %c6_205] : memref<3x8xf32, #tpu.memory_space<smem>>
    %695 = vector.broadcast %694 : f32 to vector<8x256xf32>
    %696 = arith.mulf %2, %695 : vector<8x256xf32>
    %697 = arith.addf %693, %696 : vector<8x256xf32>
    %c0_206 = arith.constant 0 : index
    %c6_207 = arith.constant 6 : index
    %698 = memref.load %arg5[%c0_206, %c6_207] : memref<1x8xf32, #tpu.memory_space<smem>>
    %699 = vector.broadcast %698 : f32 to vector<8x256xf32>
    %700 = arith.addf %697, %699 : vector<8x256xf32>
    %cst_208 = arith.constant 1.000000e+02 : f32
    %701 = vector.broadcast %cst_208 : f32 to vector<8x256xf32>
    %702 = arith.mulf %700, %701 : vector<8x256xf32>
    %cst_209 = arith.constant dense<0xFF800000> : vector<8xf32>
    %703 = vector.multi_reduction <maximumf>, %702, %cst_209 [1] : vector<8x256xf32> to vector<8xf32>
    %704 = vector.shape_cast %703 : vector<8xf32> to vector<8x1xf32>
    %705 = vector.broadcast %704 : vector<8x1xf32> to vector<8x256xf32>
    %706 = arith.subf %702, %705 : vector<8x256xf32>
    %707 = math.exp %706 : vector<8x256xf32>
    %cst_210 = arith.constant dense<0.000000e+00> : vector<8xf32>
    %708 = vector.multi_reduction <add>, %707, %cst_210 [1] : vector<8x256xf32> to vector<8xf32>
    %709 = vector.shape_cast %708 : vector<8xf32> to vector<8x1xf32>
    %710 = arith.mulf %707, %10 : vector<8x256xf32>
    %cst_211 = arith.constant dense<0.000000e+00> : vector<8xf32>
    %711 = vector.multi_reduction <add>, %710, %cst_211 [1] : vector<8x256xf32> to vector<8xf32>
    %712 = vector.shape_cast %711 : vector<8xf32> to vector<8x1xf32>
    %713 = arith.mulf %707, %7 : vector<8x256xf32>
    %cst_212 = arith.constant dense<0.000000e+00> : vector<8xf32>
    %714 = vector.multi_reduction <add>, %713, %cst_212 [1] : vector<8x256xf32> to vector<8xf32>
    %715 = vector.shape_cast %714 : vector<8xf32> to vector<8x1xf32>
    %716 = tpu.reciprocal %709 {approx = true} : vector<8x1xf32> -> vector<8x1xf32>
    %717 = arith.mulf %709, %716 : vector<8x1xf32>
    %cst_213 = arith.constant 2.000000e+00 : f32
    %718 = vector.broadcast %cst_213 : f32 to vector<8x1xf32>
    %719 = arith.subf %718, %717 : vector<8x1xf32>
    %720 = arith.mulf %716, %719 : vector<8x1xf32>
    %721 = arith.mulf %712, %720 : vector<8x1xf32>
    %cst_214 = arith.constant 1.000000e+00 : f32
    %722 = vector.broadcast %cst_214 : f32 to vector<8x1xf32>
    %723 = arith.mulf %721, %722 : vector<8x1xf32>
    %724 = arith.mulf %715, %720 : vector<8x1xf32>
    %cst_215 = arith.constant 1.000000e+00 : f32
    %725 = vector.broadcast %cst_215 : f32 to vector<8x1xf32>
    %726 = arith.mulf %724, %725 : vector<8x1xf32>
    %c0_216 = arith.constant 0 : index
    %c6_217 = arith.constant 6 : index
    %727 = memref.load %arg6[%c0_216, %c6_217] : memref<3x8xf32, #tpu.memory_space<smem>>
    %728 = vector.broadcast %727 : f32 to vector<8x1xf32>
    %729 = arith.mulf %14, %728 : vector<8x1xf32>
    %c1_218 = arith.constant 1 : index
    %c6_219 = arith.constant 6 : index
    %730 = memref.load %arg6[%c1_218, %c6_219] : memref<3x8xf32, #tpu.memory_space<smem>>
    %731 = vector.broadcast %730 : f32 to vector<8x1xf32>
    %732 = arith.mulf %18, %731 : vector<8x1xf32>
    %733 = arith.addf %729, %732 : vector<8x1xf32>
    %c2_220 = arith.constant 2 : index
    %c6_221 = arith.constant 6 : index
    %734 = memref.load %arg6[%c2_220, %c6_221] : memref<3x8xf32, #tpu.memory_space<smem>>
    %735 = vector.broadcast %734 : f32 to vector<8x1xf32>
    %736 = arith.mulf %22, %735 : vector<8x1xf32>
    %737 = arith.addf %733, %736 : vector<8x1xf32>
    %c0_222 = arith.constant 0 : index
    %c6_223 = arith.constant 6 : index
    %738 = memref.load %arg7[%c0_222, %c6_223] : memref<1x8xf32, #tpu.memory_space<smem>>
    %739 = vector.broadcast %738 : f32 to vector<8x1xf32>
    %740 = arith.addf %737, %739 : vector<8x1xf32>
    %cst_224 = arith.constant 0.000000e+00 : f32
    %741 = vector.broadcast %cst_224 : f32 to vector<8x1xf32>
    %742 = arith.subf %741, %740 : vector<8x1xf32>
    %743 = math.exp %742 : vector<8x1xf32>
    %cst_225 = arith.constant 1.000000e+00 : f32
    %744 = vector.broadcast %cst_225 : f32 to vector<8x1xf32>
    %745 = arith.addf %744, %743 : vector<8x1xf32>
    %cst_226 = arith.constant 1.000000e+00 : f32
    %746 = vector.broadcast %cst_226 : f32 to vector<8x1xf32>
    %747 = arith.divf %746, %745 : vector<8x1xf32>
    %748 = vector.broadcast %723 : vector<8x1xf32> to vector<8x4xf32>
    %749 = arith.mulf %748, %26 : vector<8x4xf32>
    %750 = arith.subf %749, %24 : vector<8x4xf32>
    %751 = vector.broadcast %747 : vector<8x1xf32> to vector<8x4xf32>
    %752 = arith.mulf %751, %750 : vector<8x4xf32>
    %753 = vector.broadcast %726 : vector<8x1xf32> to vector<8x4xf32>
    %754 = arith.mulf %753, %26 : vector<8x4xf32>
    %755 = arith.subf %754, %25 : vector<8x4xf32>
    %756 = vector.broadcast %747 : vector<8x1xf32> to vector<8x4xf32>
    %757 = arith.mulf %756, %755 : vector<8x4xf32>
    %758 = vector.extract_strided_slice %752 {offsets = [0, 0], sizes = [8, 1], strides = [1, 1]} : vector<8x4xf32> to vector<8x1xf32>
    %759 = vector.broadcast %758 : vector<8x1xf32> to vector<8x4xf32>
    %760 = arith.mulf %759, %752 : vector<8x4xf32>
    %761 = vector.extract_strided_slice %757 {offsets = [0, 0], sizes = [8, 1], strides = [1, 1]} : vector<8x4xf32> to vector<8x1xf32>
    %762 = vector.broadcast %761 : vector<8x1xf32> to vector<8x4xf32>
    %763 = arith.mulf %762, %757 : vector<8x4xf32>
    %764 = arith.addf %760, %763 : vector<8x4xf32>
    %765 = vector.extract_strided_slice %752 {offsets = [0, 1], sizes = [8, 1], strides = [1, 1]} : vector<8x4xf32> to vector<8x1xf32>
    %766 = vector.broadcast %765 : vector<8x1xf32> to vector<8x4xf32>
    %767 = arith.mulf %766, %752 : vector<8x4xf32>
    %768 = vector.extract_strided_slice %757 {offsets = [0, 1], sizes = [8, 1], strides = [1, 1]} : vector<8x4xf32> to vector<8x1xf32>
    %769 = vector.broadcast %768 : vector<8x1xf32> to vector<8x4xf32>
    %770 = arith.mulf %769, %757 : vector<8x4xf32>
    %771 = arith.addf %767, %770 : vector<8x4xf32>
    %772 = vector.extract_strided_slice %752 {offsets = [0, 2], sizes = [8, 1], strides = [1, 1]} : vector<8x4xf32> to vector<8x1xf32>
    %773 = vector.broadcast %772 : vector<8x1xf32> to vector<8x4xf32>
    %774 = arith.mulf %773, %752 : vector<8x4xf32>
    %775 = vector.extract_strided_slice %757 {offsets = [0, 2], sizes = [8, 1], strides = [1, 1]} : vector<8x4xf32> to vector<8x1xf32>
    %776 = vector.broadcast %775 : vector<8x1xf32> to vector<8x4xf32>
    %777 = arith.mulf %776, %757 : vector<8x4xf32>
    %778 = arith.addf %774, %777 : vector<8x4xf32>
    %779 = vector.extract_strided_slice %752 {offsets = [0, 3], sizes = [8, 1], strides = [1, 1]} : vector<8x4xf32> to vector<8x1xf32>
    %780 = vector.broadcast %779 : vector<8x1xf32> to vector<8x4xf32>
    %781 = arith.mulf %780, %752 : vector<8x4xf32>
    %782 = vector.extract_strided_slice %757 {offsets = [0, 3], sizes = [8, 1], strides = [1, 1]} : vector<8x4xf32> to vector<8x1xf32>
    %783 = vector.broadcast %782 : vector<8x1xf32> to vector<8x4xf32>
    %784 = arith.mulf %783, %757 : vector<8x4xf32>
    %785 = arith.addf %781, %784 : vector<8x4xf32>
    %786 = tpu.concatenate %764, %771, %778, %785 in 1 : vector<8x4xf32>, vector<8x4xf32>, vector<8x4xf32>, vector<8x4xf32> -> vector<8x16xf32>
    %787 = vector.extract_strided_slice %786 {offsets = [0, 0], sizes = [4, 16], strides = [1, 1]} : vector<8x16xf32> to vector<4x16xf32>
    %cst_227 = arith.constant dense<0.000000e+00> : vector<16xf32>
    %788 = vector.multi_reduction <add>, %787, %cst_227 [0] : vector<4x16xf32> to vector<16xf32>
    %789 = vector.shape_cast %788 : vector<16xf32> to vector<1x16xf32>
    %790 = vector.extract_strided_slice %786 {offsets = [4, 0], sizes = [4, 16], strides = [1, 1]} : vector<8x16xf32> to vector<4x16xf32>
    %cst_228 = arith.constant dense<0.000000e+00> : vector<16xf32>
    %791 = vector.multi_reduction <add>, %790, %cst_228 [0] : vector<4x16xf32> to vector<16xf32>
    %792 = vector.shape_cast %791 : vector<16xf32> to vector<1x16xf32>
    %793 = tpu.concatenate %789, %792 in 0 : vector<1x16xf32>, vector<1x16xf32> -> vector<2x16xf32>
    %c6_229 = arith.constant 6 : index
    %c0_230 = arith.constant 0 : index
    %c0_231 = arith.constant 0 : index
    %794 = vector.load %arg9[%c6_229, %c0_230, %c0_231] : memref<8x2x16xf32, #tpu.memory_space<vmem>>, vector<1x2x16xf32>
    %795 = vector.shape_cast %794 : vector<1x2x16xf32> to vector<2x16xf32>
    %796 = vector.shape_cast %793 : vector<2x16xf32> to vector<1x2x16xf32>
    tpu.vector_store %arg9[%c6_229, %c0_230, %c0_231], %796 {strides = array<i32>} : memref<8x2x16xf32, #tpu.memory_space<vmem>>, vector<1x2x16xf32>,
    %c0_232 = arith.constant 0 : index
    %c7 = arith.constant 7 : index
    %797 = memref.load %arg4[%c0_232, %c7] : memref<3x8xf32, #tpu.memory_space<smem>>
    %798 = vector.broadcast %797 : f32 to vector<8x256xf32>
    %799 = arith.mulf %0, %798 : vector<8x256xf32>
    %c1_233 = arith.constant 1 : index
    %c7_234 = arith.constant 7 : index
    %800 = memref.load %arg4[%c1_233, %c7_234] : memref<3x8xf32, #tpu.memory_space<smem>>
    %801 = vector.broadcast %800 : f32 to vector<8x256xf32>
    %802 = arith.mulf %1, %801 : vector<8x256xf32>
    %803 = arith.addf %799, %802 : vector<8x256xf32>
    %c2_235 = arith.constant 2 : index
    %c7_236 = arith.constant 7 : index
    %804 = memref.load %arg4[%c2_235, %c7_236] : memref<3x8xf32, #tpu.memory_space<smem>>
    %805 = vector.broadcast %804 : f32 to vector<8x256xf32>
    %806 = arith.mulf %2, %805 : vector<8x256xf32>
    %807 = arith.addf %803, %806 : vector<8x256xf32>
    %c0_237 = arith.constant 0 : index
    %c7_238 = arith.constant 7 : index
    %808 = memref.load %arg5[%c0_237, %c7_238] : memref<1x8xf32, #tpu.memory_space<smem>>
    %809 = vector.broadcast %808 : f32 to vector<8x256xf32>
    %810 = arith.addf %807, %809 : vector<8x256xf32>
    %cst_239 = arith.constant 1.000000e+02 : f32
    %811 = vector.broadcast %cst_239 : f32 to vector<8x256xf32>
    %812 = arith.mulf %810, %811 : vector<8x256xf32>
    %cst_240 = arith.constant dense<0xFF800000> : vector<8xf32>
    %813 = vector.multi_reduction <maximumf>, %812, %cst_240 [1] : vector<8x256xf32> to vector<8xf32>
    %814 = vector.shape_cast %813 : vector<8xf32> to vector<8x1xf32>
    %815 = vector.broadcast %814 : vector<8x1xf32> to vector<8x256xf32>
    %816 = arith.subf %812, %815 : vector<8x256xf32>
    %817 = math.exp %816 : vector<8x256xf32>
    %cst_241 = arith.constant dense<0.000000e+00> : vector<8xf32>
    %818 = vector.multi_reduction <add>, %817, %cst_241 [1] : vector<8x256xf32> to vector<8xf32>
    %819 = vector.shape_cast %818 : vector<8xf32> to vector<8x1xf32>
    %820 = arith.mulf %817, %10 : vector<8x256xf32>
    %cst_242 = arith.constant dense<0.000000e+00> : vector<8xf32>
    %821 = vector.multi_reduction <add>, %820, %cst_242 [1] : vector<8x256xf32> to vector<8xf32>
    %822 = vector.shape_cast %821 : vector<8xf32> to vector<8x1xf32>
    %823 = arith.mulf %817, %7 : vector<8x256xf32>
    %cst_243 = arith.constant dense<0.000000e+00> : vector<8xf32>
    %824 = vector.multi_reduction <add>, %823, %cst_243 [1] : vector<8x256xf32> to vector<8xf32>
    %825 = vector.shape_cast %824 : vector<8xf32> to vector<8x1xf32>
    %826 = tpu.reciprocal %819 {approx = true} : vector<8x1xf32> -> vector<8x1xf32>
    %827 = arith.mulf %819, %826 : vector<8x1xf32>
    %cst_244 = arith.constant 2.000000e+00 : f32
    %828 = vector.broadcast %cst_244 : f32 to vector<8x1xf32>
    %829 = arith.subf %828, %827 : vector<8x1xf32>
    %830 = arith.mulf %826, %829 : vector<8x1xf32>
    %831 = arith.mulf %822, %830 : vector<8x1xf32>
    %cst_245 = arith.constant 1.000000e+00 : f32
    %832 = vector.broadcast %cst_245 : f32 to vector<8x1xf32>
    %833 = arith.mulf %831, %832 : vector<8x1xf32>
    %834 = arith.mulf %825, %830 : vector<8x1xf32>
    %cst_246 = arith.constant 1.000000e+00 : f32
    %835 = vector.broadcast %cst_246 : f32 to vector<8x1xf32>
    %836 = arith.mulf %834, %835 : vector<8x1xf32>
    %c0_247 = arith.constant 0 : index
    %c7_248 = arith.constant 7 : index
    %837 = memref.load %arg6[%c0_247, %c7_248] : memref<3x8xf32, #tpu.memory_space<smem>>
    %838 = vector.broadcast %837 : f32 to vector<8x1xf32>
    %839 = arith.mulf %14, %838 : vector<8x1xf32>
    %c1_249 = arith.constant 1 : index
    %c7_250 = arith.constant 7 : index
    %840 = memref.load %arg6[%c1_249, %c7_250] : memref<3x8xf32, #tpu.memory_space<smem>>
    %841 = vector.broadcast %840 : f32 to vector<8x1xf32>
    %842 = arith.mulf %18, %841 : vector<8x1xf32>
    %843 = arith.addf %839, %842 : vector<8x1xf32>
    %c2_251 = arith.constant 2 : index
    %c7_252 = arith.constant 7 : index
    %844 = memref.load %arg6[%c2_251, %c7_252] : memref<3x8xf32, #tpu.memory_space<smem>>
    %845 = vector.broadcast %844 : f32 to vector<8x1xf32>
    %846 = arith.mulf %22, %845 : vector<8x1xf32>
    %847 = arith.addf %843, %846 : vector<8x1xf32>
    %c0_253 = arith.constant 0 : index
    %c7_254 = arith.constant 7 : index
    %848 = memref.load %arg7[%c0_253, %c7_254] : memref<1x8xf32, #tpu.memory_space<smem>>
    %849 = vector.broadcast %848 : f32 to vector<8x1xf32>
    %850 = arith.addf %847, %849 : vector<8x1xf32>
    %cst_255 = arith.constant 0.000000e+00 : f32
    %851 = vector.broadcast %cst_255 : f32 to vector<8x1xf32>
    %852 = arith.subf %851, %850 : vector<8x1xf32>
    %853 = math.exp %852 : vector<8x1xf32>
    %cst_256 = arith.constant 1.000000e+00 : f32
    %854 = vector.broadcast %cst_256 : f32 to vector<8x1xf32>
    %855 = arith.addf %854, %853 : vector<8x1xf32>
    %cst_257 = arith.constant 1.000000e+00 : f32
    %856 = vector.broadcast %cst_257 : f32 to vector<8x1xf32>
    %857 = arith.divf %856, %855 : vector<8x1xf32>
    %858 = vector.broadcast %833 : vector<8x1xf32> to vector<8x4xf32>
    %859 = arith.mulf %858, %26 : vector<8x4xf32>
    %860 = arith.subf %859, %24 : vector<8x4xf32>
    %861 = vector.broadcast %857 : vector<8x1xf32> to vector<8x4xf32>
    %862 = arith.mulf %861, %860 : vector<8x4xf32>
    %863 = vector.broadcast %836 : vector<8x1xf32> to vector<8x4xf32>
    %864 = arith.mulf %863, %26 : vector<8x4xf32>
    %865 = arith.subf %864, %25 : vector<8x4xf32>
    %866 = vector.broadcast %857 : vector<8x1xf32> to vector<8x4xf32>
    %867 = arith.mulf %866, %865 : vector<8x4xf32>
    %868 = vector.extract_strided_slice %862 {offsets = [0, 0], sizes = [8, 1], strides = [1, 1]} : vector<8x4xf32> to vector<8x1xf32>
    %869 = vector.broadcast %868 : vector<8x1xf32> to vector<8x4xf32>
    %870 = arith.mulf %869, %862 : vector<8x4xf32>
    %871 = vector.extract_strided_slice %867 {offsets = [0, 0], sizes = [8, 1], strides = [1, 1]} : vector<8x4xf32> to vector<8x1xf32>
    %872 = vector.broadcast %871 : vector<8x1xf32> to vector<8x4xf32>
    %873 = arith.mulf %872, %867 : vector<8x4xf32>
    %874 = arith.addf %870, %873 : vector<8x4xf32>
    %875 = vector.extract_strided_slice %862 {offsets = [0, 1], sizes = [8, 1], strides = [1, 1]} : vector<8x4xf32> to vector<8x1xf32>
    %876 = vector.broadcast %875 : vector<8x1xf32> to vector<8x4xf32>
    %877 = arith.mulf %876, %862 : vector<8x4xf32>
    %878 = vector.extract_strided_slice %867 {offsets = [0, 1], sizes = [8, 1], strides = [1, 1]} : vector<8x4xf32> to vector<8x1xf32>
    %879 = vector.broadcast %878 : vector<8x1xf32> to vector<8x4xf32>
    %880 = arith.mulf %879, %867 : vector<8x4xf32>
    %881 = arith.addf %877, %880 : vector<8x4xf32>
    %882 = vector.extract_strided_slice %862 {offsets = [0, 2], sizes = [8, 1], strides = [1, 1]} : vector<8x4xf32> to vector<8x1xf32>
    %883 = vector.broadcast %882 : vector<8x1xf32> to vector<8x4xf32>
    %884 = arith.mulf %883, %862 : vector<8x4xf32>
    %885 = vector.extract_strided_slice %867 {offsets = [0, 2], sizes = [8, 1], strides = [1, 1]} : vector<8x4xf32> to vector<8x1xf32>
    %886 = vector.broadcast %885 : vector<8x1xf32> to vector<8x4xf32>
    %887 = arith.mulf %886, %867 : vector<8x4xf32>
    %888 = arith.addf %884, %887 : vector<8x4xf32>
    %889 = vector.extract_strided_slice %862 {offsets = [0, 3], sizes = [8, 1], strides = [1, 1]} : vector<8x4xf32> to vector<8x1xf32>
    %890 = vector.broadcast %889 : vector<8x1xf32> to vector<8x4xf32>
    %891 = arith.mulf %890, %862 : vector<8x4xf32>
    %892 = vector.extract_strided_slice %867 {offsets = [0, 3], sizes = [8, 1], strides = [1, 1]} : vector<8x4xf32> to vector<8x1xf32>
    %893 = vector.broadcast %892 : vector<8x1xf32> to vector<8x4xf32>
    %894 = arith.mulf %893, %867 : vector<8x4xf32>
    %895 = arith.addf %891, %894 : vector<8x4xf32>
    %896 = tpu.concatenate %874, %881, %888, %895 in 1 : vector<8x4xf32>, vector<8x4xf32>, vector<8x4xf32>, vector<8x4xf32> -> vector<8x16xf32>
    %897 = vector.extract_strided_slice %896 {offsets = [0, 0], sizes = [4, 16], strides = [1, 1]} : vector<8x16xf32> to vector<4x16xf32>
    %cst_258 = arith.constant dense<0.000000e+00> : vector<16xf32>
    %898 = vector.multi_reduction <add>, %897, %cst_258 [0] : vector<4x16xf32> to vector<16xf32>
    %899 = vector.shape_cast %898 : vector<16xf32> to vector<1x16xf32>
    %900 = vector.extract_strided_slice %896 {offsets = [4, 0], sizes = [4, 16], strides = [1, 1]} : vector<8x16xf32> to vector<4x16xf32>
    %cst_259 = arith.constant dense<0.000000e+00> : vector<16xf32>
    %901 = vector.multi_reduction <add>, %900, %cst_259 [0] : vector<4x16xf32> to vector<16xf32>
    %902 = vector.shape_cast %901 : vector<16xf32> to vector<1x16xf32>
    %903 = tpu.concatenate %899, %902 in 0 : vector<1x16xf32>, vector<1x16xf32> -> vector<2x16xf32>
    %c7_260 = arith.constant 7 : index
    %c0_261 = arith.constant 0 : index
    %c0_262 = arith.constant 0 : index
    %904 = vector.load %arg9[%c7_260, %c0_261, %c0_262] : memref<8x2x16xf32, #tpu.memory_space<vmem>>, vector<1x2x16xf32>
    %905 = vector.shape_cast %904 : vector<1x2x16xf32> to vector<2x16xf32>
    %906 = vector.shape_cast %903 : vector<2x16xf32> to vector<1x2x16xf32>
    tpu.vector_store %arg9[%c7_260, %c0_261, %c0_262], %906 {strides = array<i32>} : memref<8x2x16xf32, #tpu.memory_space<vmem>>, vector<1x2x16xf32>,
    %907 = tpu.concatenate %63, %173, %283, %393, %503, %613, %723, %833 in 1 : vector<8x1xf32>, vector<8x1xf32>, vector<8x1xf32>, vector<8x1xf32>, vector<8x1xf32>, vector<8x1xf32>, vector<8x1xf32>, vector<8x1xf32> -> vector<8x8xf32>
    %c0_263 = arith.constant 0 : index
    %c0_264 = arith.constant 0 : index
    %c0_265 = arith.constant 0 : index
    %908 = vector.load %arg8[%c0_263, %c0_264, %c0_265] : memref<3x8x8xf32, #tpu.memory_space<vmem>>, vector<1x8x8xf32>
    %909 = vector.shape_cast %908 : vector<1x8x8xf32> to vector<8x8xf32>
    %910 = vector.shape_cast %907 : vector<8x8xf32> to vector<1x8x8xf32>
    tpu.vector_store %arg8[%c0_263, %c0_264, %c0_265], %910 {strides = array<i32>} : memref<3x8x8xf32, #tpu.memory_space<vmem>>, vector<1x8x8xf32>,
    %911 = tpu.concatenate %66, %176, %286, %396, %506, %616, %726, %836 in 1 : vector<8x1xf32>, vector<8x1xf32>, vector<8x1xf32>, vector<8x1xf32>, vector<8x1xf32>, vector<8x1xf32>, vector<8x1xf32>, vector<8x1xf32> -> vector<8x8xf32>
    %c1_266 = arith.constant 1 : index
    %c0_267 = arith.constant 0 : index
    %c0_268 = arith.constant 0 : index
    %912 = vector.load %arg8[%c1_266, %c0_267, %c0_268] : memref<3x8x8xf32, #tpu.memory_space<vmem>>, vector<1x8x8xf32>
    %913 = vector.shape_cast %912 : vector<1x8x8xf32> to vector<8x8xf32>
    %914 = vector.shape_cast %911 : vector<8x8xf32> to vector<1x8x8xf32>
    tpu.vector_store %arg8[%c1_266, %c0_267, %c0_268], %914 {strides = array<i32>} : memref<3x8x8xf32, #tpu.memory_space<vmem>>, vector<1x8x8xf32>,
    %915 = tpu.concatenate %87, %197, %307, %417, %527, %637, %747, %857 in 1 : vector<8x1xf32>, vector<8x1xf32>, vector<8x1xf32>, vector<8x1xf32>, vector<8x1xf32>, vector<8x1xf32>, vector<8x1xf32>, vector<8x1xf32> -> vector<8x8xf32>
    %c2_269 = arith.constant 2 : index
    %c0_270 = arith.constant 0 : index
    %c0_271 = arith.constant 0 : index
    %916 = vector.load %arg8[%c2_269, %c0_270, %c0_271] : memref<3x8x8xf32, #tpu.memory_space<vmem>>, vector<1x8x8xf32>
    %917 = vector.shape_cast %916 : vector<1x8x8xf32> to vector<8x8xf32>
    %918 = vector.shape_cast %915 : vector<8x8xf32> to vector<1x8x8xf32>
    tpu.vector_store %arg8[%c2_269, %c0_270, %c0_271], %918 {strides = array<i32>} : memref<3x8x8xf32, #tpu.memory_space<vmem>>, vector<1x8x8xf32>,
    return
  }
}

</mosaic_0001>

<bundles_post_ra>
// kernel: custom-call.2
= control target key start
LH: loop header
LB: loop body
LE: loop exit
PB: predicated region body
PF: predicated region fallthrough
CT: control target
= control target key end

     0   :  { %s2197_s0 = inlined_call_operand.vmem [shape: f32[2,8,2,2], index: 0, kind: input, shape index: {}]   ;;  %s2198_s1 = inlined_call_operand.vmem [shape: f32[2,8,2,2], index: 1, kind: input, shape index: {}]   ;;  %s2199_s2 = inlined_call_operand.vmem [shape: f32[2,8,2,2], index: 2, kind: input, shape index: {}]   ;;  %s2200_s3 = inlined_call_operand.vmem [shape: f32[2,8,2,2], index: 3, kind: input, shape index: {}]   ;;  %s2201_s4 = inlined_call_operand.vmem [shape: f32[2,8,2], index: 4, kind: output, shape index: {0}]   ;;  %s2202_s5 = inlined_call_operand.vmem [shape: f32[2,8,2], index: 5, kind: output, shape index: {1}]   ;;  %s2203_s6 = inlined_call_operand.vmem [shape: f32[2,8,2,2], index: 6, kind: output, shape index: {2}]   ;;  %s2204_s7 = inlined_call_operand.vmem [shape: f32[2,8,2,2], index: 7, kind: output, shape index: {3}]   ;;  %s2205_s8 = inlined_call_operand.vmem [shape: f32[2,8,2,2], index: 8, kind: output, shape index: {4}]   ;;  %s2206_s9 = inlined_call_operand.vmem [shape: f32[2,8,2,2], index: 9, kind: output, shape index: {5}]  }
   0x1   :  { %2212 = sst [smem:[#allocation36_spill]] %s2206_s9 }
   0x2   :  { %s1830_s30 = smov 0   ;;  %s1832_s10 = smov 0  }
   0x3   :  { %s1834_s11 = smov 0   ;;  %s1836_s12 = smov 0  }
   0x4   :  { %s1838_s13 = smov 0   ;;  %s1840_s14 = smov 0  }
   0x5   :  { %s1842_s15 = smov 0  }
   0x6 LB: > { %2213 = sst [smem:[#allocation31_spill]] %s1747_s10  ;;  %s25_s16 = sadd.s32 1, %s1759_s13  ;;  %s1767_s15 = sphi %s1842_s15, %s16_s15   ;;  %s1763_s14 = sphi %s1840_s14, %s2238_s14   ;;  %s1759_s13 = sphi %s1838_s13, %s2240_s13   ;;  %s1755_s12 = sphi %s1836_s12, %s2236_s12   ;;  %s1751_s11 = sphi %s1834_s11, %s2239_s11   ;;  %s1747_s10 = sphi %s1832_s10, %s2235_s10   ;;  %s1743_s30 = sphi %s1830_s30, %s2234_s30  }
   0x7   : > { %2214 = sst [smem:[#allocation32_spill]] %s1763_s14  ;;  %p26_p0 = scmp.ge.s32.totalorder %s25_s16, 8 }
   0x8   : > { %s28_s17 = sadd.s32 1, %s1763_s14  ;;  %s2207_s18 = sadd.s32 4294967295, %s1767_s15  }
   0x9   : > { %s32_s19 = sshrl.u32 %s1759_s13, 3  ;;  %s2242_s16 = smov (%p26_p0, %s25_s16), 0 }
   0xa   : > { %2215 = sst [smem:[#allocation33_spill]] %s2242_s16  ;;  %s2244_s17 = smov (!%p26_p0, %s28_s17), %s1763_s14 }
   0xb   : > { %s33_s20 = sshrl.u32 %s2242_s16, 3  ;;  %p49_p1 = scmp.ne.s32.totalorder %s1747_s10, %s1743_s30 }
   0xc   : > { %p30_p2 = scmp.ge.s32.totalorder %s2244_s17, 2  ;;  %s35_s21 = ssub.s32 %s32_s19, %s33_s20 }
   0xd   : > { %p50_p3 = scmp.eq.s32.totalorder %s2207_s18, 15  ;;  %s39_s25 = sadd.s32 1, %s1747_s10 }
   0xe   : > { %s2246_s17 = smov (%p30_p2, %s2244_s17), 0  ;;  %p1556_p6 = scmp.ge.s32.totalorder %s1767_s15, 16 }
   0xf   : > { %2216 = sst [smem:[#allocation34_spill]] %s2246_s17  ;;  %p1879_p4 = por %p50_p3, %p49_p1 }
  0x10   : > { %s34_s23 = ssub.s32 %s1763_s14, %s2246_s17  ;;  %102 = sbr.rel (%p1556_p6) target bundleno = 28 (0x1c), region = 16 }
  0x11   : > { %s36_s24 = sor.u32 %s35_s21, %s34_s23  ;;  %s104_s27 = sand.u32 (!%p1556_p6), 1, %s1767_s15  }
  0x12   : > { %p37_p5 = scmp.eq.s32.totalorder %s36_s24, 0  ;;  %s1558_s28 = sshll.u32 (!%p1556_p6), %s1763_s14, 3 }
  0x13   : > { %s1557_s29 = sshll.u32 (!%p1556_p6), %s104_s27, 1  ;;  %s108_s19 = sadd.s32 (!%p1556_p6), %s1759_s13, %s1558_s28 }
  0x14   : > { %s1887_s26 = scalar_select %p37_p5, %s1747_s10, %s39_s25  }
  0x15   : > { %s1559_s20 = sshll.u32 (!%p1556_p6), %s108_s19, 1  ;;  %s106_s25 = scalar_lea.vmem (!%p1556_p6), [#allocation1], %s1557_s29 }
  0x16   : > { %2218 = sst [smem:[#allocation35_spill]] %s1887_s26  ;;  %s110_s17 = scalar_lea.vmem (!%p1556_p6), %s2197_s0, %s1559_s20 }
  0x17   : > { %v126_v0 = vld [vmem:[%s110_s17] sm:$0x3]  ;;  %s149_s24 = scalar_lea.vmem %s2198_s1, %s1559_s20  ;;  %s188_s9 = scalar_lea.vmem %s2199_s2, %s1559_s20 }
  0x18   : > { %127 = vst [vmem:[%s106_s25] sm:$0x3] %v126_v0  ;;  %v165_v1 = vld [vmem:[%s149_s24] sm:$0x3]  ;;  %s145_s14 = scalar_lea.vmem [#allocation3], %s1557_s29  ;;  %s227_s16 = scalar_lea.vmem %s2200_s3, %s1559_s20 }
  0x19   : > { %166 = vst [vmem:[%s145_s14] sm:$0x3] %v165_v1  ;;  %v204_v2 = vld [vmem:[%s188_s9] sm:$0x3]  ;;  %s184_s18 = scalar_lea.vmem [#allocation5], %s1557_s29  ;;  %s223_s17 = scalar_lea.vmem [#allocation7], %s1557_s29 }
  0x1a   : > { %205 = vst [vmem:[%s184_s18] sm:$0x3] %v204_v2  ;;  %v243_v3 = vld [vmem:[%s227_s16] sm:$0x3] }
  0x1b   : > { %244 = vst [vmem:[%s223_s17] sm:$0x3] %v243_v3 }
  0x1c PF: > { %p1569_p7 = scmp.ge.s32.totalorder %s1767_s15, 1  ;;  %p260_p8 = scmp.lt.s32.totalorder %s1767_s15, 17 }
  0x1e   : > { %p261_p9 = pnand %p1569_p7, %p260_p8 }
  0x20   : > { %264 = sbr.rel (%p261_p9) target bundleno = 1010 (0x3f2), region = 140 }
  0x27   : > { %s2219_s10 = sadd.s32 4294967295, %s1767_s15   ;;  %s301_s14 = sand.u32 1, %s1743_s30   ;;  %v361_v4 = vlaneseq  ;;  %v1777_v5 = vmov 0.0  }
  0x28   : > { %s283_s9 = sand.u32 1, %s2219_s10   ;;  %s1912_s29 = sshll.u32 %s301_s14, 3  ;;  %356 = vst [vmem:[#allocation10] sm:$0xff] %v1777_v5  ;;  %357 = vst [vmem:[#allocation12] sm:$0xff] %v1777_v5 }
  0x29   : > { %s1910_s26 = sshll.u32 %s283_s9, 1  ;;  %358 = vst [vmem:[#allocation14] sm:$0xff] %v1777_v5  ;;  %359 = vst [vmem:[#allocation16] sm:$0xff] %v1777_v5  ;;  %v1914_v6 = vand.u32 127, %v361_v4  ;;  %v1916_v7 = vshrl.u32 %v361_v4, 7  ;;  %s344_s23 = smov [#allocation18] }
  0x2a   : > { %s285_s19 = scalar_lea.vmem [#allocation1], %s1910_s26  ;;  %s289_s30 = scalar_lea.vmem [#allocation3], %s1910_s26 }
  0x2b   : > { %v328_v8 = vld [vmem:[%s285_s19] sm:$0x3]  ;;  %v332_v9 = vld [vmem:[%s289_s30] sm:$0x3]  ;;  %s293_s20 = scalar_lea.vmem [#allocation5], %s1910_s26  ;;  %s297_s21 = scalar_lea.vmem [#allocation7], %s1910_s26  ;;  %v363_v6 = vmov %v1914_v6  ;;  %v366_v7 = vmov %v1916_v7 }
  0x2c   : > { %329 = vst [vmem:[#allocation0] sm:$0x3] %v328_v8  ;;  %333 = vst [vmem:[#allocation2] sm:$0x3] %v332_v9  ;;  %v336_v10 = vld [vmem:[%s293_s20] sm:$0x3]  ;;  %v376_v6 = vmov %v1914_v6  ;;  %v379_v7 = vmov %v1916_v7  ;;  %vm370_vm0 = vcmp.eq.s32.totalorder %v366_v7, %v363_v6 }
  0x2d   : > { %v340_v11 = vld [vmem:[%s297_s21] sm:$0x3]  ;;  %337 = vst [vmem:[#allocation4] sm:$0x3] %v336_v10  ;;  %s347_s24 = smov [#allocation19]  ;;  %vm383_vm1 = vcmp.eq.s32.totalorder %v379_v7, %v376_v6  ;;  %s360_s25 = smov [#allocation10]  ;;  %v1428_v7 = vmov %v1916_v7 }
  0x2e   : > { %341 = vst [vmem:[#allocation6] sm:$0x3] %v340_v11  ;;  %s373_s27 = smov [#allocation16]  ;;  %s350_s28 = smov [#allocation20]  ;;  %vm1433_vm2 = vcmp.lt.s32.totalorder %v1914_v6, 2  ;;  %v1425_v6 = vmov %v1914_v6 }
  0x2f   : > { %s353_s16 = smov [#allocation21]  ;;  %v367_v12 = vld [vmem:[%s360_s25] sm:$0x3]  ;;  %s1429_s30 = smov [#allocation18]  ;;  %vm1438_vm3 = vcmp.eq.s32.totalorder %v1428_v7, %v1425_v6  ;;  %v1476_v6 = vmov %v1914_v6  ;;  %v1445_v7 = vmov %v1916_v7 }
  0x30   : > { %v380_v13 = vld [vmem:[%s373_s27] sm:$0x3]  ;;  %v371_v16 = vsel %vm370_vm0, 1.0, %v367_v12  ;;  %s1446_s20 = smov [#allocation19]  ;;  %s1463_s21 = smov [#allocation20]  ;;  %v1442_v6 = vmov %v1914_v6  ;;  %v1479_v7 = vmov %v1916_v7 }
  0x31   : > { %v384_v17 = vsel %vm383_vm1, 1.0, %v380_v13  ;;  %372 = vst [vmem:[%s360_s25] sm:$0x3] %v371_v16  ;;  %v1459_v6 = vmov %v1914_v6  ;;  %v1462_v7 = vmov %v1916_v7  ;;  %vm1489_vm4 = vcmp.eq.s32.totalorder %v1479_v7, %v1476_v6 }
  0x32   : > { %385 = vst [vmem:[%s373_s27] sm:$0x3] %v384_v17 }
  0x33   : > { %v345_v14 = vld [vmem:[#allocation0] sm:$0xff]  ;;  %v348_v15 = vld [vmem:[#allocation2] sm:$0xff] }
  0x34   : > { %346 = vst [vmem:[%s344_s23] sm:$0xff] %v345_v14  ;;  %349 = vst [vmem:[%s347_s24] sm:$0xff] %v348_v15  ;;  %v351_v18 = vld [vmem:[#allocation4] sm:$0xff]  ;;  %s1480_s23 = smov [#allocation21] }
  0x35   : > { %v354_v19 = vld [vmem:[#allocation6] sm:$0xff]  ;;  %352 = vst [vmem:[%s350_s28] sm:$0xff] %v351_v18 }
  0x36   : > { %355 = vst [vmem:[%s353_s16] sm:$0xff] %v354_v19 }
  0x3b   : > { %v1435_v20 = vld [vmem:[%s1429_s30] sm:$0x3] }
  0x3c   : > { %v1452_v21 = vld [vmem:[%s1446_s20] sm:$0x3]  ;;  %v1436_v22 = vsel %vm1433_vm2, %v1435_v20, 0.0 }
  0x3d   : > { %v1453_v23 = vsel %vm1433_vm2, %v1452_v21, 0.0  ;;  %v1469_v24 = vld [vmem:[%s1463_s21] sm:$0x3]  ;;  %v1437_v26 = vmul.f32 %v1436_v22, %v1436_v22 }
  0x3e   : > { %v1486_v25 = vld [vmem:[%s1480_s23] sm:$0x3]  ;;  %v1454_v27 = vmul.f32 %v1453_v23, %v1453_v23  ;;  %v1470_v28 = vsel %vm1433_vm2, %v1469_v24, 0.0 }
  0x3f   : > { %v1487_v29 = vsel %vm1433_vm2, %v1486_v25, 0.0  ;;  %v1471_v30 = vmul.f32 %v1470_v28, %v1470_v28  ;;  %v1439_v33 = vsel %vm1438_vm3, 0.0, %v1437_v26 }
  0x40   : > { %v1456_v31 = vadd.f32 %v1454_v27, %v1437_v26  ;;  %v1488_v32 = vmul.f32 %v1487_v29, %v1487_v29  ;;  %v1455_v34 = vadd.f32 %v1454_v27, %v1439_v33 }
  0x42   : > { %v1473_v35 = vadd.f32 %v1471_v30, %v1456_v31  ;;  %v1472_v36 = vadd.f32 %v1471_v30, %v1455_v34  ;;  %v1490_v37 = vsel %vm1489_vm4, 0.0, %v1488_v32 }
  0x44   : > { %v1492_v38 = vadd.f32 %v1488_v32, %v1473_v35  ;;  %v1491_v39 = vadd.f32 %v1490_v37, %v1472_v36 }
  0x46   : > { %1493 = vadd.xlane.f32.xlu0 %v1492_v38 }
  0x4a   : > { %1501 = vadd.xlane.f32.xlu0 %v1491_v39 }
  0xd3   : > { %v1494_v40 = vpop.xlane.xlu0 %1493 }
  0xd4   : > { %v1495_v41 = vrot.slane %v1494_v40, 4 }
  0xd6   : > { %v1496_v42 = vadd.f32 %v1495_v41, %v1494_v40 }
  0xd7   : > { %v1502_v43 = vpop.xlane.xlu0 %1501 }
  0xd8   : > { %v1497_v44 = vrot.slane %v1496_v42, 2  ;;  %v1503_v45 = vrot.slane %v1502_v43, 4 }
  0xda   : > { %v1504_v46 = vadd.f32 %v1503_v45, %v1502_v43  ;;  %v1498_v47 = vadd.f32 %v1497_v44, %v1496_v42 }
  0xdc   : > { %v1505_v48 = vrot.slane %v1504_v46, 2  ;;  %v1499_v50 = vrot.slane %v1498_v47, 1 }
  0xde   : > { %v1506_v49 = vadd.f32 %v1505_v48, %v1504_v46  ;;  %v1500_v53 = vadd.f32 %v1499_v50, %v1498_v47 }
  0xe0   : > { %v1507_v51 = vrot.slane %v1506_v49, 1 }
  0xe2   : > { %v1508_v52 = vadd.f32 %v1507_v51, %v1506_v49 }
  0xe4   : > { %1614 = vpush %v1508_v52 }
  0xe5   : > { %1616 = vpush %v1500_v53 }
 0x115   : > { %s1615_s24 = spop %1614 }
 0x116   : > { %s1617_s25 = spop %1616 }
 0x117   : > { %s1511_s27 = smul.f32 1e-10, %s1617_s25 }
 0x119   : > { %p1512_p10 = scmp.le.f32.partialorder %s1615_s24, %s1511_s27 }
 0x11a   : > { %s1950_s28 = smov (!%p1512_p10), 0  }
 0x11b   : > { %1515 = sbr.rel (%p1512_p10) target bundleno = 965 (0x3c5), region = 475 }
 0x122 LB: >> { %s1955_s16 = smov 0   ;;  %s1771_s28 = sphi %s1950_s28, %s2220_s28  }
 0x123 LB: >>> { %s490_s30 = smov [#allocation18]  ;;  %v494_v6 = vmov %v1914_v6  ;;  %v497_v7 = vmov %v1916_v7  ;;  %s510_s20 = smov [#allocation19]  ;;  %vm813_vm14 = vcmp.eq.s32.totalorder %v1916_v7, 0  ;;  %vm825_vm15 = vcmp.eq.s32.totalorder %v1916_v7, 1  ;;  %s1775_s16 = sphi %s1955_s16, %s489_s16  }
 0x124   : >>> { %v514_v6 = vmov %v1914_v6  ;;  %v517_v7 = vmov %v1916_v7  ;;  %v498_v54 = vld [vmem:[%s490_s30] sm:$0x3]  ;;  %vm501_vm5 = vcmp.eq.s32.totalorder %v497_v7, %v494_v6  ;;  %s530_s21 = smov [#allocation21]  ;;  %s491_s23 = smov [#allocation22] }
 0x125   : >>> { %vm521_vm6 = vcmp.eq.s32.totalorder %v517_v7, %v514_v6  ;;  %v534_v6 = vmov %v1914_v6  ;;  %v537_v7 = vmov %v1916_v7  ;;  %v502_v55 = vsel %vm501_vm5, %v498_v54, 0.0  ;;  %v518_v56 = vld [vmem:[%s510_s20] sm:$0x3]  ;;  %s511_s24 = smov [#allocation23]  ;;  %s531_s25 = smov [#allocation24] }
 0x126   : >>> { %vm541_vm7 = vcmp.eq.s32.totalorder %v537_v7, %v534_v6  ;;  %v503_v57 = vrot.slane %v502_v55, 4  ;;  %v522_v58 = vsel %vm521_vm6, %v518_v56, 0.0  ;;  %v538_v59 = vld [vmem:[%s530_s21] sm:$0x3]  ;;  %s554_s27 = smov [#allocation23]  ;;  %s552_s30 = smov [#allocation22]  ;;  %v603_v6 = vmov %v1914_v6 }
 0x127   : >>> { %v523_v60 = vrot.slane %v522_v58, 4  ;;  %v542_v61 = vsel %vm541_vm7, %v538_v59, 0.0  ;;  %s556_s20 = smov [#allocation24]  ;;  %s591_s21 = smov [#allocation25]  ;;  %v606_v7 = vmov %v1916_v7  ;;  %v618_v6 = vmov %v1914_v6 }
 0x128   : >>> { %v504_v62 = vadd.f32 %v503_v57, %v502_v55  ;;  %v543_v63 = vrot.slane %v542_v61, 4  ;;  %v621_v7 = vmov %v1916_v7  ;;  %vm608_vm12 = vcmp.eq.s32.totalorder %v606_v7, %v603_v6  ;;  %s1974_s17 = smov [#allocation20]  ;;  %s1980_s18 = smov [#allocation12] }
 0x129   : >>> { %v524_v0 = vadd.f32 %v523_v60, %v522_v58  ;;  %vm623_vm13 = vcmp.eq.s32.totalorder %v621_v7, %v618_v6  ;;  %s853_s19 = smov [#allocation29]  ;;  %s1986_s14 = smov [#allocation16]  ;;  %v639_v55 = vld [vmem:[%s1974_s17] sm:$0x3]  ;;  %v716_v6 = vmov %v1914_v6  ;;  %v719_v7 = vmov %v1916_v7 }
 0x12a   : >>> { %v505_v1 = vrot.slane %v504_v62, 2  ;;  %v544_v2 = vadd.f32 %v543_v63, %v542_v61  ;;  %v862_v58 = vld [vmem:[%s1980_s18] sm:$0x3]  ;;  %s631_s9 = smov [#allocation30]  ;;  %s855_s10 = smov [#allocation30]  ;;  %v730_v6 = vmov %v1914_v6  ;;  %v733_v7 = vmov %v1916_v7 }
 0x12b   : >>> { %v525_v3 = vrot.slane %v524_v0, 2  ;;  %v864_v61 = vld [vmem:[%s1986_s14] sm:$0x3]  ;;  %vm723_vm0 = vcmp.eq.s32.totalorder %v719_v7, %v716_v6  ;;  %v689_v6 = vmov %v1914_v6  ;;  %v692_v7 = vmov %v1916_v7  ;;  %s489_s16 = sadd.s32 1, %s1775_s16  }
 0x12c   : >>> { %v506_v4 = vadd.f32 %v505_v1, %v504_v62  ;;  %v545_v5 = vrot.slane %v544_v2, 2  ;;  %v703_v6 = vmov %v1914_v6  ;;  %v706_v7 = vmov %v1916_v7  ;;  %p486_p11 = scmp.ge.s32.totalorder %s489_s16, 3  }
 0x12d   : >>> { %v526_v8 = vadd.f32 %v525_v3, %v524_v0  ;;  %vm738_vm1 = vcmp.eq.s32.totalorder %v733_v7, %v730_v6  ;;  %vm697_vm3 = vcmp.eq.s32.totalorder %v692_v7, %v689_v6  ;;  %vm710_vm4 = vcmp.eq.s32.totalorder %v706_v7, %v703_v6 }
 0x12e   : >>> { %v507_v9 = vrot.slane %v506_v4, 1  ;;  %v546_v10 = vadd.f32 %v545_v5, %v544_v2  ;;  %vm752_vm5 = vcmp.eq.s32.totalorder %v1914_v6, 0  ;;  %vm756_vm6 = vcmp.eq.s32.totalorder %v1914_v6, 1 }
 0x12f   : >>> { %v527_v11 = vrot.slane %v526_v8, 1  ;;  %v390_v6 = vmov (%p486_p11), %v1914_v6  ;;  %v393_v7 = vmov (%p486_p11), %v1916_v7 }
 0x130   : >>> { %v508_v12 = vadd.f32 %v507_v9, %v506_v4  ;;  %v547_v13 = vrot.slane %v546_v10, 1  ;;  %v443_v6 = vmov (%p486_p11), %v1914_v6  ;;  %vm405_vm7 = vcmp.eq.s32.totalorder (%p486_p11), %v393_v7, %v390_v6 }
 0x131   : >>> { %v528_v14 = vadd.f32 %v527_v11, %v526_v8  ;;  %v446_v7 = vmov (%p486_p11), %v1916_v7  ;;  %v409_v6 = vmov (%p486_p11), %v1914_v6 }
 0x132   : >>> { %509 = vst [vmem:[%s491_s23] sm:$0x1] %v508_v12  ;;  %v548_v15 = vadd.f32 %v547_v13, %v546_v10  ;;  %s593_s23 = smov [#allocation26]  ;;  %v412_v7 = vmov (%p486_p11), %v1916_v7  ;;  %v426_v6 = vmov (%p486_p11), %v1914_v6 }
 0x133   : >>> { %529 = vst [vmem:[%s511_s24] sm:$0x1] %v528_v14  ;;  %s550_s24 = smov [#allocation27]  ;;  %v429_v7 = vmov (%p486_p11), %v1916_v7 }
 0x134   : >>> { %549 = vst [vmem:[%s531_s25] sm:$0x1] %v548_v15  ;;  %s551_s25 = smov [#allocation28]  ;;  %s595_s24 = smov %s550_s24 }
 0x135   : >>> { %s597_s25 = smov %s551_s25 }
 0x139   : >>> { %v553_v18 = vld [vmem:[%s552_s30] sm:$0xff]  ;;  %s614_s30 = smov [#allocation28] }
 0x13a   : >>> { %v555_v16 = vld [vmem:[%s554_s27] sm:$0xff]  ;;  %v576_v31 = vand.u32 2147483647, %v553_v18  ;;  %s599_s27 = smov [#allocation27] }
 0x13b   : >>> { %v559_v17 = vmul.f32 2.0, %v555_v16  ;;  %v557_v19 = vld [vmem:[%s556_s20] sm:$0xff]  ;;  %v577_v36 = vand.u32 2147483647, %v555_v16  ;;  %s612_s20 = smov [#allocation29] }
 0x13c   : >>> { %v558_v20 = vsub.f32 %v557_v19, %v553_v18  ;;  %v578_v32 = vand.u32 2147483647, %v557_v19 }
 0x13d   : >>> { %1697 = vrcp.f32 %v559_v17 }
 0x13e   : >>> { %v579_v35 = vmin.f32 %v576_v31, %v578_v32 }
 0x140   : >>> { %v580_v37 = vmul.f32 1.1920929e-08, %v579_v35 }
 0x142   : >>> { %vm581_vm11 = vcmp.le.f32.partialorder %v577_v36, %v580_v37 }
 0x147   : >>> { %v1698_v21 = vpop.eup %1697 }
 0x148   : >>> { %v561_v22 = vmul.f32 %v1698_v21, %v558_v20 }
 0x14a   : >>> { %v563_v23 = vmul.f32 %v561_v22, %v561_v22  ;;  %vm562_vm10 = vcmp.ge.f32.partialorder %v561_v22, 0.0 }
 0x14c   : >>> { %v564_v24 = vadd.f32 1.0, %v563_v23 }
 0x14e   : >>> { %1699 = vrsqrt.f32 %v564_v24  ;;  %vm567_vm8 = vcmp.eq.f32.partialorder %v564_v24, inf  ;;  %v570_v26 = vand.u32 2147483648, %v564_v24  ;;  %vm569_vm9 = vcmp.eq.f32.partialorder %v564_v24, 0.0 }
 0x158   : >>> { %v1700_v25 = vpop.eup %1699 }
 0x159   : >>> { %v566_v27 = vmul.f32 %v1700_v25, %v564_v24 }
 0x15b   : >>> { %v568_v28 = vsel %vm567_vm8, %v564_v24, %v566_v27  ;;  %vm458_vm8 = vcmp.eq.s32.totalorder (%p486_p11), %v446_v7, %v443_v6 }
 0x15c   : >>> { %v571_v29 = vsel %vm569_vm9, %v570_v26, %v568_v28 }
 0x15d   : >>> { %v572_v30 = vxor.u32 2147483648, %v571_v29 }
 0x15f   : >>> { %v573_v33 = vsel %vm562_vm10, %v571_v29, %v572_v30 }
 0x160   : >>> { %v574_v34 = vadd.f32 %v573_v33, %v561_v22 }
 0x162   : >>> { %1701 = vrcp.f32 %v574_v34 }
 0x16c   : >>> { %v1702_v38 = vpop.eup %1701 }
 0x16d   : >>> { %v582_v39 = vsel %vm581_vm11, 0.0, %v1702_v38 }
 0x16e   : >>> { %v583_v40 = vmul.f32 %v582_v39, %v582_v39  ;;  %v587_v41 = vmul.f32 %v582_v39, %v555_v16 }
 0x170   : >>> { %v584_v42 = vadd.f32 1.0, %v583_v40  ;;  %v588_v43 = vsub.f32 %v553_v18, %v587_v41  ;;  %v590_v44 = vadd.f32 %v587_v41, %v557_v19 }
 0x172   : >>> { %1703 = vrsqrt.f32 %v584_v42  ;;  %592 = vst [vmem:[%s591_s21] sm:$0xff] %v588_v43  ;;  %594 = vst [vmem:[%s593_s23] sm:$0xff] %v590_v44  ;;  %s629_s21 = smov [#allocation29]  ;;  %s1970_s23 = smov [#allocation18] }
 0x173   : >>> { %v637_v53 = vld [vmem:[%s1970_s23] sm:$0x3] }
 0x17c   : >>> { %v1704_v45 = vpop.eup %1703 }
 0x17d   : >>> { %596 = vst [vmem:[%s595_s24] sm:$0xff] %v1704_v45  ;;  %v586_v46 = vmul.f32 %v1704_v45, %v582_v39  ;;  %s627_s24 = smov [#allocation30] }
 0x17f   : >>> { %598 = vst [vmem:[%s597_s25] sm:$0xff] %v586_v46  ;;  %s1972_s25 = smov [#allocation19] }
 0x180   : >>> { %v638_v54 = vld [vmem:[%s1972_s25] sm:$0x3] }
 0x184   : >>> { %v600_v47 = vld [vmem:[%s599_s27] ss:$0 sm:$0xff]  ;;  %s1976_s27 = smov [#allocation21] }
 0x185   : >>> { %v609_v48 = vsel %vm608_vm12, %v600_v47, 0.0  ;;  %v640_v56 = vld [vmem:[%s1976_s27] sm:$0x3] }
 0x186   : >>> { %610 = vadd.xlane.f32.xlu0 %v609_v48  ;;  %v615_v49 = vld [vmem:[%s614_s30] ss:$0 sm:$0xff]  ;;  %s1978_s30 = smov [#allocation10] }
 0x187   : >>> { %v624_v50 = vsel %vm623_vm13, %v615_v49, 0.0  ;;  %v861_v57 = vld [vmem:[%s1978_s30] sm:$0x3] }
 0x18a   : >>> { %625 = vadd.xlane.f32.xlu0 %v624_v50 }
 0x213   : >>> { %v611_v51 = vpop.xlane.xlu0 %610 }
 0x214   : >>> { %613 = vst [vmem:[%s612_s20] sm:$0xff] %v611_v51  ;;  %s1982_s20 = smov [#allocation14] }
 0x215   : >>> { %v863_v59 = vld [vmem:[%s1982_s20] sm:$0x3] }
 0x217   : >>> { %v626_v52 = vpop.xlane.xlu0 %625 }
 0x218   : >>> { %628 = vst [vmem:[%s627_s24] sm:$0xff] %v626_v52  ;;  %s2006_s24 = smov [#allocation21] }
 0x21b   : >>> { %v630_v60 = vld [vmem:[%s629_s21] sm:$0xff]  ;;  %s2004_s21 = smov [#allocation20] }
 0x21c   : >>> { %v854_v62 = vld [vmem:[%s853_s19] sm:$0xff]  ;;  %v641_v63 = vmul.f32 %v637_v53, %v630_v60  ;;  %v644_v0 = vmul.f32 %v638_v54, %v630_v60  ;;  %v648_v1 = vmul.f32 %v639_v55, %v630_v60  ;;  %v651_v2 = vmul.f32 %v640_v56, %v630_v60  ;;  %s2002_s19 = smov [#allocation10] }
 0x21d   : >>> { %v865_v3 = vmul.f32 %v861_v57, %v854_v62  ;;  %v868_v4 = vmul.f32 %v862_v58, %v854_v62  ;;  %v872_v5 = vmul.f32 %v863_v59, %v854_v62  ;;  %v875_v8 = vmul.f32 %v864_v61, %v854_v62 }
 0x21f   : >>> { %v632_v9 = vld [vmem:[%s631_s9] sm:$0xff]  ;;  %s659_s9 = smov [#allocation28] }
 0x220   : >>> { %v856_v10 = vld [vmem:[%s855_s10] sm:$0xff]  ;;  %v642_v11 = vmul.f32 %v639_v55, %v632_v9  ;;  %v645_v12 = vmul.f32 %v640_v56, %v632_v9  ;;  %v647_v13 = vmul.f32 %v637_v53, %v632_v9  ;;  %v650_v14 = vmul.f32 %v638_v54, %v632_v9  ;;  %s657_s10 = smov [#allocation27] }
 0x221   : >>> { %v866_v15 = vmul.f32 %v863_v59, %v856_v10  ;;  %v869_v16 = vmul.f32 %v864_v61, %v856_v10  ;;  %v871_v17 = vmul.f32 %v861_v57, %v856_v10  ;;  %v874_v18 = vmul.f32 %v862_v58, %v856_v10  ;;  %v658_v27 = vld [vmem:[%s657_s10] ss:$0 sm:$0xff]  ;;  %s686_s10 = smov [#allocation25] }
 0x222   : >>> { %v643_v19 = vsub.f32 %v641_v63, %v642_v11  ;;  %v646_v20 = vsub.f32 %v644_v0, %v645_v12  ;;  %v649_v21 = vadd.f32 %v648_v1, %v647_v13  ;;  %v652_v22 = vadd.f32 %v651_v2, %v650_v14  ;;  %v660_v28 = vld [vmem:[%s659_s9] ss:$0 sm:$0xff]  ;;  %s685_s9 = smov [#allocation18] }
 0x223   : >>> { %v867_v23 = vsub.f32 %v865_v3, %v866_v15  ;;  %v870_v24 = vsub.f32 %v868_v4, %v869_v16  ;;  %v873_v25 = vadd.f32 %v872_v5, %v871_v17  ;;  %v876_v26 = vadd.f32 %v875_v8, %v874_v18  ;;  %v693_v63 = vld [vmem:[%s686_s10] ss:$0 sm:$0xff]  ;;  %s929_s10 = sadd.s32 (%p486_p11), 1, %s1771_s28  }
 0x224   : >>> { %654 = vst [vmem:[%s1972_s25] sm:$0x3] %v646_v20  ;;  %656 = vst [vmem:[%s1976_s27] sm:$0x3] %v652_v22  ;;  %s2008_s25 = smov [#allocation18]  ;;  %s727_s27 = smov [#allocation26] }
 0x225   : >>> { %653 = vst [vmem:[%s1970_s23] sm:$0x3] %v643_v19  ;;  %655 = vst [vmem:[%s1974_s17] sm:$0x3] %v649_v21  ;;  %s2010_s17 = smov [#allocation14]  ;;  %s2018_s23 = smov [#allocation19]  ;;  %v734_v59 = vld [vmem:[%s727_s27] ss:$0 sm:$0xff] }
 0x226   : >>> { %877 = vst [vmem:[%s1978_s30] sm:$0x3] %v867_v23  ;;  %878 = vst [vmem:[%s1980_s18] sm:$0x3] %v870_v24  ;;  %s2012_s18 = smov [#allocation12]  ;;  %s713_s30 = smov [#allocation20] }
 0x227   : >>> { %879 = vst [vmem:[%s1982_s20] sm:$0x3] %v873_v25  ;;  %880 = vst [vmem:[%s1986_s14] sm:$0x3] %v876_v26  ;;  %s2016_s14 = smov [#allocation16]  ;;  %s726_s20 = smov [#allocation21] }
 0x228   : >>> { %s829_s27 = smov [#allocation19]  ;;  %p482_p12 = scmp.ge.s32.totalorder (%p486_p11), %s929_s10, 15 }
 0x229   : >> { %s2220_s28 = smov (%p486_p11), %s929_s10 }
 0x22b   : >>> { %v668_v30 = vld [vmem:[%s2006_s24] sm:$0x3] }
 0x22c   : >>> { %v667_v29 = vld [vmem:[%s2004_s21] sm:$0x3]  ;;  %v676_v36 = vmul.f32 %v668_v30, %v660_v28  ;;  %v679_v42 = vmul.f32 %v668_v30, %v658_v27 }
 0x22d   : >>> { %v665_v31 = vld [vmem:[%s2008_s25] sm:$0x3]  ;;  %v675_v35 = vmul.f32 %v667_v29, %v658_v27  ;;  %v678_v37 = vmul.f32 %v667_v29, %v660_v28 }
 0x22e   : >>> { %v883_v32 = vld [vmem:[%s2002_s19] ss:$0 sm:$0xff]  ;;  %v1589_v34 = vld [vmem:[%s2002_s19 + $0x1] ss:$0 sm:$0xff]  ;;  %v669_v48 = vmul.f32 %v665_v31, %v658_v27  ;;  %v672_v49 = vmul.f32 %v665_v31, %v660_v28 }
 0x22f   : >>> { %v1588_v33 = vld [vmem:[%s2002_s19 - $0x1] sm:$0x2]  ;;  %v1591_v40 = vld [vmem:[%s2010_s17 + $0x1] sm:$0x1]  ;;  %v677_v47 = vsub.f32 %v675_v35, %v676_v36  ;;  %v680_v53 = vadd.f32 %v679_v42, %v678_v37 }
 0x230   : >>> { %v890_v38 = vsel %vm813_vm14, %v883_v32, %v1588_v33  ;;  %v894_v39 = vld [vmem:[%s2010_s17] ss:$0 sm:$0xff]  ;;  %v902_v43 = vsel %vm825_vm15, %v1589_v34, %v1591_v40  ;;  %v1593_v45 = vld [vmem:[%s2012_s18 + $0x1] ss:$0 sm:$0xff] }
 0x231   : >>> { %v907_v41 = vld [vmem:[%s2012_s18] ss:$0 sm:$0xff]  ;;  %893 = vst [vmem:[%s2002_s19] sm:$0x3] %v890_v38  ;;  %904 = vst [vmem:[%s2010_s17] sm:$0x3] %v902_v43  ;;  %v1595_v51 = vld [vmem:[%s2016_s14 + $0x1] sm:$0x1] }
 0x232   : >>> { %v1592_v44 = vld [vmem:[%s2012_s18 - $0x1] sm:$0x2]  ;;  %1590 = vst [vmem:[%s2002_s19 + $0x1] sm:$0x1] %v894_v39  ;;  %v926_v54 = vsel %vm825_vm15, %v1593_v45, %v1595_v51  ;;  %683 = vst [vmem:[%s2004_s21] sm:$0x3] %v677_v47  ;;  %s700_s19 = smov [#allocation19] }
 0x233   : >>> { %v918_v46 = vld [vmem:[%s2016_s14] ss:$0 sm:$0xff]  ;;  %v914_v50 = vsel %vm813_vm14, %v907_v41, %v1592_v44  ;;  %684 = vst [vmem:[%s2006_s24] sm:$0x3] %v680_v53  ;;  %s2060_s21 = smov [#allocation20]  ;;  %s1778_s24 = smov 1  }
 0x234   : >>> { %v666_v52 = vld [vmem:[%s2018_s23] sm:$0x3]  ;;  %917 = vst [vmem:[%s2012_s18] sm:$0x3] %v914_v50  ;;  %928 = vst [vmem:[%s2016_s14] sm:$0x3] %v926_v54  ;;  %s742_s17 = smov [#allocation19]  ;;  %s2063_s14 = smov [#allocation21] }
 0x235   : >>> { %v670_v55 = vmul.f32 %v666_v52, %v660_v28  ;;  %v673_v56 = vmul.f32 %v666_v52, %v658_v27  ;;  %1594 = vst [vmem:[%s2012_s18 + $0x1] sm:$0x1] %v918_v46  ;;  %s1779_s18 = smov 127  }
 0x237   : >>> { %v671_v57 = vsub.f32 %v669_v48, %v670_v55  ;;  %v674_v58 = vadd.f32 %v673_v56, %v672_v49 }
 0x239   : >>> { %681 = vst [vmem:[%s2008_s25] sm:$0x3] %v671_v57  ;;  %682 = vst [vmem:[%s2018_s23] sm:$0x3] %v674_v58  ;;  %v720_v60 = vld [vmem:[%s713_s30] sm:$0x3]  ;;  %s741_s25 = smov [#allocation18]  ;;  %s805_s23 = smov [#allocation18] }
 0x23a   : >>> { %v724_v61 = vsel %vm723_vm0, 0.0, %v720_v60  ;;  %v735_v62 = vld [vmem:[%s726_s20] sm:$0x3] }
 0x23b   : >>> { %725 = vst [vmem:[%s713_s30] sm:$0x3] %v724_v61  ;;  %v739_v0 = vsel %vm738_vm1, %v734_v59, %v735_v62  ;;  %s806_s30 = smov [#allocation20] }
 0x23c   : >>> { %740 = vst [vmem:[%s726_s20] sm:$0x3] %v739_v0  ;;  %s830_s20 = smov [#allocation21] }
 0x240   : >>> { %v694_v1 = vld [vmem:[%s685_s9] sm:$0x3] }
 0x241   : >>> { %v707_v2 = vld [vmem:[%s700_s19] sm:$0x3]  ;;  %v698_v3 = vsel %vm697_vm3, %v693_v63, %v694_v1 }
 0x242   : >>> { %v711_v4 = vsel %vm710_vm4, 0.0, %v707_v2  ;;  %699 = vst [vmem:[%s685_s9] sm:$0x3] %v698_v3  ;;  %v779_v5 = vld [vmem:[%s2060_s21] sm:$0x3]  ;;  %s394_s9 = smov (%p486_p11), [#allocation18] }
 0x243   : >>> { %712 = vst [vmem:[%s700_s19] sm:$0x3] %v711_v4  ;;  %780 = vrot.lane.b32.xlu0 %v779_v5, %s1778_s24  ;;  %v775_v11 = vld [vmem:[%s2063_s14] sm:$0x3]  ;;  %s413_s19 = smov (%p486_p11), [#allocation19] }
 0x244   : >>> { %v796_v12 = vld [vmem:[%s2063_s14] sm:$0x3] }
 0x245   : >>> { %v778_v30 = vld [vmem:[%s2060_s21] sm:$0x3] }
 0x249   : >>> { %v747_v8 = vld [vmem:[%s741_s25] sm:$0x3] }
 0x24a   : >>> { %748 = vrot.lane.b32.xlu1 %v747_v8, %s1778_s24  ;;  %v743_v9 = vld [vmem:[%s742_s17] sm:$0x3] }
 0x24b   : >>> { %v764_v10 = vld [vmem:[%s742_s17] sm:$0x3] }
 0x24c   : >>> { %v746_v18 = vld [vmem:[%s741_s25] sm:$0x3] }
 0x24e   : >>> { %744 = vrot.lane.b32.xlu1 %v743_v9, %s1778_s24 }
 0x252   : >>> { %765 = vrot.lane.b32.xlu1 %v764_v10, %s1779_s18 }
 0x256   : >>> { %776 = vrot.lane.b32.xlu1 %v775_v11, %s1778_s24  ;;  %s447_s24 = smov (%p486_p11), [#allocation21] }
 0x25a   : >>> { %797 = vrot.lane.b32.xlu1 %v796_v12, %s1779_s18 }
 0x2b5   : >>> { %v781_v20 = vpop.permute.xlu0 %780 }
 0x2b6   : >>> { %v785_v22 = vsel %vm752_vm5, %v779_v5, %v781_v20 }
 0x2bc   : >>> { %v749_v13 = vpop.permute.xlu1 %748 }
 0x2bd   : >>> { %v753_v14 = vsel %vm752_vm5, %v747_v8, %v749_v13 }
 0x2c0   : >>> { %v745_v15 = vpop.permute.xlu1 %744 }
 0x2c1   : >>> { %v757_v16 = vsel %vm756_vm6, %v745_v15, %v753_v14 }
 0x2c2   : >>> { %v763_v17 = vsel %vm1433_vm2, %v757_v16, 0.0 }
 0x2c3   : >>> { %771 = vst [vmem:[%s741_s25] sm:$0x3] %v763_v17 }
 0x2c4   : >>> { %v766_v19 = vpop.permute.xlu1 %765 }
 0x2c5   : >>> { %v770_v21 = vsel %vm756_vm6, %v746_v18, %v766_v19 }
 0x2c6   : >>> { %772 = vst [vmem:[%s742_s17] sm:$0x3] %v770_v21 }
 0x2c8   : >>> { %v777_v23 = vpop.permute.xlu1 %776 }
 0x2c9   : >>> { %v789_v24 = vsel %vm756_vm6, %v777_v23, %v785_v22 }
 0x2ca   : >>> { %v807_v25 = vld [vmem:[%s805_s23] ss:$0 sm:$0xff]  ;;  %v1581_v27 = vld [vmem:[%s805_s23 + $0x1] ss:$0 sm:$0xff]  ;;  %v795_v29 = vsel %vm1433_vm2, %v789_v24, 0.0 }
 0x2cb   : >>> { %v1580_v26 = vld [vmem:[%s805_s23 - $0x1] sm:$0x2]  ;;  %803 = vst [vmem:[%s2060_s21] sm:$0x3] %v795_v29  ;;  %s430_s21 = smov (%p486_p11), [#allocation20] }
 0x2cc   : >>> { %v814_v28 = vsel %vm813_vm14, %v807_v25, %v1580_v26  ;;  %v798_v31 = vpop.permute.xlu1 %797 }
 0x2cd   : >>> { %817 = vst [vmem:[%s805_s23] sm:$0x3] %v814_v28  ;;  %v831_v32 = vld [vmem:[%s829_s27] ss:$0 sm:$0xff]  ;;  %v1585_v34 = vld [vmem:[%s829_s27 + $0x1] ss:$0 sm:$0xff]  ;;  %v802_v35 = vsel %vm756_vm6, %v778_v30, %v798_v31 }
 0x2ce   : >>> { %v1584_v33 = vld [vmem:[%s829_s27 - $0x1] sm:$0x2]  ;;  %804 = vst [vmem:[%s2063_s14] sm:$0x3] %v802_v35 }
 0x2cf   : >>> { %v838_v36 = vsel %vm813_vm14, %v831_v32, %v1584_v33 }
 0x2d0   : >>> { %841 = vst [vmem:[%s829_s27] sm:$0x3] %v838_v36 }
 0x2d2   : >>> { %v818_v37 = vld [vmem:[%s806_s30] ss:$0 sm:$0xff]  ;;  %v1583_v38 = vld [vmem:[%s806_s30 + $0x1] sm:$0x1] }
 0x2d3   : >>> { %1582 = vst [vmem:[%s805_s23 + $0x1] sm:$0x1] %v818_v37  ;;  %v826_v39 = vsel %vm825_vm15, %v1581_v27, %v1583_v38  ;;  %488 = sbr.rel (!%p486_p11) target bundleno = 291 (0x123), region = 470 }
 0x2d4   : >>> { %828 = vst [vmem:[%s806_s30] sm:$0x3] %v826_v39 }
 0x2d5   : >>> { %v842_v40 = vld [vmem:[%s830_s20] ss:$0 sm:$0xff]  ;;  %v1587_v41 = vld [vmem:[%s830_s20 + $0x1] sm:$0x1] }
 0x2d6   : >>> { %1586 = vst [vmem:[%s829_s27 + $0x1] sm:$0x1] %v842_v40  ;;  %v850_v42 = vsel %vm825_vm15, %v1585_v34, %v1587_v41 }
 0x2d7   : >>> { %852 = vst [vmem:[%s830_s20] sm:$0x3] %v850_v42 }
 0x2da   : >> { %v400_v43 = vld [vmem:[%s394_s9] sm:$0x3] }
 0x2db   : >> { %v401_v45 = vsel %vm1433_vm2, %v400_v43, 0.0  ;;  %v436_v47 = vld [vmem:[%s430_s21] sm:$0x3] }
 0x2dc   : >> { %v402_v49 = vmul.f32 %v401_v45, %v401_v45  ;;  %v437_v51 = vsel %vm1433_vm2, %v436_v47, 0.0 }
 0x2dd   : >> { %v419_v44 = vld [vmem:[%s413_s19] sm:$0x3]  ;;  %v438_v53 = vmul.f32 %v437_v51, %v437_v51 }
 0x2de   : >> { %v420_v46 = vsel %vm1433_vm2, %v419_v44, 0.0  ;;  %v453_v48 = vld [vmem:[%s447_s24] sm:$0x3]  ;;  %v406_v56 = vsel %vm405_vm7, 0.0, %v402_v49 }
 0x2df   : >> { %v421_v50 = vmul.f32 %v420_v46, %v420_v46  ;;  %v454_v52 = vsel %vm1433_vm2, %v453_v48, 0.0 }
 0x2e0   : >> { %v455_v55 = vmul.f32 %v454_v52, %v454_v52 }
 0x2e1   : >> { %v423_v54 = vadd.f32 %v421_v50, %v402_v49  ;;  %v422_v57 = vadd.f32 %v421_v50, %v406_v56 }
 0x2e2   : >> { %v459_v60 = vsel %vm458_vm8, 0.0, %v455_v55 }
 0x2e3   : >> { %v440_v58 = vadd.f32 %v438_v53, %v423_v54  ;;  %v439_v59 = vadd.f32 %v438_v53, %v422_v57 }
 0x2e5   : >> { %v461_v61 = vadd.f32 %v455_v55, %v440_v58  ;;  %v460_v62 = vadd.f32 %v459_v60, %v439_v59 }
 0x2e7   : >> { %462 = vadd.xlane.f32.xlu0 %v461_v61 }
 0x2eb   : >> { %470 = vadd.xlane.f32.xlu0 %v460_v62 }
 0x374   : >> { %v463_v63 = vpop.xlane.xlu0 %462 }
 0x375   : >> { %v464_v0 = vrot.slane %v463_v63, 4 }
 0x377   : >> { %v465_v1 = vadd.f32 %v464_v0, %v463_v63 }
 0x378   : >> { %v471_v2 = vpop.xlane.xlu0 %470 }
 0x379   : >> { %v466_v3 = vrot.slane %v465_v1, 2  ;;  %v472_v4 = vrot.slane %v471_v2, 4 }
 0x37b   : >> { %v473_v5 = vadd.f32 %v472_v4, %v471_v2  ;;  %v467_v8 = vadd.f32 %v466_v3, %v465_v1 }
 0x37d   : >> { %v474_v9 = vrot.slane %v473_v5, 2  ;;  %v468_v11 = vrot.slane %v467_v8, 1 }
 0x37f   : >> { %v475_v10 = vadd.f32 %v474_v9, %v473_v5  ;;  %v469_v14 = vadd.f32 %v468_v11, %v467_v8 }
 0x381   : >> { %v476_v12 = vrot.slane %v475_v10, 1 }
 0x383   : >> { %v477_v13 = vadd.f32 %v476_v12, %v475_v10 }
 0x385   : >> { %1618 = vpush %v477_v13 }
 0x386   : >> { %1620 = vpush %v469_v14 }
 0x3b6   : >> { %s1619_s16 = spop %1618 }
 0x3b7   : >> { %s1621_s25 = spop %1620 }
 0x3b8   : >> { %s480_s17 = smul.f32 1e-10, %s1621_s25 }
 0x3ba   : >> { %p481_p13 = scmp.le.f32.partialorder %s1619_s16, %s480_s17 }
 0x3bc   : >> { %p483_p0 = por %p482_p12, %p481_p13 }
 0x3be   : > { %931 = sbr.rel (!%p483_p0) target bundleno = 290 (0x122), region = 481 }
 0x3c5 PF: > { %s936_s18 = smov [#allocation18]  ;;  %v940_v6 = vmov %v1914_v6  ;;  %v943_v7 = vmov %v1916_v7  ;;  %v979_v15 = vld [vmem:[#allocation10] sm:$0x3]  ;;  %v985_v16 = vld [vmem:[#allocation12] sm:$0x3]  ;;  %s2221_s28 = scalar_lea.vmem [#allocation11], %s1910_s26 }
 0x3c6   : > { %v960_v6 = vmov %v1914_v6  ;;  %v963_v7 = vmov %v1916_v7  ;;  %v944_v17 = vld [vmem:[%s936_s18] sm:$0x3]  ;;  %vm947_vm9 = vcmp.eq.s32.totalorder %v943_v7, %v940_v6  ;;  %981 = vst [vmem:[%s2221_s28] sm:$0x3] %v979_v15  ;;  %s2222_s14 = scalar_lea.vmem [#allocation13], %s1910_s26  ;;  %v991_v18 = vld [vmem:[#allocation14] sm:$0x3] }
 0x3c7   : > { %vm967_vm10 = vcmp.eq.s32.totalorder %v963_v7, %v960_v6  ;;  %987 = vst [vmem:[%s2222_s14] sm:$0x3] %v985_v16  ;;  %v997_v19 = vld [vmem:[#allocation16] sm:$0x3]  ;;  %v948_v20 = vsel %vm947_vm9, %v944_v17, 0.0  ;;  %s956_s23 = smov [#allocation21]  ;;  %s2223_s27 = scalar_lea.vmem [#allocation15], %s1910_s26 }
 0x3c8   : > { %993 = vst [vmem:[%s2223_s27] sm:$0x3] %v991_v18  ;;  %s2224_s30 = scalar_lea.vmem [#allocation17], %s1910_s26  ;;  %v949_v21 = vrot.slane %v948_v20, 4  ;;  %v964_v22 = vld [vmem:[%s956_s23] sm:$0x3]  ;;  %s932_s20 = sand.u32 7, %s1751_s11  }
 0x3c9   : > { %999 = vst [vmem:[%s2224_s30] sm:$0x3] %v997_v19  ;;  %v968_v23 = vsel %vm967_vm10, %v964_v22, 0.0  ;;  %s2225_s10 = scalar_lea.vmem [#allocation8], %s1912_s29  ;;  %s2226_s19 = scalar_lea.vmem [#allocation9], %s1912_s29 }
 0x3ca   : > { %v950_v24 = vadd.f32 %v949_v21, %v948_v20  ;;  %v969_v25 = vrot.slane %v968_v23, 4  ;;  %s933_s9 = scalar_lea.vmem %s2225_s10, %s932_s20 [#allocation8]  ;;  %s935_s21 = scalar_lea.vmem %s2226_s19, %s932_s20 [#allocation9] }
 0x3cb   : > { %s937_s9 = smov %s933_s9  ;;  %s957_s21 = smov %s935_s21 }
 0x3cc   : > { %v951_v6 = vrot.slane %v950_v24, 2  ;;  %v970_v7 = vadd.f32 %v969_v25, %v968_v23  ;;  %s1027_s24 = sshrl.u32 (%p1879_p4), %s1751_s11, 3  ;;  %s2227_s25 = scalar_lea.vmem (%p1879_p4), [#allocation8], %s1912_s29 }
 0x3cd   : > { %s1028_s16 = sadd.s32 (%p1879_p4), %s1755_s12, %s1027_s24 }
 0x3ce   : > { %v952_v26 = vadd.f32 %v951_v6, %v950_v24  ;;  %v971_v27 = vrot.slane %v970_v7, 2  ;;  %s1602_s17 = sshll.u32 (%p1879_p4), %s1028_s16, 3 }
 0x3cf   : > { %s1030_s14 = scalar_lea.vmem (%p1879_p4), %s2201_s4, %s1602_s17 }
 0x3d0   : > { %v953_v28 = vrot.slane %v952_v26, 1  ;;  %v972_v29 = vadd.f32 %v971_v27, %v970_v7  ;;  %1026 = sbr.rel (!%p1879_p4) target bundleno = 989 (0x3dd), region = 158 }
 0x3d2   : > { %v954_v30 = vadd.f32 %v953_v28, %v952_v26  ;;  %v973_v31 = vrot.slane %v972_v29, 1 }
 0x3d4   : > { %955 = vst [vmem:[%s937_s9] sm:$0x1] %v954_v30  ;;  %v974_v32 = vadd.f32 %v973_v31, %v972_v29 }
 0x3d6   : > { %975 = vst [vmem:[%s957_s21] sm:$0x1] %v974_v32 }
 0x3db   : > { %v1058_v33 = vld [vmem:[%s2227_s25] sm:$0xff] }
 0x3dc   : > { %1059 = vst [vmem:[%s1030_s14] sm:$0xff] %v1058_v33 }
 0x3dd PF: > { %1065 = sbr.rel (!%p1879_p4) target bundleno = 997 (0x3e5), region = 196  ;;  %s1066_s23 = sshrl.u32 (%p1879_p4), %s1751_s11, 3 }
 0x3de   : > { %s1067_s27 = sadd.s32 (%p1879_p4), %s1755_s12, %s1066_s23  ;;  %s2228_s30 = scalar_lea.vmem (%p1879_p4), [#allocation9], %s1912_s29 }
 0x3df   : > { %s1603_s20 = sshll.u32 (%p1879_p4), %s1067_s27, 3 }
 0x3e0   : > { %s1069_s19 = scalar_lea.vmem (%p1879_p4), %s2202_s5, %s1603_s20 }
 0x3e3   : > { %v1097_v34 = vld [vmem:[%s2228_s30] sm:$0xff] (%p1879_p4) }
 0x3e4   : > { %1098 = vst [vmem:[%s1069_s19] sm:$0xff] %v1097_v34 }
 0x3e5 PF: > { %s1604_s22 = sshll.u32 %s1755_s12, 3  ;;  %s2229_s24 = scalar_lea.vmem [#allocation11], %s1910_s26 }
 0x3e6   : > { %s1103_s21 = sadd.s32 %s1751_s11, %s1604_s22  ;;  %v1121_v35 = vld [vmem:[%s2229_s24] sm:$0x3]  ;;  %s2230_s16 = scalar_lea.vmem [#allocation13], %s1910_s26 }
 0x3e7   : > { %v1156_v36 = vld [vmem:[%s2230_s16] sm:$0x3]  ;;  %s1605_s29 = sshll.u32 %s1103_s21, 1  ;;  %s2231_s25 = scalar_lea.vmem [#allocation15], %s1910_s26 }
 0x3e8   : > { %v1191_v37 = vld [vmem:[%s2231_s25] sm:$0x3]  ;;  %s2232_s17 = scalar_lea.vmem [#allocation17], %s1910_s26  ;;  %s1105_s14 = scalar_lea.vmem %s2203_s6, %s1605_s29 }
 0x3e9   : > { %v1226_v38 = vld [vmem:[%s2232_s17] sm:$0x3]  ;;  %s1140_s30 = scalar_lea.vmem %s2204_s7, %s1605_s29  ;;  %1122 = vst [vmem:[%s1105_s14] sm:$0x3] %v1121_v35  ;;  %s1175_s20 = scalar_lea.vmem %s2205_s8, %s1605_s29 }
 0x3ea   : > { %1157 = vst [vmem:[%s1140_s30] sm:$0x3] %v1156_v36  ;;  %s2233_s19 = sld [smem:[#allocation36_spill]]  ;;  %1192 = vst [vmem:[%s1175_s20] sm:$0x3] %v1191_v37 }
 0x3f0   : > { %s1210_s22 = scalar_lea.vmem %s2233_s19, %s1605_s29 }
 0x3f1   : > { %1227 = vst [vmem:[%s1210_s22] sm:$0x3] %v1226_v38 }
 0x3f2 PF: > { %s16_s15 = sadd.s32 1, %s1767_s15   ;;  %s2234_s30 = sld [smem:[#allocation31_spill]] }
 0x3f3   : > { %p13_p1 = scmp.ge.s32.totalorder %s16_s15, 18   ;;  %s2235_s10 = sld [smem:[#allocation35_spill]] }
 0x3f4   : > { %s2236_s12 = sld [smem:[#allocation32_spill]]  ;;  %s2237_s26 = sld [smem:[#allocation33_spill]] }
 0x3f5   : > { %s2238_s14 = sld [smem:[#allocation34_spill]]  ;;  %s2239_s11 = smov %s1759_s13 }
 0x3f6   :  { %15 = sbr.rel (!%p13_p1) target bundleno = 6 (0x6), region = 492 }
 0x3fa   : > { %s2240_s13 = smov %s2237_s26 }

// kernel: algebraic_triangulation_forward.1
= control target key start
LH: loop header
LB: loop body
LE: loop exit
PB: predicated region body
PF: predicated region fallthrough
CT: control target
= control target key end

     0   :  { %s2618_s0 = inlined_call_operand.vmem [shape: f32[8,256], index: 0, kind: input, shape index: {}]   ;;  %s2619_s1 = inlined_call_operand.vmem [shape: f32[8,256], index: 1, kind: input, shape index: {}]   ;;  %s2620_s2 = inlined_call_operand.vmem [shape: f32[8,256], index: 2, kind: input, shape index: {}]   ;;  %s2621_s3 = inlined_call_operand.vmem [shape: f32[8,12], index: 3, kind: input, shape index: {}]   ;;  %s2622_s4 = inlined_call_operand.vmem [shape: f32[3,8], index: 4, kind: input, shape index: {}]   ;;  %s2623_s5 = inlined_call_operand.vmem [shape: f32[1,8], index: 5, kind: input, shape index: {}]   ;;  %s2624_s6 = inlined_call_operand.vmem [shape: f32[3,8], index: 6, kind: input, shape index: {}]   ;;  %s2625_s7 = inlined_call_operand.vmem [shape: f32[1,8], index: 7, kind: input, shape index: {}]   ;;  %s2626_s8 = inlined_call_operand.vmem [shape: f32[3,8,8], index: 8, kind: output, shape index: {0}]   ;;  %s2627_s9 = inlined_call_operand.vmem [shape: f32[8,2,16], index: 9, kind: output, shape index: {1}]  }
   0x1   :  { %2645 = sst [smem:[#allocation25_spill]] %s2621_s3 }
   0x2   :  { %2646 = sst [smem:[#allocation26_spill]] %s2626_s8 }
   0x3   :  { %2647 = sst [smem:[#allocation27_spill]] %s2627_s9 }
   0x4   :  { %15 = vsyncpa [#allocation3], 0 }
   0x5   :  { %16 = vsyncpa [#allocation5], 0  ;;  %s42_s11 = sshll.u32 %s2623_s5, 4  ;;  %s43_s11 = int_to_ptr.vmem [resolvable:$true] %s42_s11 }
   0x6   :  { %17 = vsyncpa [#allocation8], 0  ;;  %s32_s14 = sshll.u32 %s2622_s4, 4  ;;  %s1616_s15 = scalar_lea.vmem %s43_s11, 16  ;;  %s33_s14 = int_to_ptr.vmem [resolvable:$true] %s32_s14 }
   0x7   :  { %p1617_p0 = scmp.ne.s32.totalorder %s43_s11, %s1616_s15  ;;  %p1621_p1 = scmp.lt.s32.totalorder %s43_s11, %s43_s11 }
   0x8   :  { %p1622_p2 = scmp.lt.s32.totalorder %s1616_s15, %s1616_s15 }
   0xa   :  { %p1623_p3 = por %p1622_p2, %p1621_p1 }
   0xc   :  { %p1624_p4 = pnand %p1623_p3, %p1617_p0 }
   0xe   :  { %1627 = shalt.err (!%p1624_p4)
}
   0xf   :  { %s1670_s16 = smov [#allocation4]   ;;  %s1628_s17 = scalar_lea.vmem %s33_s14, 64 }
  0x10   :  { %45 = dma.vmem_to_smem %s43_s11, 16, %s1670_s16, [#allocation5]  }
  0x11   :  { %p1629_p5 = scmp.ne.s32.totalorder %s33_s14, %s1628_s17  ;;  %p1633_p6 = scmp.lt.s32.totalorder %s33_s14, %s33_s14 }
  0x12   :  { %p1634_p7 = scmp.lt.s32.totalorder %s1628_s17, %s1628_s17 }
  0x14   :  { %p1635_p8 = por %p1634_p7, %p1633_p6 }
  0x16   :  { %p1636_p9 = pnand %p1635_p8, %p1629_p5 }
  0x18   :  { %1639 = shalt.err (!%p1636_p9)
}
  0x19   :  { %s1671_s5 = smov [#allocation2]   ;;  %s52_s19 = sshll.u32 %s2624_s6, 4  ;;  %s53_s19 = int_to_ptr.vmem [resolvable:$true] %s52_s19 }
  0x1a   :  { %35 = dma.vmem_to_smem %s33_s14, 64, %s1671_s5, [#allocation3]  }
  0x1b   :  { %s62_s22 = sshll.u32 %s2625_s7, 4  ;;  %s1640_s23 = scalar_lea.vmem %s53_s19, 64  ;;  %s63_s22 = int_to_ptr.vmem [resolvable:$true] %s62_s22 }
  0x1c   :  { %p1641_p10 = scmp.ne.s32.totalorder %s53_s19, %s1640_s23  ;;  %p1645_p11 = scmp.lt.s32.totalorder %s53_s19, %s53_s19 }
  0x1d   :  { %p1646_p12 = scmp.lt.s32.totalorder %s1640_s23, %s1640_s23 }
  0x1f   :  { %p1647_p13 = por %p1646_p12, %p1645_p11 }
  0x21   :  { %p1648_p0 = pnand %p1647_p13, %p1641_p10 }
  0x23   :  { %1651 = shalt.err (!%p1648_p0)
}
  0x24   :  { %s1672_s24 = smov [#allocation6]   ;;  %s1652_s25 = scalar_lea.vmem %s63_s22, 16 }
  0x25   :  { %55 = dma.vmem_to_smem %s53_s19, 64, %s1672_s24, [#allocation5]  }
  0x26   :  { %p1653_p1 = scmp.ne.s32.totalorder %s63_s22, %s1652_s25  ;;  %p1657_p2 = scmp.lt.s32.totalorder %s63_s22, %s63_s22 }
  0x27   :  { %p1658_p3 = scmp.lt.s32.totalorder %s1652_s25, %s1652_s25 }
  0x29   :  { %p1659_p4 = por %p1658_p3, %p1657_p2 }
  0x2b   :  { %p1660_p5 = pnand %p1659_p4, %p1653_p1 }
  0x2d   :  { %1663 = shalt.err (!%p1660_p5)
}
  0x2e   :  { %s1673_s6 = smov [#allocation7]  }
  0x2f   :  { %65 = dma.vmem_to_smem %s63_s22, 16, %s1673_s6, [#allocation8]  }
  0x30   :  { %1664 = dma.done.wait [#allocation3], 64  }
  0x31   :  { %1665 = vsyncadd [#allocation3], 4294967232 }
  0x32   :  { %1666 = dma.done.wait [#allocation5], 80  }
  0x33   :  { %1667 = vsyncadd [#allocation5], 4294967216 }
  0x34   :  { %1668 = dma.done.wait [#allocation8], 16  }
  0x35   :  { %1669 = vsyncadd [#allocation8], 4294967280 }
  0x36   :  { %78 = sfence }
  0x37   :  { %v1747_v0 = vld [vmem:[%s2618_s0] sm:$0xff]  ;;  %v1752_v1 = vld [vmem:[%s2618_s0 + $0x8] sm:$0xff]  ;;  %s112_s10 = sld [smem:[#allocation2]]  ;;  %s1428_s5 = sld [smem:[#allocation2 + $0x81]]  ;;  %vm1380_vm0 = vcmask 7168   ;;  %vm1382_vm1 = vcmask 15360  }
  0x38   :  { %v1757_v2 = vld [vmem:[%s2619_s1] sm:$0xff]  ;;  %v99_v3 = vadd.f32 %v1752_v1, %v1747_v0  ;;  %v1764_v4 = vld [vmem:[%s2619_s1 + $0x8] sm:$0xff]  ;;  %s1423_s16 = sld [smem:[#allocation2 + $0x80]]  ;;  %s1429_s19 = sld [smem:[#allocation2 + $0x101]]  ;;  %vm1384_vm2 = vcmask 23552   ;;  %vm253_vm3 = vcmask 31744  }
  0x39   :  { %2648 = vst [vmem:[#allocation12_spill] sm:$0xff] %v1764_v4  ;;  %v1769_v5 = vld [vmem:[%s2620_s2] sm:$0xff]  ;;  %v1774_v6 = vld [vmem:[%s2620_s2 + $0x8] sm:$0xff]  ;;  %s1424_s17 = sld [smem:[#allocation2 + $0x100]]  ;;  %v103_v8 = vadd.f32 %v1764_v4, %v1757_v2  ;;  %s1427_s2 = sld [smem:[#allocation2 + $0x1]]  ;;  %vm1387_vm4 = vcmask 39936  }
  0x3a   :  { %2649 = vst [vmem:[#allocation13_spill] sm:$0xff] %v1769_v5  ;;  %2650 = vst [vmem:[#allocation14_spill] sm:$0xff] %v1774_v6  ;;  %v107_v7 = vadd.f32 %v1774_v6, %v1769_v5  ;;  %100 = vadd.xlane.f32.xlu0 %v99_v3  ;;  %s128_s1 = sld [smem:[#allocation4]]  ;;  %v1795_v28 = vld [vmem:[%s2621_s3] sm:$0xff]  ;;  %s1436_s20 = sld [smem:[#allocation2 + $0x2]]  ;;  %vm1389_vm5 = vcmask 48128  }
  0x3b   :  { %2651 = vst [vmem:[#allocation15_spill] sm:$0xff] %v1795_v28  ;;  %s1437_s21 = sld [smem:[#allocation2 + $0x82]]  ;;  %s2628_s22 = smov 4   ;;  %vm1391_vm6 = vcmask 56320   ;;  %vm255_vm7 = vcmask 64512   ;;  %vm257_vm8 = vcmask 97280  }
  0x3c   :  { %108 = vadd.xlane.f32.xlu1 %v107_v7  ;;  %s1799_s23 = sld [smem:[#allocation2 + $0x102]]  ;;  %s1803_s24 = sld [smem:[#allocation2 + $0x5]]  ;;  %vm259_vm9 = vcmask 125952   ;;  %vm277_vm10 = vcmask 1040384   ;;  %vm279_vm11 = vcmask 123904  }
  0x3d   :  { %v113_v9 = vstv %s112_s10  ;;  %v286_v30 = vstv %s1428_s5  ;;  %s1805_s25 = sld [smem:[#allocation2 + $0x85]]  ;;  %s1809_s6 = sld [smem:[#allocation4 + $0x1]] }
  0x3e   :  { %104 = vadd.xlane.f32.xlu0 %v103_v8  ;;  %v114_v10 = vmul.f32 %v113_v9, %v1747_v0  ;;  %v115_v11 = vmul.f32 %v113_v9, %v1752_v1  ;;  %v117_v12 = vstv %s1423_s16  ;;  %v287_v32 = vmul.f32 %v286_v30, %v1757_v2  ;;  %s1811_s7 = sld [smem:[#allocation2 + $0x3]]  ;;  %s1675_s27 = smov 8  }
  0x3f   :  { %v118_v13 = vmul.f32 %v117_v12, %v1757_v2  ;;  %v119_v14 = vmul.f32 %v117_v12, %v1764_v4  ;;  %v123_v15 = vstv %s1424_s17  ;;  %v282_v29 = vstv %s1427_s2  ;;  %s1813_s26 = sld [smem:[#allocation2 + $0x83]]  ;;  %s1817_s28 = sld [smem:[#allocation4 + $0x2]] }
  0x40   :  { %v124_v16 = vmul.f32 %v123_v15, %v1769_v5  ;;  %v125_v17 = vmul.f32 %v123_v15, %v1774_v6  ;;  %v129_v20 = vstv %s128_s1  ;;  %v283_v31 = vmul.f32 %v282_v29, %v1747_v0  ;;  %s1819_s29 = sld [smem:[#allocation2 + $0x105]]  ;;  %s1827_s30 = sld [smem:[#allocation2 + $0x103]] }
  0x41   :  { %v120_v18 = vadd.f32 %v118_v13, %v114_v10  ;;  %v121_v19 = vadd.f32 %v119_v14, %v115_v11  ;;  %v284_v33 = vmul.f32 %v282_v29, %v1752_v1  ;;  %v288_v34 = vmul.f32 %v286_v30, %v1764_v4  ;;  %s1829_s10 = sld [smem:[#allocation2 + $0x4]]  ;;  %s1846_s12 = sld [smem:[#allocation4 + $0x5]] }
  0x42   :  { %v292_v35 = vstv %s1429_s19  ;;  %v439_v36 = vstv %s1436_s20  ;;  %v443_v37 = vstv %s1437_s21  ;;  %v289_v38 = vadd.f32 %v287_v32, %v283_v31  ;;  %s1835_s11 = sld [smem:[#allocation2 + $0x84]]  ;;  %s1863_s14 = sld [smem:[#allocation4 + $0x3]] }
  0x43   :  { %v126_v21 = vadd.f32 %v124_v16, %v120_v18  ;;  %v127_v22 = vadd.f32 %v125_v17, %v121_v19  ;;  %v293_v39 = vmul.f32 %v292_v35, %v1769_v5  ;;  %v290_v40 = vadd.f32 %v288_v34, %v284_v33  ;;  %s1850_s13 = sld [smem:[#allocation2 + $0x104]]  ;;  %s1472_s15 = sld [smem:[#allocation2 + $0x6]] }
  0x44   :  { %v294_v41 = vmul.f32 %v292_v35, %v1774_v6  ;;  %v440_v42 = vmul.f32 %v439_v36, %v1747_v0  ;;  %v444_v43 = vmul.f32 %v443_v37, %v1757_v2  ;;  %v441_v44 = vmul.f32 %v439_v36, %v1752_v1  ;;  %s1457_s0 = sld [smem:[#allocation4 + $0x4]]  ;;  %s1473_s16 = sld [smem:[#allocation2 + $0x86]] }
  0x45   :  { %v130_v23 = vadd.f32 %v129_v20, %v126_v21  ;;  %v131_v24 = vadd.f32 %v129_v20, %v127_v22  ;;  %v445_v45 = vmul.f32 %v443_v37, %v1764_v4  ;;  %v449_v46 = vstv %s1799_s23  ;;  %s1474_s17 = sld [smem:[#allocation2 + $0x106]]  ;;  %s1914_s2 = sld [smem:[#allocation6]] }
  0x46   :  { %v295_v47 = vadd.f32 %v293_v39, %v289_v38  ;;  %v910_v48 = vstv %s1803_s24  ;;  %v914_v49 = vstv %s1805_s25  ;;  %v296_v50 = vadd.f32 %v294_v41, %v290_v40  ;;  %s1475_s1 = sld [smem:[#allocation4 + $0x6]]  ;;  %s1916_s5 = sld [smem:[#allocation6 + $0x1]] }
  0x47   :  { %v1786_v25 = vmul.f32 100.0, %v130_v23  ;;  %v1788_v26 = vmul.f32 100.0, %v131_v24  ;;  %v298_v51 = vstv %s1809_s6  ;;  %v446_v52 = vadd.f32 %v444_v43, %v440_v42  ;;  %s1918_s4 = sld [smem:[#allocation6 + $0x2]]  ;;  %s1920_s18 = sld [smem:[#allocation6 + $0x3]] }
  0x48   :  { %v450_v53 = vmul.f32 %v449_v46, %v1769_v5  ;;  %v447_v54 = vadd.f32 %v445_v45, %v441_v44  ;;  %v451_v55 = vmul.f32 %v449_v46, %v1774_v6  ;;  %v596_v56 = vstv %s1811_s7  ;;  %s1922_s19 = sld [smem:[#allocation6 + $0x4]]  ;;  %s1924_s20 = sld [smem:[#allocation6 + $0x5]] }
  0x49   :  { %v134_v27 = vmax.f32 %v1786_v25, %v1788_v26  ;;  %v600_v57 = vstv %s1813_s26  ;;  %v911_v58 = vmul.f32 %v910_v48, %v1747_v0  ;;  %v912_v59 = vmul.f32 %v910_v48, %v1752_v1  ;;  %s1926_s21 = sld [smem:[#allocation6 + $0x6]]  ;;  %s1928_s23 = sld [smem:[#allocation6 + $0x7]] }
  0x4a   :  { %v915_v60 = vmul.f32 %v914_v49, %v1757_v2  ;;  %v916_v61 = vmul.f32 %v914_v49, %v1764_v4  ;;  %v299_v62 = vadd.f32 %v298_v51, %v295_v47  ;;  %v455_v63 = vstv %s1817_s28  ;;  %s1930_s24 = sld [smem:[#allocation6 + $0x80]]  ;;  %s1932_s25 = sld [smem:[#allocation6 + $0x81]] }
  0x4b   :  { %135 = vmax.xlane.f32.xlu1 %v134_v27  ;;  %v920_v3 = vstv %s1819_s29  ;;  %v300_v7 = vadd.f32 %v298_v51, %v296_v50  ;;  %v452_v8 = vadd.f32 %v450_v53, %v446_v52  ;;  %v597_v9 = vmul.f32 %v596_v56, %v1747_v0  ;;  %s1934_s6 = sld [smem:[#allocation6 + $0x82]]  ;;  %s1936_s7 = sld [smem:[#allocation6 + $0x83]] }
  0x4c   :  { %v598_v10 = vmul.f32 %v596_v56, %v1752_v1  ;;  %v453_v11 = vadd.f32 %v451_v55, %v447_v54  ;;  %v601_v12 = vmul.f32 %v600_v57, %v1757_v2  ;;  %v602_v13 = vmul.f32 %v600_v57, %v1764_v4  ;;  %s1938_s26 = sld [smem:[#allocation6 + $0x84]]  ;;  %s1942_s28 = sld [smem:[#allocation6 + $0x86]] }
  0x4d   :  { %v606_v14 = vstv %s1827_s30  ;;  %v917_v15 = vadd.f32 %v915_v60, %v911_v58  ;;  %v918_v16 = vadd.f32 %v916_v61, %v912_v59  ;;  %v921_v17 = vmul.f32 %v920_v3, %v1769_v5  ;;  %s1944_s29 = sld [smem:[#allocation6 + $0x87]]  ;;  %s1946_s30 = sld [smem:[#allocation6 + $0x100]] }
  0x4e   :  { %v922_v18 = vmul.f32 %v920_v3, %v1774_v6  ;;  %v753_v19 = vstv %s1829_s10  ;;  %v1858_v20 = vmul.f32 100.0, %v299_v62  ;;  %v1860_v21 = vmul.f32 100.0, %v300_v7  ;;  %s1948_s10 = sld [smem:[#allocation6 + $0x101]]  ;;  %s1970_s9 = sld [smem:[#allocation7 + $0x4]] }
  0x4f   :  { %v607_v22 = vmul.f32 %v606_v14, %v1769_v5  ;;  %v757_v23 = vstv %s1835_s11  ;;  %v456_v24 = vadd.f32 %v455_v63, %v452_v8  ;;  %v457_v27 = vadd.f32 %v455_v63, %v453_v11  ;;  %s1950_s11 = sld [smem:[#allocation6 + $0x102]]  ;;  %s1972_s3 = sld [smem:[#allocation7 + $0x5]] }
  0x50   :  { %v603_v29 = vadd.f32 %v601_v12, %v597_v9  ;;  %v608_v30 = vmul.f32 %v606_v14, %v1774_v6  ;;  %v604_v31 = vadd.f32 %v602_v13, %v598_v10  ;;  %v754_v32 = vmul.f32 %v753_v19, %v1747_v0  ;;  %s1978_s8 = sld [smem:[#allocation7 + $0x6]] }
  0x51   :  { %v923_v33 = vadd.f32 %v921_v17, %v917_v15  ;;  %v924_v34 = vadd.f32 %v922_v18, %v918_v16  ;;  %v755_v35 = vmul.f32 %v753_v19, %v1752_v1  ;;  %v758_v36 = vmul.f32 %v757_v23, %v1757_v2 }
  0x52   :  { %v759_v37 = vmul.f32 %v757_v23, %v1764_v4  ;;  %v926_v38 = vstv %s1846_s12  ;;  %v763_v39 = vstv %s1850_s13  ;;  %v303_v40 = vmax.f32 %v1858_v20, %v1860_v21  ;;  %s1952_s12 = sld [smem:[#allocation6 + $0x103]]  ;;  %s1954_s13 = sld [smem:[#allocation6 + $0x104]] }
  0x53   :  { %v1875_v41 = vmul.f32 100.0, %v456_v24  ;;  %v1877_v42 = vmul.f32 100.0, %v457_v27  ;;  %v609_v43 = vadd.f32 %v607_v22, %v603_v29  ;;  %v610_v44 = vadd.f32 %v608_v30, %v604_v31 }
  0x54   :  { %190 = vrot.lane.b32.xlu0 %v1795_v28, %s2628_s22  ;;  %v927_v45 = vadd.f32 %v926_v38, %v923_v33  ;;  %v928_v46 = vadd.f32 %v926_v38, %v924_v34  ;;  %v760_v47 = vadd.f32 %v758_v36, %v754_v32  ;;  %v761_v48 = vadd.f32 %v759_v37, %v755_v35  ;;  %s1968_s22 = sld [smem:[#allocation7 + $0x2]] }
  0x55   :  { %v764_v49 = vmul.f32 %v763_v39, %v1769_v5  ;;  %v765_v50 = vmul.f32 %v763_v39, %v1774_v6  ;;  %v612_v51 = vstv %s1863_s14  ;;  %v460_v52 = vmax.f32 %v1875_v41, %v1877_v42  ;;  %s1956_s14 = sld [smem:[#allocation6 + $0x105]] }
  0x56   :  { %v1884_v53 = vmul.f32 100.0, %v927_v45  ;;  %v1886_v54 = vmul.f32 100.0, %v928_v46  ;;  %v613_v55 = vadd.f32 %v612_v51, %v609_v43  ;;  %v614_v56 = vadd.f32 %v612_v51, %v610_v44 }
  0x57   :  { %v766_v57 = vadd.f32 %v764_v49, %v760_v47  ;;  %v767_v58 = vadd.f32 %v765_v50, %v761_v48  ;;  %v769_v59 = vstv %s1457_s0  ;;  %v1067_v11 = vstv %s1472_s15  ;;  %s1958_s0 = sld [smem:[#allocation6 + $0x106]]  ;;  %s1960_s15 = sld [smem:[#allocation6 + $0x107]] }
  0x58   :  { %2652 = vst [vmem:[#allocation16_spill] sm:$0xff] %v1884_v53  ;;  %2653 = vst [vmem:[#allocation17_spill] sm:$0xff] %v1886_v54  ;;  %v931_v60 = vmax.f32 %v1884_v53, %v1886_v54  ;;  %v1890_v61 = vmul.f32 100.0, %v613_v55  ;;  %v1892_v62 = vmul.f32 100.0, %v614_v56  ;;  %v1071_v12 = vstv %s1473_s16  ;;  %s1962_s16 = sld [smem:[#allocation7]] }
  0x59   :  { %v770_v63 = vadd.f32 %v769_v59, %v766_v57  ;;  %v771_v3 = vadd.f32 %v769_v59, %v767_v58  ;;  %v1068_v13 = vmul.f32 %v1067_v11, %v1747_v0  ;;  %v1069_v14 = vmul.f32 %v1067_v11, %v1752_v1 }
  0x5a   :  { %2654 = vst [vmem:[#allocation18_spill] sm:$0xff] %v1890_v61  ;;  %2655 = vst [vmem:[#allocation19_spill] sm:$0xff] %v1892_v62  ;;  %v617_v7 = vmax.f32 %v1890_v61, %v1892_v62  ;;  %v1072_v15 = vmul.f32 %v1071_v12, %v1757_v2  ;;  %v1073_v16 = vmul.f32 %v1071_v12, %v1764_v4  ;;  %v1077_v17 = vstv %s1474_s17  ;;  %s1964_s17 = sld [smem:[#allocation7 + $0x3]] }
  0x5b   :  { %v1896_v8 = vmul.f32 100.0, %v770_v63  ;;  %v1898_v9 = vmul.f32 100.0, %v771_v3  ;;  %v1078_v22 = vmul.f32 %v1077_v17, %v1769_v5  ;;  %v1079_v23 = vmul.f32 %v1077_v17, %v1774_v6 }
  0x5c   :  { %184 = vrot.lane.b32.xlu1 %v1795_v28, %s1675_s27  ;;  %v1074_v18 = vadd.f32 %v1072_v15, %v1068_v13  ;;  %v1075_v19 = vadd.f32 %v1073_v16, %v1069_v14  ;;  %v1083_v29 = vstv %s1475_s1  ;;  %s1940_s27 = sld [smem:[#allocation6 + $0x85]]  ;;  %s1966_s1 = sld [smem:[#allocation7 + $0x1]]  ;;  %v163_v35 = vstv %s1914_s2 }
  0x5d   :  { %2656 = vst [vmem:[#allocation20_spill] sm:$0xff] %v1896_v8  ;;  %2657 = vst [vmem:[#allocation21_spill] sm:$0xff] %v1898_v9  ;;  %v774_v10 = vmax.f32 %v1896_v8, %v1898_v9  ;;  %v332_v36 = vstv %s1916_s5  ;;  %v489_v37 = vstv %s1918_s4  ;;  %v646_v38 = vstv %s1920_s18  ;;  %s1482_s5 = sld [smem:[#allocation2 + $0x87]] }
  0x5e   :  { %v1080_v24 = vadd.f32 %v1078_v22, %v1074_v18  ;;  %v1081_v27 = vadd.f32 %v1079_v23, %v1075_v19  ;;  %v803_v39 = vstv %s1922_s19  ;;  %v1117_v43 = vstv %s1926_s21  ;;  %s2080_s4 = sld [smem:[#allocation2 + $0x107]]  ;;  %s2673_s21 = sld [smem:[#allocation25_spill]] }
  0x5f   :  { %v1274_v44 = vstv %s1928_s23  ;;  %v166_v45 = vstv %s1930_s24  ;;  %v335_v46 = vstv %s1932_s25  ;;  %v492_v47 = vstv %s1934_s6  ;;  %s2093_s18 = sld [smem:[#allocation4 + $0x7]]  ;;  %s1680_s23 = smov 120  }
  0x60   :  { %v1084_v30 = vadd.f32 %v1083_v29, %v1080_v24  ;;  %v1085_v31 = vadd.f32 %v1083_v29, %v1081_v27  ;;  %v85_v48 = vlaneseq  ;;  %v649_v49 = vstv %s1936_s7  ;;  %s2676_s24 = smov 4  }
  0x61   :  { %v806_v50 = vstv %s1938_s26  ;;  %v1277_v55 = vstv %s1944_s29  ;;  %v170_v56 = vstv %s1946_s30  ;;  %v339_v57 = vstv %s1948_s10  ;;  %s2677_s30 = sld [smem:[#allocation27_spill]] }
  0x62   :  { %v1908_v32 = vmul.f32 100.0, %v1084_v30  ;;  %v1910_v33 = vmul.f32 100.0, %v1085_v31  ;;  %2660 = sst [smem:[#allocation24_spill]] %s1966_s1  ;;  %s1980_s1 = sld [smem:[#allocation7 + $0x7]]  ;;  %v963_v51 = vstv %s1940_s27  ;;  %v496_v58 = vstv %s1950_s11 }
  0x63   :  { %s2661_s2 = sld [smem:[#allocation24_spill]]  ;;  %v653_v59 = vstv %s1952_s12  ;;  %v967_v63 = vstv %s1956_s14  ;;  %v1124_v3 = vstv %s1958_s0  ;;  %v2002_v11 = vand.u32 127, %v85_v48  ;;  %s1681_s27 = smov 124  }
  0x64   :  { %2658 = vst [vmem:[#allocation22_spill] sm:$0xff] %v1908_v32  ;;  %2659 = vst [vmem:[#allocation23_spill] sm:$0xff] %v1910_v33  ;;  %v1088_v34 = vmax.f32 %v1908_v32, %v1910_v33  ;;  %v174_v12 = vstv %s1962_s16  ;;  %v657_v13 = vstv %s1964_s17  ;;  %v500_v17 = vstv %s1968_s22  ;;  %s1481_s22 = sld [smem:[#allocation2 + $0x7]] }
  0x65   :  { %v814_v18 = vstv %s1970_s9  ;;  %v971_v22 = vstv %s1972_s3  ;;  %v1128_v23 = vstv %s1978_s8  ;;  %s2662_s9 = sld [smem:[#allocation26_spill]] }
  0x68   :  { %v1285_v24 = vstv %s1980_s1 }
  0x69   :  { %v343_v16 = vstv %s2661_s2 }
  0x73   :  { %304 = vmax.xlane.f32.xlu0 %v303_v40  ;;  %v960_v40 = vstv %s1924_s20 }
  0x77   :  { %461 = vmax.xlane.f32.xlu0 %v460_v52  ;;  %v1120_v52 = vstv %s1942_s28 }
  0x7b   :  { %932 = vmax.xlane.f32.xlu0 %v931_v60  ;;  %v810_v60 = vstv %s1954_s13 }
  0x80   :  { %618 = vmax.xlane.f32.xlu1 %v617_v7 }
  0x84   :  { %775 = vmax.xlane.f32.xlu1 %v774_v10  ;;  %v1281_v10 = vstv %s1960_s15 }
  0x88   :  { %1089 = vmax.xlane.f32.xlu1 %v1088_v34 }
  0xc7   :  { %v101_v7 = vpop.xlane.xlu0 %100 }
  0xc8   :  { %v102_v14 = vmul.f32 0.00390625, %v101_v7 }
  0xc9   :  { %v109_v15 = vpop.xlane.xlu1 %108 }
  0xca   :  { %v110_v19 = vmul.f32 0.00390625, %v109_v15  ;;  %v164_v27 = vmul.f32 %v163_v35, %v102_v14  ;;  %v333_v29 = vmul.f32 %v332_v36, %v102_v14  ;;  %v490_v30 = vmul.f32 %v489_v37, %v102_v14 }
  0xcb   :  { %v647_v31 = vmul.f32 %v646_v38, %v102_v14  ;;  %v804_v34 = vmul.f32 %v803_v39, %v102_v14  ;;  %v961_v33 = vmul.f32 %v960_v40, %v102_v14  ;;  %v1118_v32 = vmul.f32 %v1117_v43, %v102_v14  ;;  %v105_v28 = vpop.xlane.xlu0 %104 }
  0xcc   :  { %v1275_v48 = vmul.f32 %v1274_v44, %v102_v14  ;;  %v106_v54 = vmul.f32 0.00390625, %v105_v28  ;;  %v171_v53 = vmul.f32 %v170_v56, %v110_v19  ;;  %v340_v7 = vmul.f32 %v339_v57, %v110_v19 }
  0xcd   :  { %v497_v6 = vmul.f32 %v496_v58, %v110_v19  ;;  %v654_v9 = vmul.f32 %v653_v59, %v110_v19  ;;  %v811_v8 = vmul.f32 %v810_v60, %v110_v19  ;;  %v968_v5 = vmul.f32 %v967_v63, %v110_v19 }
  0xce   :  { %v1125_v15 = vmul.f32 %v1124_v3, %v110_v19  ;;  %v167_v62 = vmul.f32 %v166_v45, %v106_v54  ;;  %v336_v61 = vmul.f32 %v335_v46, %v106_v54  ;;  %v493_v4 = vmul.f32 %v492_v47, %v106_v54 }
  0xcf   :  { %v650_v35 = vmul.f32 %v649_v49, %v106_v54  ;;  %v807_v36 = vmul.f32 %v806_v50, %v106_v54  ;;  %v964_v37 = vmul.f32 %v963_v51, %v106_v54  ;;  %v1121_v38 = vmul.f32 %v1120_v52, %v106_v54 }
  0xd0   :  { %v1278_v39 = vmul.f32 %v1277_v55, %v106_v54  ;;  %v168_v40 = vadd.f32 %v167_v62, %v164_v27  ;;  %v337_v43 = vadd.f32 %v336_v61, %v333_v29  ;;  %v494_v44 = vadd.f32 %v493_v4, %v490_v30 }
  0xd1   :  { %v651_v14 = vadd.f32 %v650_v35, %v647_v31  ;;  %v808_v28 = vadd.f32 %v807_v36, %v804_v34  ;;  %v965_v56 = vadd.f32 %v964_v37, %v961_v33  ;;  %v1122_v57 = vadd.f32 %v1121_v38, %v1118_v32 }
  0xd2   :  { %v1279_v58 = vadd.f32 %v1278_v39, %v1275_v48  ;;  %v172_v59 = vadd.f32 %v171_v53, %v168_v40  ;;  %v341_v60 = vadd.f32 %v340_v7, %v337_v43  ;;  %v498_v63 = vadd.f32 %v497_v6, %v494_v44 }
  0xd3   :  { %v655_v3 = vadd.f32 %v654_v9, %v651_v14  ;;  %v812_v45 = vadd.f32 %v811_v8, %v808_v28  ;;  %v969_v46 = vadd.f32 %v968_v5, %v965_v56  ;;  %v1126_v47 = vadd.f32 %v1125_v15, %v1122_v57 }
  0xd4   :  { %v1282_v49 = vmul.f32 %v1281_v10, %v110_v19  ;;  %v175_v50 = vadd.f32 %v174_v12, %v172_v59  ;;  %v344_v52 = vadd.f32 %v343_v16, %v341_v60  ;;  %v501_v54 = vadd.f32 %v500_v17, %v498_v63 }
  0xd5   :  { %v658_v51 = vadd.f32 %v657_v13, %v655_v3  ;;  %v815_v61 = vadd.f32 %v814_v18, %v812_v45  ;;  %v972_v4 = vadd.f32 %v971_v22, %v969_v46  ;;  %v1129_v55 = vadd.f32 %v1128_v23, %v1126_v47 }
  0xd6   :  { %v1283_v62 = vadd.f32 %v1282_v49, %v1279_v58  ;;  %v176_v27 = vsub.f32 0.0, %v175_v50  ;;  %v345_v32 = vsub.f32 0.0, %v344_v52  ;;  %v502_v29 = vsub.f32 0.0, %v501_v54 }
  0xd7   :  { %v659_v33 = vsub.f32 0.0, %v658_v51  ;;  %v816_v53 = vsub.f32 0.0, %v815_v61  ;;  %v973_v13 = vsub.f32 0.0, %v972_v4  ;;  %v2015_v16 = vadd.s32 128, %v2002_v11 }
  0xd8   :  { %v1286_v30 = vadd.f32 %v1285_v24, %v1283_v62  ;;  %v136_v6 = vpop.xlane.xlu1 %135  ;;  %v177_v9 = vmul.f32 1.442695, %v176_v27  ;;  %v346_v5 = vmul.f32 1.442695, %v345_v32  ;;  %v503_v17 = vmul.f32 1.442695, %v502_v29 }
  0xd9   :  { %v660_v8 = vmul.f32 1.442695, %v659_v33  ;;  %v137_v10 = vsub.f32 %v1786_v25, %v136_v6  ;;  %v138_v12 = vsub.f32 %v1788_v26, %v136_v6  ;;  %v1130_v18 = vsub.f32 0.0, %v1129_v55 }
  0xda   :  { %1535 = vpow2.f32 %v177_v9  ;;  %v1287_v23 = vsub.f32 0.0, %v1286_v30  ;;  %v817_v24 = vmul.f32 1.442695, %v816_v53  ;;  %v974_v31 = vmul.f32 1.442695, %v973_v13 }
  0xdb   :  { %v139_v19 = vmul.f32 1.442695, %v137_v10  ;;  %v141_v22 = vmul.f32 1.442695, %v138_v12  ;;  %1537 = vpow2.f32 %v660_v8  ;;  %v88_v25 = vcvt.s32.f32 %v2002_v11 }
  0xdc   :  { %1539 = vpow2.f32 %v346_v5  ;;  %v1131_v34 = vmul.f32 1.442695, %v1130_v18  ;;  %v89_v26 = vcvt.s32.f32 %v2015_v16  ;;  %v1288_v48 = vmul.f32 1.442695, %v1287_v23  ;;  %v2068_v5 = vpop.permute.xlu0 %190 }
  0xdd   :  { %1541 = vpow2.f32 %v139_v19  ;;  %v91_v7 = vmul.f32 0.0625, %v88_v25 }
  0xde   :  { %1543 = vpow2.f32 %v141_v22  ;;  %v92_v15 = vmul.f32 0.0625, %v89_v26 }
  0xdf   :  { %1545 = vpow2.f32 %v503_v17  ;;  %v2023_v39 = vfloor.f32 %v91_v7 }
  0xe0   :  { %1547 = vpow2.f32 %v817_v24  ;;  %v2027_v43 = vfloor.f32 %v92_v15 }
  0xe1   :  { %1549 = vpow2.f32 %v974_v31  ;;  %v95_v7 = vmul.f32 16.0, %v2023_v39 }
  0xe2   :  { %1551 = vpow2.f32 %v1131_v34  ;;  %v96_v15 = vmul.f32 16.0, %v2027_v43 }
  0xe3   :  { %1553 = vpow2.f32 %v1288_v48  ;;  %v2082_v48 = vpop.permute.xlu1 %184 }
  0xe4   :  { %v1536_v35 = vpop.eup %1535 }
  0xe5   :  { %v1538_v36 = vpop.eup %1537  ;;  %v179_v37 = vadd.f32 1.0, %v1536_v35 }
  0xe6   :  { %v1540_v38 = vpop.eup %1539  ;;  %v662_v59 = vadd.f32 1.0, %v1538_v36 }
  0xe7   :  { %v2025_v40 = vpop.eup %1541  ;;  %1555 = vrcp.f32 %v179_v37  ;;  %v348_v44 = vadd.f32 1.0, %v1540_v38  ;;  %v2663_v37 = vld [vmem:[#allocation12_spill] sm:$0xff] }
  0xe8   :  { %v2029_v14 = vpop.eup %1543  ;;  %v151_v28 = vmul.f32 %v2025_v40, %v2023_v39 }
  0xe9   :  { %v1546_v56 = vpop.eup %1545  ;;  %v143_v57 = vadd.f32 %v2029_v14, %v2025_v40  ;;  %v152_v58 = vmul.f32 %v2029_v14, %v2027_v43  ;;  %1557 = vrcp.f32 %v348_v44  ;;  %v2664_v44 = vld [vmem:[#allocation18_spill] sm:$0xff] }
  0xea   :  { %v1548_v60 = vpop.eup %1547  ;;  %v505_v63 = vadd.f32 1.0, %v1546_v56  ;;  %v2665_v56 = vld [vmem:[#allocation19_spill] sm:$0xff] }
  0xeb   :  { %v1550_v3 = vpop.eup %1549  ;;  %144 = vadd.xlane.f32.xlu0 %v143_v57  ;;  %v2037_v45 = vadd.f32 %v152_v58, %v151_v28  ;;  %v819_v46 = vadd.f32 1.0, %v1548_v60  ;;  %v1234_v58 = vstv %s2080_s4 }
  0xec   :  { %v1552_v47 = vpop.eup %1551  ;;  %1559 = vrcp.f32 %v505_v63  ;;  %v976_v49 = vadd.f32 1.0, %v1550_v3 }
  0xed   :  { %v1554_v50 = vpop.eup %1553  ;;  %1561 = vrcp.f32 %v662_v59  ;;  %v1133_v51 = vadd.f32 1.0, %v1552_v47 }
  0xee   :  { %1563 = vrcp.f32 %v819_v46  ;;  %v1290_v52 = vadd.f32 1.0, %v1554_v50  ;;  %v2666_v50 = vld [vmem:[#allocation13_spill] sm:$0xff] }
  0xef   :  { %1565 = vrcp.f32 %v976_v49 }
  0xf0   :  { %1567 = vrcp.f32 %v1133_v51  ;;  %v1235_v51 = vmul.f32 %v1234_v58, %v2666_v50 }
  0xf1   :  { %v2039_v54 = vpop.eup %1555  ;;  %1569 = vrcp.f32 %v1290_v52  ;;  %v2667_v52 = vld [vmem:[#allocation20_spill] sm:$0xff] }
  0xf3   :  { %v2041_v62 = vpop.eup %1557 }
  0xf4   :  { %v1403_v61 = vsel %vm1380_vm0, %v2039_v54, %v2041_v62 }
  0xf6   :  { %v2046_v4 = vpop.eup %1559 }
  0xf7   :  { %v2048_v55 = vpop.eup %1561  ;;  %v1404_v27 = vsel %vm1382_vm1, %v1403_v61, %v2046_v4 }
  0xf8   :  { %v2052_v33 = vpop.eup %1563  ;;  %v1405_v32 = vsel %vm1384_vm2, %v1404_v27, %v2048_v55  ;;  %v2668_v27 = vld [vmem:[#allocation21_spill] sm:$0xff] }
  0xf9   :  { %v2056_v29 = vpop.eup %1565  ;;  %v1406_v53 = vsel %vm253_vm3, %v1405_v32, %v2052_v33 }
  0xfa   :  { %v2060_v30 = vpop.eup %1567  ;;  %v1407_v6 = vsel %vm1387_vm4, %v1406_v53, %v2056_v29  ;;  %v2669_v53 = vld [vmem:[#allocation14_spill] sm:$0xff] }
  0xfb   :  { %v2064_v9 = vpop.eup %1569  ;;  %v1408_v8 = vsel %vm1389_vm5, %v1407_v6, %v2060_v30  ;;  %v1236_v11 = vmul.f32 %v1234_v58, %v2669_v53 }
  0xfc   :  { %v1409_v10 = vsel %vm1391_vm6, %v1408_v8, %v2064_v9 }
  0xfd   :  { %1491 = vst.msk [vmem:[%s2662_s9 + $0x10] sm:$0xff] %vm255_vm7, %v1409_v10 }
 0x100   :  { %v305_v12 = vpop.xlane.xlu0 %304 }
 0x101   :  { %v306_v13 = vsub.f32 %v1858_v20, %v305_v12  ;;  %v307_v17 = vsub.f32 %v1860_v21, %v305_v12  ;;  %v1224_v20 = vstv %s1481_s22  ;;  %v1228_v21 = vstv %s1482_s5 }
 0x102   :  { %v1229_v36 = vmul.f32 %v1228_v21, %v1757_v2  ;;  %v1230_v38 = vmul.f32 %v1228_v21, %v2663_v37 }
 0x103   :  { %v308_v18 = vmul.f32 1.442695, %v306_v13  ;;  %v310_v19 = vmul.f32 1.442695, %v307_v17 }
 0x104   :  { %v462_v22 = vpop.xlane.xlu0 %461 }
 0x105   :  { %1571 = vpow2.f32 %v308_v18  ;;  %v463_v23 = vsub.f32 %v1875_v41, %v462_v22  ;;  %v464_v24 = vsub.f32 %v1877_v42, %v462_v22  ;;  %v1225_v41 = vmul.f32 %v1224_v20, %v1747_v0  ;;  %v2670_v22 = vld [vmem:[#allocation16_spill] sm:$0xff] }
 0x106   :  { %1573 = vpow2.f32 %v310_v19  ;;  %v1226_v42 = vmul.f32 %v1224_v20, %v1752_v1  ;;  %v2097_v0 = vsub.f32 %v88_v25, %v95_v7  ;;  %v2101_v1 = vsub.f32 %v89_v26, %v96_v15 }
 0x107   :  { %v465_v31 = vmul.f32 1.442695, %v463_v23  ;;  %v467_v34 = vmul.f32 1.442695, %v464_v24  ;;  %v1231_v47 = vadd.f32 %v1229_v36, %v1225_v41  ;;  %v1240_v19 = vstv %s2093_s18  ;;  %v2671_v24 = vld [vmem:[#allocation17_spill] sm:$0xff] }
 0x108   :  { %v1232_v49 = vadd.f32 %v1230_v38, %v1226_v42  ;;  %v146_v10 = vmul.f32 %v2025_v40, %v2097_v0  ;;  %v147_v12 = vmul.f32 %v2029_v14, %v2101_v1  ;;  %v933_v18 = vpop.xlane.xlu0 %932 }
 0x109   :  { %1575 = vpow2.f32 %v465_v31  ;;  %v1237_v13 = vadd.f32 %v1235_v51, %v1231_v47  ;;  %v934_v23 = vsub.f32 %v2670_v22, %v933_v18  ;;  %v935_v31 = vsub.f32 %v2671_v24, %v933_v18 }
 0x10a   :  { %1577 = vpow2.f32 %v467_v34  ;;  %v1238_v17 = vadd.f32 %v1236_v11, %v1232_v49  ;;  %v148_v34 = vadd.f32 %v147_v12, %v146_v10  ;;  %v1676_v12 = vmov 11  }
 0x10b   :  { %v1241_v20 = vadd.f32 %v1240_v19, %v1237_v13  ;;  %v936_v7 = vmul.f32 1.442695, %v934_v23  ;;  %v938_v15 = vmul.f32 1.442695, %v935_v31  ;;  %1506 = vset.pattern.permute.xlu0 %v1676_v12  ;;  %v1677_v13 = vmov 8  }
 0x10c   :  { %v1242_v21 = vadd.f32 %v1240_v19, %v1238_v17  ;;  %1504 = vset.pattern.permute.xlu1 %v1677_v13 }
 0x10d   :  { %v619_v35 = vpop.xlane.xlu1 %618  ;;  %v2116_v36 = vmul.f32 100.0, %v1241_v20 }
 0x10e   :  { %v620_v28 = vsub.f32 %v2664_v44, %v619_v35  ;;  %v621_v57 = vsub.f32 %v2665_v56, %v619_v35  ;;  %v2118_v37 = vmul.f32 100.0, %v1242_v21 }
 0x10f   :  { %v1572_v59 = vpop.eup %1571 }
 0x110   :  { %v1574_v60 = vpop.eup %1573  ;;  %v622_v63 = vmul.f32 1.442695, %v620_v28  ;;  %v624_v3 = vmul.f32 1.442695, %v621_v57  ;;  %v1245_v28 = vmax.f32 %v2116_v36, %v2118_v37  ;;  %v315_v56 = vmul.f32 %v1572_v59, %v2097_v0 }
 0x111   :  { %v312_v2 = vadd.f32 %v1574_v60, %v1572_v59  ;;  %v776_v46 = vpop.xlane.xlu1 %775  ;;  %v316_v57 = vmul.f32 %v1574_v60, %v2101_v1 }
 0x112   :  { %1579 = vpow2.f32 %v622_v63  ;;  %v777_v61 = vsub.f32 %v2667_v52, %v776_v46  ;;  %v778_v32 = vsub.f32 %v2668_v27, %v776_v46  ;;  %v320_v63 = vmul.f32 %v1572_v59, %v2023_v39 }
 0x113   :  { %v1576_v25 = vpop.eup %1575  ;;  %1581 = vpow2.f32 %v624_v3  ;;  %313 = vadd.xlane.f32.xlu1 %v312_v2  ;;  %v321_v3 = vmul.f32 %v1574_v60, %v2027_v43  ;;  %v317_v2 = vadd.f32 %v316_v57, %v315_v56 }
 0x114   :  { %v1578_v16 = vpop.eup %1577  ;;  %v779_v26 = vmul.f32 1.442695, %v777_v61  ;;  %v781_v6 = vmul.f32 1.442695, %v778_v32  ;;  %v477_v53 = vmul.f32 %v1576_v25, %v2023_v39 }
 0x115   :  { %v469_v8 = vadd.f32 %v1578_v16, %v1576_v25  ;;  %v322_v52 = vadd.f32 %v321_v3, %v320_v63  ;;  %v473_v59 = vmul.f32 %v1578_v16, %v2101_v1  ;;  %v478_v11 = vmul.f32 %v1578_v16, %v2027_v43  ;;  %v2149_v22 = vpop.xlane.xlu1 %1089 }
 0x116   :  { %1583 = vpow2.f32 %v779_v26 }
 0x117   :  { %470 = vadd.xlane.f32.xlu1 %v469_v8  ;;  %1585 = vpow2.f32 %v781_v6  ;;  %v479_v6 = vadd.f32 %v478_v11, %v477_v53 }
 0x118   :  { %1587 = vpow2.f32 %v936_v7 }
 0x119   :  { %1589 = vpow2.f32 %v938_v15 }
 0x11b   :  { %149 = vadd.xlane.f32.xlu1 %v148_v34 }
 0x11c   :  { %v1580_v40 = vpop.eup %1579 }
 0x11d   :  { %v1582_v35 = vpop.eup %1581  ;;  %v634_v14 = vmul.f32 %v1580_v40, %v2023_v39  ;;  %v629_v8 = vmul.f32 %v1580_v40, %v2097_v0 }
 0x11e   :  { %v626_v41 = vadd.f32 %v1582_v35, %v1580_v40  ;;  %v635_v42 = vmul.f32 %v1582_v35, %v2027_v43  ;;  %v630_v10 = vmul.f32 %v1582_v35, %v2101_v1  ;;  %v2672_v35 = vld [vmem:[#allocation15_spill] sm:$0xff] }
 0x120   :  { %627 = vadd.xlane.f32.xlu0 %v626_v41  ;;  %v636_v38 = vadd.f32 %v635_v42, %v634_v14  ;;  %v1584_v44 = vpop.eup %1583  ;;  %v631_v17 = vadd.f32 %v630_v10, %v629_v8 }
 0x121   :  { %v1586_v58 = vpop.eup %1585  ;;  %v791_v47 = vmul.f32 %v1584_v44, %v2023_v39 }
 0x122   :  { %637 = vadd.xlane.f32.xlu1 %v636_v38  ;;  %v783_v46 = vadd.f32 %v1586_v58, %v1584_v44  ;;  %v792_v49 = vmul.f32 %v1586_v58, %v2027_v43  ;;  %v2129_v50 = vpop.eup %1587  ;;  %v787_v16 = vmul.f32 %v1586_v58, %v2101_v1 }
 0x123   :  { %v2131_v51 = vpop.eup %1589  ;;  %v948_v60 = vmul.f32 %v2129_v50, %v2023_v39 }
 0x124   :  { %154 = vadd.xlane.f32.xlu0 %v2037_v45  ;;  %v472_v45 = vmul.f32 %v1576_v25, %v2097_v0  ;;  %v793_v61 = vadd.f32 %v792_v49, %v791_v47  ;;  %v949_v27 = vmul.f32 %v2131_v51, %v2027_v43  ;;  %v786_v25 = vmul.f32 %v1584_v44, %v2097_v0 }
 0x126   :  { %1246 = vmax.xlane.f32.xlu1 %v1245_v28  ;;  %v474_v32 = vadd.f32 %v473_v59, %v472_v45  ;;  %v2141_v26 = vadd.f32 %v949_v27, %v948_v60  ;;  %v788_v18 = vadd.f32 %v787_v16, %v786_v25 }
 0x128   :  { %318 = vadd.xlane.f32.xlu0 %v317_v2 }
 0x12a   :  { %784 = vadd.xlane.f32.xlu1 %v783_v46  ;;  %v2163_v46 = vld [vmem:[%s2673_s21] sm:$0xff] }
 0x12c   :  { %323 = vadd.xlane.f32.xlu0 %v322_v52 }
 0x12e   :  { %794 = vadd.xlane.f32.xlu1 %v793_v61 }
 0x130   :  { %475 = vadd.xlane.f32.xlu0 %v474_v32 }
 0x134   :  { %480 = vadd.xlane.f32.xlu0 %v479_v6 }
 0x138   :  { %632 = vadd.xlane.f32.xlu0 %v631_v17 }
 0x13c   :  { %789 = vadd.xlane.f32.xlu0 %v788_v18 }
 0x178   :  { %v145_v19 = vpop.xlane.xlu0 %144 }
 0x179   :  { %1591 = vrcp.f32 %v145_v19 }
 0x183   :  { %v1592_v23 = vpop.eup %1591 }
 0x184   :  { %v157_v24 = vmul.f32 %v1592_v23, %v145_v19  ;;  %v1678_v19 = vmov 10  }
 0x186   :  { %v158_v34 = vsub.f32 2.0, %v157_v24 }
 0x188   :  { %v159_v21 = vmul.f32 %v1592_v23, %v158_v34 }
 0x1a0   :  { %v314_v31 = vpop.xlane.xlu1 %313 }
 0x1a1   :  { %1593 = vrcp.f32 %v314_v31 }
 0x1a4   :  { %v471_v20 = vpop.xlane.xlu1 %470 }
 0x1a5   :  { %1595 = vrcp.f32 %v471_v20 }
 0x1a8   :  { %v150_v7 = vpop.xlane.xlu1 %149 }
 0x1a9   :  { %v160_v40 = vmul.f32 %v159_v21, %v150_v7 }
 0x1ab   :  { %v1594_v15 = vpop.eup %1593  ;;  %v182_v14 = vmul.f32 %v160_v40, %v2672_v35 }
 0x1ac   :  { %v326_v41 = vmul.f32 %v1594_v15, %v314_v31 }
 0x1ad   :  { %v187_v42 = vsub.f32 %v182_v14, %v2082_v48  ;;  %v628_v38 = vpop.xlane.xlu0 %627 }
 0x1ae   :  { %1597 = vrcp.f32 %v628_v38  ;;  %v327_v56 = vsub.f32 2.0, %v326_v41 }
 0x1af   :  { %v2154_v44 = vmul.f32 %v2039_v54, %v187_v42  ;;  %v638_v28 = vpop.xlane.xlu1 %637  ;;  %v1596_v57 = vpop.eup %1595 }
 0x1b0   :  { %v483_v2 = vmul.f32 %v1596_v57, %v471_v20  ;;  %v328_v49 = vmul.f32 %v1594_v15, %v327_v56 }
 0x1b1   :  { %v155_v58 = vpop.xlane.xlu0 %154  ;;  %231 = vperm.xlu0 %1506, %v2154_v44   ;;  %197 = vperm.xlu1 %1504, %v2154_v44  }
 0x1b2   :  { %v161_v63 = vmul.f32 %v159_v21, %v155_v58  ;;  %v484_v27 = vsub.f32 2.0, %v483_v2 }
 0x1b3   :  { %v2158_v3 = vpop.xlane.xlu1 %1246 }
 0x1b4   :  { %v189_v47 = vmul.f32 %v2163_v46, %v161_v63  ;;  %v485_v16 = vmul.f32 %v1596_v57, %v484_v27 }
 0x1b5   :  { %v319_v52 = vpop.xlane.xlu0 %318 }
 0x1b6   :  { %v193_v45 = vsub.f32 %v189_v47, %v2068_v5  ;;  %v329_v59 = vmul.f32 %v328_v49, %v319_v52 }
 0x1b7   :  { %v785_v61 = vpop.xlane.xlu1 %784 }
 0x1b8   :  { %v1598_v60 = vpop.eup %1597  ;;  %v2168_v32 = vmul.f32 %v2039_v54, %v193_v45  ;;  %v1381_v53 = vsel %vm1380_vm0, %v160_v40, %v329_v59  ;;  %1599 = vrcp.f32 %v785_v61 }
 0x1b9   :  { %v640_v11 = vmul.f32 %v1598_v60, %v628_v38  ;;  %v324_v6 = vpop.xlane.xlu0 %323 }
 0x1ba   :  { %v330_v8 = vmul.f32 %v328_v49, %v324_v6  ;;  %203 = vperm.xlu1 %1504, %v2168_v32   ;;  %v2675_v6 = vld [vmem:[#allocation23_spill] sm:$0xff] }
 0x1bb   :  { %v641_v10 = vsub.f32 2.0, %v640_v11 }
 0x1bc   :  { %v1394_v25 = vsel %vm1380_vm0, %v161_v63, %v330_v8  ;;  %v354_v20 = vmul.f32 %v2163_v46, %v330_v8  ;;  %v795_v63 = vpop.xlane.xlu1 %794  ;;  %v1092_v8 = vsub.f32 %v2675_v6, %v2149_v22 }
 0x1bd   :  { %v476_v17 = vpop.xlane.xlu0 %475  ;;  %v642_v23 = vmul.f32 %v1598_v60, %v641_v10  ;;  %v1248_v10 = vsub.f32 %v2116_v36, %v2158_v3 }
 0x1be   :  { %v486_v18 = vmul.f32 %v485_v16, %v476_v17  ;;  %1505 = vset.pattern.permute.xlu1 %v1678_v19  ;;  %v355_v56 = vsub.f32 %v354_v20, %v2068_v5 }
 0x1bf   :  { %220 = vperm.xlu1 %1505, %v2154_v44   ;;  %v644_v34 = vmul.f32 %v642_v23, %v638_v28  ;;  %v351_v28 = vmul.f32 %v2163_v46, %v329_v59 }
 0x1c0   :  { %v1383_v54 = vsel %vm1382_vm1, %v1381_v53, %v486_v18  ;;  %v2192_v49 = vmul.f32 %v2041_v62, %v355_v56  ;;  %v2674_v53 = vld [vmem:[#allocation22_spill] sm:$0xff]  ;;  %v508_v17 = vmul.f32 %v2163_v46, %v486_v18 }
 0x1c1   :  { %v481_v24 = vpop.xlane.xlu0 %480  ;;  %v352_v59 = vsub.f32 %v351_v28, %v2082_v48  ;;  %v1091_v11 = vsub.f32 %v2674_v53, %v2149_v22 }
 0x1c2   :  { %v487_v31 = vmul.f32 %v485_v16, %v481_v24  ;;  %v1600_v21 = vpop.eup %1599  ;;  %v1095_v16 = vmul.f32 1.442695, %v1092_v8  ;;  %v509_v22 = vsub.f32 %v508_v17, %v2082_v48 }
 0x1c3   :  { %225 = vperm.xlu1 %1505, %v2168_v32   ;;  %v797_v15 = vmul.f32 %v1600_v21, %v785_v61  ;;  %v2211_v27 = vmul.f32 %v2041_v62, %v352_v59  ;;  %v1093_v62 = vmul.f32 1.442695, %v1091_v11 }
 0x1c4   :  { %v511_v7 = vmul.f32 %v2163_v46, %v487_v31  ;;  %v1395_v40 = vsel %vm1382_vm1, %v1394_v25, %v487_v31  ;;  %v1249_v25 = vsub.f32 %v2118_v37, %v2158_v3  ;;  %v2230_v36 = vmul.f32 %v2046_v4, %v509_v22 }
 0x1c5   :  { %v1396_v35 = vsel %vm1384_vm2, %v1395_v40, %v644_v34  ;;  %v633_v14 = vpop.xlane.xlu0 %632  ;;  %v798_v38 = vsub.f32 2.0, %v797_v15  ;;  %1601 = vpow2.f32 %v1093_v62  ;;  %v940_v3 = vadd.f32 %v2131_v51, %v2129_v50 }
 0x1c6   :  { %v512_v41 = vsub.f32 %v511_v7, %v2068_v5  ;;  %v643_v42 = vmul.f32 %v642_v23, %v633_v14  ;;  %v1250_v23 = vmul.f32 1.442695, %v1248_v10  ;;  %1603 = vpow2.f32 %v1095_v16 }
 0x1c7   :  { %1507 = vset.pattern.permute.xlu1 %v1676_v12  ;;  %v799_v2 = vmul.f32 %v1600_v21, %v798_v38  ;;  %v668_v31 = vmul.f32 %v2163_v46, %v644_v34  ;;  %v943_v15 = vmul.f32 %v2129_v50, %v2097_v0  ;;  %v944_v34 = vmul.f32 %v2131_v51, %v2101_v1 }
 0x1c8   :  { %v2186_v57 = vmul.f32 %v2046_v4, %v512_v41  ;;  %v1385_v58 = vsel %vm1384_vm2, %v1383_v54, %v643_v42  ;;  %236 = vperm.xlu1 %1507, %v2168_v32   ;;  %v1252_v54 = vmul.f32 1.442695, %v1249_v25  ;;  %1605 = vpow2.f32 %v1250_v23 }
 0x1c9   :  { %v790_v47 = vpop.xlane.xlu0 %789  ;;  %v2194_v52 = vmul.f32 %v799_v2, %v795_v63  ;;  %v669_v21 = vsub.f32 %v668_v31, %v2068_v5  ;;  %v665_v40 = vmul.f32 %v2163_v46, %v643_v42  ;;  %v945_v41 = vadd.f32 %v944_v34, %v943_v15 }
 0x1ca   :  { %555 = vperm.xlu0 %1506, %v2186_v57   ;;  %v2196_v45 = vmul.f32 %v799_v2, %v790_v47  ;;  %1607 = vpow2.f32 %v1252_v54 }
 0x1cb   :  { %v2202_v61 = vsel %vm253_vm3, %v1396_v35, %v2194_v52  ;;  %v2248_v35 = vmul.f32 %v2048_v55, %v669_v21  ;;  %v666_v14 = vsub.f32 %v665_v40, %v2082_v48 }
 0x1cc   :  { %1508 = vset.pattern.permute.xlu1 %v1677_v13  ;;  %v2206_v60 = vsel %vm253_vm3, %v1385_v58, %v2196_v45  ;;  %v822_v47 = vmul.f32 %v2163_v46, %v2196_v45  ;;  %v1679_v45 = vmov 9  }
 0x1cd   :  { %365 = vperm.xlu1 %1508, %v2192_v49   ;;  %v2256_v50 = vmul.f32 %v2048_v55, %v666_v14 }
 0x1ce   :  { %1519 = vset.pattern.permute.xlu0 %v1677_v13  ;;  %v823_v11 = vsub.f32 %v822_v47, %v2082_v48 }
 0x1cf   :  { %v1602_v37 = vpop.eup %1601 }
 0x1d0   :  { %v1604_v18 = vpop.eup %1603  ;;  %v1100_v42 = vmul.f32 %v1602_v37, %v2097_v0  ;;  %v1105_v56 = vmul.f32 %v1602_v37, %v2023_v39 }
 0x1d1   :  { %1509 = vset.pattern.permute.xlu1 %v1678_v19  ;;  %v1097_v4 = vadd.f32 %v1604_v18, %v1602_v37  ;;  %v1101_v38 = vmul.f32 %v1604_v18, %v2101_v1  ;;  %v1106_v28 = vmul.f32 %v1604_v18, %v2027_v43 }
 0x1d2   :  { %382 = vperm.xlu1 %1509, %v2211_v27   ;;  %v1606_v24 = vpop.eup %1605 }
 0x1d3   :  { %v1102_v51 = vadd.f32 %v1101_v38, %v1100_v42  ;;  %v1107_v58 = vadd.f32 %v1106_v28, %v1105_v56  ;;  %v1257_v63 = vmul.f32 %v1606_v24, %v2097_v0  ;;  %v1262_v59 = vmul.f32 %v1606_v24, %v2023_v39 }
 0x1d4   :  { %v1608_v20 = vpop.eup %1607  ;;  %v825_v39 = vmul.f32 %v2163_v46, %v2194_v52 }
 0x1d5   :  { %v1254_v7 = vadd.f32 %v1608_v20, %v1606_v24  ;;  %v1258_v2 = vmul.f32 %v1608_v20, %v2101_v1  ;;  %v1263_v53 = vmul.f32 %v1608_v20, %v2027_v43  ;;  %v2273_v1 = vmul.f32 %v2052_v33, %v823_v11 }
 0x1d6   :  { %387 = vperm.xlu1 %1509, %v2192_v49   ;;  %v826_v43 = vsub.f32 %v825_v39, %v2068_v5 }
 0x1d7   :  { %v1259_v55 = vadd.f32 %v1258_v2, %v1257_v63  ;;  %v1264_v0 = vadd.f32 %v1263_v53, %v1262_v59 }
 0x1d8   :  { %v2285_v6 = vmul.f32 %v2052_v33, %v826_v43 }
 0x1da   :  { %1510 = vset.pattern.permute.xlu1 %v1676_v12 }
 0x1db   :  { %393 = vperm.xlu1 %1510, %v2211_v27  }
 0x1df   :  { %398 = vperm.xlu1 %1510, %v2192_v49  }
 0x1e3   :  { %1511 = vset.pattern.permute.xlu1 %v1677_v13 }
 0x1e4   :  { %516 = vperm.xlu1 %1511, %v2230_v36  }
 0x1e8   :  { %1512 = vset.pattern.permute.xlu1 %v1678_v19 }
 0x1e9   :  { %941 = vadd.xlane.f32.xlu0 %v940_v3  ;;  %544 = vperm.xlu1 %1512, %v2186_v57  }
 0x1ed   :  { %1098 = vadd.xlane.f32.xlu0 %v1097_v4  ;;  %1513 = vset.pattern.permute.xlu1 %v1676_v12 }
 0x1ee   :  { %550 = vperm.xlu1 %1513, %v2230_v36  }
 0x1f1   :  { %1255 = vadd.xlane.f32.xlu0 %v1254_v7 }
 0x1f2   :  { %1514 = vset.pattern.permute.xlu1 %v1677_v13 }
 0x1f3   :  { %679 = vperm.xlu1 %1514, %v2248_v35  }
 0x1f5   :  { %946 = vadd.xlane.f32.xlu0 %v945_v41 }
 0x1f7   :  { %1515 = vset.pattern.permute.xlu1 %v1678_v19 }
 0x1f8   :  { %696 = vperm.xlu1 %1515, %v2256_v50  }
 0x1f9   :  { %1103 = vadd.xlane.f32.xlu0 %v1102_v51 }
 0x1fc   :  { %1516 = vset.pattern.permute.xlu1 %v1676_v12 }
 0x1fd   :  { %1108 = vadd.xlane.f32.xlu0 %v1107_v58  ;;  %707 = vperm.xlu1 %1516, %v2256_v50  }
 0x201   :  { %1260 = vadd.xlane.f32.xlu0 %v1259_v55  ;;  %712 = vperm.xlu1 %1516, %v2248_v35  }
 0x205   :  { %1265 = vadd.xlane.f32.xlu0 %v1264_v0  ;;  %1517 = vset.pattern.permute.xlu1 %v1677_v13 }
 0x206   :  { %830 = vperm.xlu1 %1517, %v2273_v1  }
 0x20a   :  { %1518 = vset.pattern.permute.xlu1 %v1679_v45 }
 0x21b   :  { %359 = vperm.xlu0 %1519, %v2211_v27  }
 0x21f   :  { %522 = vperm.xlu0 %1519, %v2186_v57  }
 0x223   :  { %673 = vperm.xlu0 %1519, %v2256_v50  }
 0x227   :  { %836 = vperm.xlu0 %1519, %v2285_v6  }
 0x22a   :  { %951 = vadd.xlane.f32.xlu1 %v2141_v26 }
 0x22b   :  { %1520 = vset.pattern.permute.xlu0 %v1679_v45 }
 0x22c   :  { %214 = vperm.xlu0 %1520, %v2168_v32  }
 0x230   :  { %v198_v52 = vpop.permute.xlu1 %197  ;;  %v232_v16 = vpop.permute.xlu0 %231 }
 0x231   :  { %v200_v62 = vmul.f32 %v198_v52, %v2154_v44  ;;  %v234_v54 = vmul.f32 %v232_v16, %v2154_v44 }
 0x239   :  { %v204_v8 = vpop.permute.xlu1 %203 }
 0x23a   :  { %v206_v10 = vmul.f32 %v204_v8, %v2168_v32 }
 0x23b   :  { %209 = vperm.xlu1 %1518, %v2154_v44  }
 0x23c   :  { %v207_v17 = vadd.f32 %v206_v10, %v200_v62 }
 0x23e   :  { %v2295_v33 = vpop.permute.xlu1 %220 }
 0x23f   :  { %371 = vperm.xlu1 %1518, %v2211_v27  }
 0x242   :  { %v2299_v26 = vpop.permute.xlu1 %225 }
 0x243   :  { %376 = vperm.xlu1 %1518, %v2192_v49  }
 0x247   :  { %528 = vperm.xlu1 %1518, %v2230_v36   ;;  %v237_v25 = vpop.permute.xlu1 %236 }
 0x248   :  { %v239_v23 = vmul.f32 %v237_v25, %v2168_v32 }
 0x249   :  { %v2311_v18 = vpop.permute.xlu0 %555 }
 0x24a   :  { %v240_v22 = vadd.f32 %v239_v23, %v234_v54 }
 0x24b   :  { %533 = vperm.xlu1 %1518, %v2186_v57  }
 0x24c   :  { %v366_v37 = vpop.permute.xlu1 %365 }
 0x24f   :  { %685 = vperm.xlu1 %1518, %v2256_v50  }
 0x251   :  { %v2309_v3 = vpop.permute.xlu1 %382 }
 0x253   :  { %690 = vperm.xlu1 %1518, %v2248_v35  }
 0x255   :  { %v2313_v31 = vpop.permute.xlu1 %387 }
 0x257   :  { %842 = vperm.xlu1 %1518, %v2273_v1  }
 0x25a   :  { %v394_v4 = vpop.permute.xlu1 %393 }
 0x25b   :  { %242 = vrot.lane.b32.xlu1 %v207_v17, %s1680_s23  ;;  %v368_v17 = vmul.f32 %v366_v37, %v2192_v49 }
 0x25e   :  { %v399_v34 = vpop.permute.xlu1 %398 }
 0x25f   :  { %250 = vrot.lane.b32.xlu1 %v240_v22, %s2676_s24  ;;  %v401_v54 = vmul.f32 %v399_v34, %v2192_v49 }
 0x263   :  { %v517_v28 = vpop.permute.xlu1 %516 }
 0x268   :  { %v2317_v0 = vpop.permute.xlu1 %544 }
 0x26d   :  { %v551_v25 = vpop.permute.xlu1 %550 }
 0x272   :  { %v680_v23 = vpop.permute.xlu1 %679 }
 0x276   :  { %v942_v24 = vpop.xlane.xlu0 %941 }
 0x277   :  { %1609 = vrcp.f32 %v942_v24 }
 0x27a   :  { %v1099_v20 = vpop.xlane.xlu0 %1098 }
 0x27b   :  { %1611 = vrcp.f32 %v1099_v20 }
 0x27e   :  { %v1256_v21 = vpop.xlane.xlu0 %1255 }
 0x27f   :  { %1613 = vrcp.f32 %v1256_v21 }
 0x281   :  { %v1610_v7 = vpop.eup %1609 }
 0x282   :  { %v954_v40 = vmul.f32 %v1610_v7, %v942_v24  ;;  %v947_v15 = vpop.xlane.xlu0 %946 }
 0x284   :  { %v955_v41 = vsub.f32 2.0, %v954_v40 }
 0x285   :  { %v1612_v14 = vpop.eup %1611 }
 0x286   :  { %v1111_v42 = vmul.f32 %v1612_v14, %v1099_v20  ;;  %v1104_v38 = vpop.xlane.xlu0 %1103  ;;  %v956_v58 = vmul.f32 %v1610_v7, %v955_v41  ;;  %v396_v20 = vmul.f32 %v394_v4, %v2211_v27  ;;  %v2336_v7 = vpop.permute.xlu1 %696 }
 0x288   :  { %v1112_v51 = vsub.f32 2.0, %v1111_v42  ;;  %v2315_v59 = vmul.f32 %v956_v58, %v947_v15  ;;  %v519_v15 = vmul.f32 %v517_v28, %v2230_v36 }
 0x289   :  { %v1614_v56 = vpop.eup %1613 }
 0x28a   :  { %v1268_v63 = vmul.f32 %v1614_v56, %v1256_v21  ;;  %v1113_v2 = vmul.f32 %v1612_v14, %v1112_v51  ;;  %v1109_v47 = vpop.xlane.xlu0 %1108  ;;  %v1388_v43 = vsel %vm1387_vm4, %v2206_v60, %v2315_v59  ;;  %v402_v21 = vadd.f32 %v401_v54, %v396_v20  ;;  %v708_v14 = vpop.permute.xlu1 %707 }
 0x28b   :  { %v558_v54 = vmul.f32 %v2311_v18, %v2186_v57 }
 0x28c   :  { %v1269_v55 = vsub.f32 2.0, %v1268_v63  ;;  %v1114_v53 = vmul.f32 %v1113_v2, %v1104_v38 }
 0x28e   :  { %v1261_v11 = vpop.xlane.xlu0 %1260  ;;  %v1270_v39 = vmul.f32 %v1614_v56, %v1269_v55  ;;  %v1390_v8 = vsel %vm1389_vm5, %v1388_v43, %v1114_v53  ;;  %v713_v34 = vpop.permute.xlu1 %712  ;;  %v2342_v56 = vmul.f32 %v1113_v2, %v1109_v47 }
 0x290   :  { %v2322_v52 = vmul.f32 %v1270_v39, %v1261_v11 }
 0x292   :  { %v1392_v10 = vsel %vm1391_vm6, %v1390_v8, %v2322_v52  ;;  %v1266_v62 = vpop.xlane.xlu0 %1265  ;;  %v831_v42 = vpop.permute.xlu1 %830 }
 0x293   :  { %1393 = vst.msk [vmem:[%s2662_s9] sm:$0xff] %vm255_vm7, %v1392_v10  ;;  %v1272_v55 = vmul.f32 %v1270_v39, %v1266_v62  ;;  %v553_v62 = vmul.f32 %v551_v25, %v2230_v36 }
 0x29a   :  { %v360_v16 = vpop.permute.xlu0 %359 }
 0x29b   :  { %v362_v60 = vmul.f32 %v360_v16, %v2211_v27 }
 0x29d   :  { %v369_v22 = vadd.f32 %v368_v17, %v362_v60 }
 0x29e   :  { %v523_v24 = vpop.permute.xlu0 %522 }
 0x29f   :  { %404 = vrot.lane.b32.xlu1 %v369_v22, %s1680_s23  ;;  %v525_v40 = vmul.f32 %v523_v24, %v2186_v57  ;;  %v559_v22 = vadd.f32 %v558_v54, %v553_v62  ;;  %v1136_v24 = vmul.f32 %v2163_v46, %v1114_v53  ;;  %v228_v62 = vmul.f32 %v2299_v26, %v2168_v32 }
 0x2a1   :  { %v526_v37 = vadd.f32 %v525_v40, %v519_v15  ;;  %v833_v40 = vmul.f32 %v831_v42, %v2273_v1  ;;  %v1137_v25 = vsub.f32 %v1136_v24, %v2082_v48 }
 0x2a2   :  { %v674_v41 = vpop.permute.xlu0 %673 }
 0x2a3   :  { %412 = vrot.lane.b32.xlu1 %v402_v21, %s2676_s24  ;;  %v676_v18 = vmul.f32 %v674_v41, %v2256_v50  ;;  %v2375_v42 = vmul.f32 %v2060_v30, %v1137_v25 }
 0x2a6   :  { %v837_v38 = vpop.permute.xlu0 %836 }
 0x2a7   :  { %561 = vrot.lane.b32.xlu1 %v526_v37, %s1680_s23  ;;  %v839_v20 = vmul.f32 %v837_v38, %v2285_v6  ;;  %v682_v38 = vmul.f32 %v680_v23, %v2248_v35  ;;  %v715_v23 = vmul.f32 %v713_v34, %v2248_v35  ;;  %v979_v34 = vmul.f32 %v2163_v46, %v2315_v59 }
 0x2ab   :  { %v215_v63 = vpop.permute.xlu0 %214 }
 0x2ac   :  { %v217_v8 = vmul.f32 %v215_v63, %v2168_v32 }
 0x2b7   :  { %v952_v4 = vpop.xlane.xlu1 %951 }
 0x2b8   :  { %v958_v51 = vmul.f32 %v956_v58, %v952_v4  ;;  %v840_v4 = vadd.f32 %v839_v20, %v833_v40 }
 0x2ba   :  { %v1398_v11 = vsel %vm1387_vm4, %v2202_v61, %v958_v51 }
 0x2bb   :  { %v1399_v28 = vsel %vm1389_vm5, %v1398_v11, %v2342_v56  ;;  %v210_v43 = vpop.permute.xlu1 %209  ;;  %v982_v11 = vmul.f32 %v2163_v46, %v958_v51 }
 0x2bc   :  { %v1400_v10 = vsel %vm1391_vm6, %v1399_v28, %v1272_v55  ;;  %v212_v16 = vmul.f32 %v210_v43, %v2154_v44  ;;  %v683_v28 = vadd.f32 %v682_v38, %v676_v18 }
 0x2bd   :  { %1490 = vst.msk [vmem:[%s2662_s9 + $0x8] sm:$0xff] %vm255_vm7, %v1400_v10  ;;  %v983_v43 = vsub.f32 %v982_v11, %v2068_v5 }
 0x2be   :  { %v218_v58 = vadd.f32 %v217_v8, %v212_v16  ;;  %v1296_v16 = vmul.f32 %v2163_v46, %v1272_v55 }
 0x2bf   :  { %v372_v2 = vpop.permute.xlu1 %371 }
 0x2c0   :  { %246 = vrot.lane.b32.xlu0 %v218_v58, %s1681_s27  ;;  %v374_v47 = vmul.f32 %v372_v2, %v2211_v27  ;;  %v2385_v58 = vmul.f32 %v2056_v29, %v983_v43  ;;  %v710_v2 = vmul.f32 %v708_v14, %v2256_v50  ;;  %v980_v14 = vsub.f32 %v979_v34, %v2082_v48 }
 0x2c3   :  { %v377_v61 = vpop.permute.xlu1 %376 }
 0x2c4   :  { %v379_v39 = vmul.f32 %v377_v61, %v2192_v49  ;;  %v716_v61 = vadd.f32 %v715_v23, %v710_v2 }
 0x2c6   :  { %v380_v17 = vadd.f32 %v379_v39, %v374_v47  ;;  %v1297_v47 = vsub.f32 %v1296_v16, %v2068_v5  ;;  %v2403_v39 = vmul.f32 %v2056_v29, %v980_v14 }
 0x2c7   :  { %v529_v60 = vpop.permute.xlu1 %528 }
 0x2c8   :  { %408 = vrot.lane.b32.xlu0 %v380_v17, %s1681_s27  ;;  %v531_v15 = vmul.f32 %v529_v60, %v2230_v36  ;;  %v2397_v55 = vmul.f32 %v2064_v9, %v1297_v47  ;;  %v223_v60 = vmul.f32 %v2295_v33, %v2154_v44  ;;  %v385_v44 = vmul.f32 %v2309_v3, %v2211_v27 }
 0x2ca   :  { %v229_v54 = vadd.f32 %v228_v62, %v223_v60 }
 0x2cb   :  { %v534_v21 = vpop.permute.xlu1 %533 }
 0x2cc   :  { %v536_v37 = vmul.f32 %v534_v21, %v2186_v57  ;;  %569 = vrot.lane.b32.xlu0 %v559_v22, %s2676_s24 }
 0x2ce   :  { %v537_v63 = vadd.f32 %v536_v37, %v531_v15  ;;  %v390_v15 = vmul.f32 %v2313_v31, %v2192_v49 }
 0x2cf   :  { %v686_v53 = vpop.permute.xlu1 %685 }
 0x2d0   :  { %565 = vrot.lane.b32.xlu1 %v537_v63, %s1681_s27  ;;  %875 = vrot.lane.b32.xlu0 %v840_v4, %s1680_s23  ;;  %v688_v41 = vmul.f32 %v686_v53, %v2256_v50  ;;  %v391_v63 = vadd.f32 %v390_v15, %v385_v44 }
 0x2d3   :  { %v691_v8 = vpop.permute.xlu1 %690 }
 0x2d4   :  { %v693_v10 = vmul.f32 %v691_v8, %v2248_v35  ;;  %718 = vrot.lane.b32.xlu1 %v683_v28, %s1680_s23  ;;  %1156 = vperm.xlu0 %1520, %v2375_v42  }
 0x2d6   :  { %v694_v51 = vadd.f32 %v693_v10, %v688_v41 }
 0x2d7   :  { %v2413_v59 = vpop.permute.xlu1 %842 }
 0x2d8   :  { %722 = vrot.lane.b32.xlu1 %v694_v51, %s1681_s27  ;;  %1526 = vset.pattern.permute.xlu0 %v1677_v13 }
 0x2d9   :  { %993 = vperm.xlu0 %1526, %v2385_v58  }
 0x2db   :  { %v243_v29 = vpop.permute.xlu1 %242 }
 0x2dc   :  { %726 = vrot.lane.b32.xlu1 %v716_v61, %s2676_s24 }
 0x2dd   :  { %1144 = vperm.xlu0 %1526, %v2375_v42  }
 0x2df   :  { %v251_v17 = vpop.permute.xlu1 %250 }
 0x2e0   :  { %847 = vperm.xlu1 %1518, %v2285_v6  }
 0x2e1   :  { %1307 = vperm.xlu0 %1526, %v2397_v55  }
 0x2e4   :  { %1521 = vset.pattern.permute.xlu1 %v1678_v19 }
 0x2e5   :  { %853 = vperm.xlu1 %1521, %v2273_v1   ;;  %1530 = vset.pattern.permute.xlu0 %v1676_v12 }
 0x2e6   :  { %1021 = vperm.xlu0 %1530, %v2403_v39  }
 0x2e9   :  { %1522 = vset.pattern.permute.xlu1 %v1676_v12 }
 0x2ea   :  { %864 = vperm.xlu1 %1522, %v2273_v1  }
 0x2ee   :  { %869 = vperm.xlu1 %1522, %v2285_v6  }
 0x2f2   :  { %1523 = vset.pattern.permute.xlu1 %v1677_v13 }
 0x311   :  { %v405_v22 = vpop.permute.xlu1 %404 }
 0x315   :  { %v413_v33 = vpop.permute.xlu1 %412 }
 0x319   :  { %v562_v41 = vpop.permute.xlu1 %561 }
 0x332   :  { %v247_v24 = vpop.permute.xlu0 %246 }
 0x333   :  { %v254_v20 = vsel %vm253_vm3, %v243_v29, %v247_v24 }
 0x334   :  { %v256_v21 = vsel %vm255_vm7, %v254_v20, %v229_v54 }
 0x335   :  { %v258_v40 = vsel %vm257_vm8, %v256_v21, %v251_v17 }
 0x336   :  { %v260_v32 = vsel %vm259_vm9, %v258_v40, 0.0  ;;  %v268_v26 = vrot.slane %v258_v40, 4 }
 0x337   :  { %v261_v37 = vrot.slane %v260_v32, 4 }
 0x338   :  { %v270_v25 = vsel %vm259_vm9, %v268_v26, 0.0 }
 0x339   :  { %v262_v18 = vadd.f32 %v261_v37, %v260_v32  ;;  %v271_v4 = vrot.slane %v270_v25, 4 }
 0x33a   :  { %v409_v11 = vpop.permute.xlu0 %408 }
 0x33b   :  { %v263_v53 = vrot.slane %v262_v18, 2  ;;  %v272_v38 = vadd.f32 %v271_v4, %v270_v25  ;;  %v415_v28 = vsel %vm253_vm3, %v405_v22, %v409_v11  ;;  %v845_v4 = vmul.f32 %v2413_v59, %v2273_v1 }
 0x33c   :  { %v416_v49 = vsel %vm255_vm7, %v415_v28, %v391_v63  ;;  %v1139_v28 = vmul.f32 %v2163_v46, %v2342_v56  ;;  %v1293_v56 = vmul.f32 %v2163_v46, %v2322_v52 }
 0x33d   :  { %v264_v31 = vadd.f32 %v263_v53, %v262_v18  ;;  %v273_v43 = vrot.slane %v272_v38, 2  ;;  %v417_v8 = vsel %vm257_vm8, %v416_v49, %v413_v33 }
 0x33e   :  { %v418_v27 = vsel %vm259_vm9, %v417_v8, 0.0  ;;  %v426_v3 = vrot.slane %v417_v8, 4 }
 0x33f   :  { %v265_v10 = vrot.slane %v264_v31, 1  ;;  %v274_v23 = vadd.f32 %v273_v43, %v272_v38  ;;  %v419_v51 = vrot.slane %v418_v27, 4  ;;  %v1140_v43 = vsub.f32 %v1139_v28, %v2068_v5 }
 0x340   :  { %v428_v16 = vsel %vm259_vm9, %v426_v3, 0.0 }
 0x341   :  { %v275_v2 = vrot.slane %v274_v23, 1  ;;  %v420_v61 = vadd.f32 %v419_v51, %v418_v27  ;;  %v429_v47 = vrot.slane %v428_v16, 4  ;;  %v266_v34 = vadd.f32 %v265_v10, %v264_v31 }
 0x342   :  { %v566_v14 = vpop.permute.xlu1 %565  ;;  %v1294_v27 = vsub.f32 %v1293_v56, %v2082_v48 }
 0x343   :  { %v276_v29 = vadd.f32 %v275_v2, %v274_v23  ;;  %v421_v62 = vrot.slane %v420_v61, 2  ;;  %v430_v17 = vadd.f32 %v429_v47, %v428_v16  ;;  %v2434_v60 = vsel %vm253_vm3, %v562_v41, %v566_v14 }
 0x344   :  { %v2468_v41 = vmul.f32 %v2060_v30, %v1140_v43  ;;  %v2480_v30 = vmul.f32 %v2064_v9, %v1294_v27  ;;  %v570_v9 = vpop.permute.xlu0 %569 }
 0x345   :  { %v278_v54 = vsel %vm277_vm10, %v266_v34, %v276_v29  ;;  %v422_v22 = vadd.f32 %v421_v62, %v420_v61  ;;  %v431_v24 = vrot.slane %v430_v17, 2 }
 0x346   :  { %280 = vst.msk [vmem:[%s2677_s30] sm:$0x3] %vm279_vm11, %v278_v54  ;;  %v719_v20 = vpop.permute.xlu1 %718 }
 0x347   :  { %v423_v21 = vrot.slane %v422_v22, 1  ;;  %v432_v40 = vadd.f32 %v431_v24, %v430_v17 }
 0x348   :  { %v2503_v5 = vpop.permute.xlu0 %875 }
 0x349   :  { %v433_v15 = vrot.slane %v432_v40, 1  ;;  %v424_v26 = vadd.f32 %v423_v21, %v422_v22 }
 0x34a   :  { %v723_v32 = vpop.permute.xlu1 %722 }
 0x34b   :  { %v434_v37 = vadd.f32 %v433_v15, %v432_v40  ;;  %v2442_v44 = vsel %vm253_vm3, %v719_v20, %v723_v32  ;;  %v547_v32 = vmul.f32 %v2317_v0, %v2186_v57 }
 0x34d   :  { %v435_v33 = vsel %vm277_vm10, %v424_v26, %v434_v37 }
 0x34e   :  { %1435 = vst.msk [vmem:[%s2677_s30 + $0x2] sm:$0x3] %vm279_vm11, %v435_v33  ;;  %v2449_v25 = vpop.permute.xlu1 %726 }
 0x353   :  { %v1157_v48 = vpop.permute.xlu0 %1156 }
 0x354   :  { %v1159_v20 = vmul.f32 %v1157_v48, %v2375_v42 }
 0x35f   :  { %v848_v18 = vpop.permute.xlu1 %847 }
 0x360   :  { %v850_v63 = vmul.f32 %v848_v18, %v2285_v6 }
 0x362   :  { %v851_v11 = vadd.f32 %v850_v63, %v845_v4 }
 0x364   :  { %879 = vrot.lane.b32.xlu1 %v851_v11, %s1681_s27  ;;  %v2455_v53 = vpop.permute.xlu1 %853 }
 0x365   :  { %v856_v56 = vmul.f32 %v2455_v53, %v2273_v1 }
 0x368   :  { %987 = vperm.xlu1 %1523, %v2403_v39  }
 0x369   :  { %v865_v38 = vpop.permute.xlu1 %864 }
 0x36a   :  { %v867_v59 = vmul.f32 %v865_v38, %v2273_v1  ;;  %v699_v38 = vmul.f32 %v2336_v7, %v2256_v50 }
 0x36c   :  { %1524 = vset.pattern.permute.xlu1 %v1679_v45 }
 0x36d   :  { %999 = vperm.xlu1 %1524, %v2403_v39   ;;  %v870_v49 = vpop.permute.xlu1 %869 }
 0x36e   :  { %v872_v31 = vmul.f32 %v870_v49, %v2285_v6 }
 0x370   :  { %v873_v8 = vadd.f32 %v872_v31, %v867_v59 }
 0x371   :  { %1004 = vperm.xlu1 %1524, %v2385_v58  }
 0x372   :  { %883 = vrot.lane.b32.xlu0 %v873_v8, %s2676_s24 }
 0x375   :  { %1525 = vset.pattern.permute.xlu1 %v1677_v13 }
 0x376   :  { %1150 = vperm.xlu1 %1525, %v2468_v41   ;;  %1183 = vperm.xlu0 %1530, %v2468_v41  }
 0x37a   :  { %1527 = vset.pattern.permute.xlu1 %v1679_v45  ;;  %1340 = vperm.xlu0 %1530, %v2397_v55  }
 0x37b   :  { %1161 = vperm.xlu1 %1527, %v2468_v41  }
 0x37e   :  { %1532 = vset.pattern.permute.xlu0 %v1678_v19 }
 0x37f   :  { %1528 = vset.pattern.permute.xlu1 %v1677_v13  ;;  %539 = vperm.xlu0 %1532, %v2230_v36   ;;  %v994_v13 = vpop.permute.xlu0 %993 }
 0x380   :  { %1301 = vperm.xlu1 %1528, %v2480_v30   ;;  %v996_v3 = vmul.f32 %v994_v13, %v2385_v58 }
 0x383   :  { %701 = vperm.xlu0 %1532, %v2248_v35   ;;  %v1145_v46 = vpop.permute.xlu0 %1144 }
 0x384   :  { %1529 = vset.pattern.permute.xlu1 %v1679_v45  ;;  %v1147_v62 = vmul.f32 %v1145_v46, %v2375_v42 }
 0x385   :  { %1313 = vperm.xlu1 %1529, %v2480_v30  }
 0x387   :  { %858 = vperm.xlu0 %1532, %v2285_v6  }
 0x389   :  { %1318 = vperm.xlu1 %1529, %v2397_v55  }
 0x38b   :  { %1015 = vperm.xlu0 %1532, %v2385_v58  }
 0x38d   :  { %1531 = vset.pattern.permute.xlu1 %v1676_v12 }
 0x38e   :  { %1026 = vperm.xlu1 %1531, %v2385_v58  }
 0x38f   :  { %1324 = vperm.xlu0 %1532, %v2480_v30  }
 0x392   :  { %1178 = vperm.xlu1 %1531, %v2375_v42  }
 0x393   :  { %1534 = vset.pattern.permute.xlu0 %v1676_v12  ;;  %v1308_v12 = vpop.permute.xlu0 %1307 }
 0x394   :  { %v1310_v33 = vmul.f32 %v1308_v12, %v2397_v55 }
 0x396   :  { %1335 = vperm.xlu1 %1531, %v2480_v30  }
 0x397   :  { %v2508_v51 = vpop.permute.xlu0 %1021 }
 0x39a   :  { %1533 = vset.pattern.permute.xlu1 %v1678_v19 }
 0x39b   :  { %1010 = vperm.xlu1 %1533, %v2403_v39  }
 0x39f   :  { %1167 = vperm.xlu1 %1533, %v2375_v42  }
 0x3a3   :  { %1172 = vperm.xlu1 %1533, %v2468_v41  }
 0x3a7   :  { %1329 = vperm.xlu1 %1533, %v2397_v55  }
 0x3d6   :  { %v880_v45 = vpop.permute.xlu1 %879 }
 0x3d7   :  { %v886_v53 = vsel %vm253_vm3, %v2503_v5, %v880_v45 }
 0x3e4   :  { %v884_v2 = vpop.permute.xlu0 %883 }
 0x3e7   :  { %v988_v52 = vpop.permute.xlu1 %987 }
 0x3e8   :  { %v990_v19 = vmul.f32 %v988_v52, %v2403_v39 }
 0x3ea   :  { %v997_v10 = vadd.f32 %v996_v3, %v990_v19 }
 0x3ec   :  { %v1000_v23 = vpop.permute.xlu1 %999  ;;  %1032 = vrot.lane.b32.xlu0 %v997_v10, %s1680_s23 }
 0x3ed   :  { %v1002_v61 = vmul.f32 %v1000_v23, %v2403_v39 }
 0x3f0   :  { %v1005_v16 = vpop.permute.xlu1 %1004 }
 0x3f1   :  { %v1007_v47 = vmul.f32 %v1005_v16, %v2385_v58 }
 0x3f3   :  { %v1008_v34 = vadd.f32 %v1007_v47, %v1002_v61 }
 0x3f5   :  { %1036 = vrot.lane.b32.xlu1 %v1008_v34, %s1681_s27  ;;  %v1151_v14 = vpop.permute.xlu1 %1150  ;;  %v2513_v29 = vpop.permute.xlu0 %1183 }
 0x3f6   :  { %v1153_v17 = vmul.f32 %v1151_v14, %v2468_v41 }
 0x3f8   :  { %v1154_v54 = vadd.f32 %v1153_v17, %v1147_v62 }
 0x3f9   :  { %v2517_v22 = vpop.permute.xlu0 %1340 }
 0x3fa   :  { %v1162_v24 = vpop.permute.xlu1 %1161  ;;  %1189 = vrot.lane.b32.xlu0 %v1154_v54, %s1680_s23  ;;  %v1024_v54 = vmul.f32 %v2508_v51, %v2403_v39  ;;  %v1186_v51 = vmul.f32 %v2513_v29, %v2468_v41 }
 0x3fb   :  { %v1164_v21 = vmul.f32 %v1162_v24, %v2468_v41 }
 0x3fd   :  { %v1165_v40 = vadd.f32 %v1164_v21, %v1159_v20 }
 0x3fe   :  { %v540_v15 = vpop.permute.xlu0 %539 }
 0x3ff   :  { %v542_v26 = vmul.f32 %v540_v15, %v2230_v36  ;;  %v1302_v37 = vpop.permute.xlu1 %1301  ;;  %1193 = vrot.lane.b32.xlu1 %v1165_v40, %s1681_s27 }
 0x400   :  { %v1304_v18 = vmul.f32 %v1302_v37, %v2480_v30 }
 0x401   :  { %v548_v4 = vadd.f32 %v547_v32, %v542_v26 }
 0x402   :  { %v1311_v63 = vadd.f32 %v1310_v33, %v1304_v18  ;;  %v702_v11 = vpop.permute.xlu0 %701 }
 0x403   :  { %v573_v28 = vsel %vm255_vm7, %v2434_v60, %v548_v4  ;;  %v704_v57 = vmul.f32 %v702_v11, %v2248_v35 }
 0x404   :  { %v574_v36 = vsel %vm257_vm8, %v573_v28, %v570_v9  ;;  %v1314_v0 = vpop.permute.xlu1 %1313  ;;  %1346 = vrot.lane.b32.xlu0 %v1311_v63, %s1680_s23 }
 0x405   :  { %v575_v49 = vsel %vm259_vm9, %v574_v36, 0.0  ;;  %v583_v59 = vrot.slane %v574_v36, 4  ;;  %v705_v31 = vadd.f32 %v704_v57, %v699_v38  ;;  %v1316_v48 = vmul.f32 %v1314_v0, %v2480_v30 }
 0x406   :  { %v576_v43 = vrot.slane %v575_v49, 4  ;;  %v859_v8 = vpop.permute.xlu0 %858 }
 0x407   :  { %v585_v50 = vsel %vm259_vm9, %v583_v59, 0.0  ;;  %v730_v7 = vsel %vm255_vm7, %v2442_v44, %v705_v31  ;;  %v861_v35 = vmul.f32 %v859_v8, %v2285_v6  ;;  %v1343_v59 = vmul.f32 %v2517_v22, %v2397_v55 }
 0x408   :  { %v577_v60 = vadd.f32 %v576_v43, %v575_v49  ;;  %v586_v27 = vrot.slane %v585_v50, 4  ;;  %v731_v9 = vsel %vm257_vm8, %v730_v7, %v2449_v25  ;;  %v1319_v13 = vpop.permute.xlu1 %1318 }
 0x409   :  { %v732_v46 = vsel %vm259_vm9, %v731_v9, 0.0  ;;  %v740_v12 = vrot.slane %v731_v9, 4  ;;  %v862_v52 = vadd.f32 %v861_v35, %v856_v56  ;;  %v1321_v1 = vmul.f32 %v1319_v13, %v2397_v55 }
 0x40a   :  { %v578_v44 = vrot.slane %v577_v60, 2  ;;  %v587_v3 = vadd.f32 %v586_v27, %v585_v50  ;;  %v733_v6 = vrot.slane %v732_v46, 4 }
 0x40b   :  { %v742_v19 = vsel %vm259_vm9, %v740_v12, 0.0  ;;  %v887_v10 = vsel %vm255_vm7, %v886_v53, %v862_v52  ;;  %v1322_v25 = vadd.f32 %v1321_v1, %v1316_v48  ;;  %v1016_v53 = vpop.permute.xlu0 %1015 }
 0x40c   :  { %v579_v23 = vadd.f32 %v578_v44, %v577_v60  ;;  %v588_v16 = vrot.slane %v587_v3, 2  ;;  %v734_v61 = vadd.f32 %v733_v6, %v732_v46  ;;  %v743_v47 = vrot.slane %v742_v19, 4 }
 0x40d   :  { %v888_v34 = vsel %vm257_vm8, %v887_v10, %v884_v2  ;;  %v1027_v14 = vpop.permute.xlu1 %1026  ;;  %1350 = vrot.lane.b32.xlu1 %v1322_v25, %s1681_s27 }
 0x40e   :  { %v580_v62 = vrot.slane %v579_v23, 1  ;;  %v589_v17 = vadd.f32 %v588_v16, %v587_v3  ;;  %v735_v5 = vrot.slane %v734_v61, 2  ;;  %v744_v45 = vadd.f32 %v743_v47, %v742_v19 }
 0x40f   :  { %v889_v24 = vsel %vm259_vm9, %v888_v34, 0.0  ;;  %v897_v20 = vrot.slane %v888_v34, 4  ;;  %v1029_v21 = vmul.f32 %v1027_v14, %v2385_v58  ;;  %v1325_v3 = vpop.permute.xlu0 %1324  ;;  %v1018_v16 = vmul.f32 %v1016_v53, %v2385_v58 }
 0x410   :  { %v590_v40 = vrot.slane %v589_v17, 1  ;;  %v736_v15 = vadd.f32 %v735_v5, %v734_v61  ;;  %v745_v32 = vrot.slane %v744_v45, 2  ;;  %v581_v26 = vadd.f32 %v580_v62, %v579_v23 }
 0x411   :  { %v890_v2 = vrot.slane %v889_v24, 4  ;;  %v899_v37 = vsel %vm259_vm9, %v897_v20, 0.0  ;;  %v1030_v33 = vadd.f32 %v1029_v21, %v1024_v54  ;;  %v1179_v18 = vpop.permute.xlu1 %1178 }
 0x412   :  { %v591_v4 = vadd.f32 %v590_v40, %v589_v17  ;;  %v737_v63 = vrot.slane %v736_v15, 1  ;;  %v746_v11 = vadd.f32 %v745_v32, %v744_v45  ;;  %v900_v38 = vrot.slane %v899_v37, 4 }
 0x413   :  { %v891_v28 = vadd.f32 %v890_v2, %v889_v24  ;;  %v1181_v57 = vmul.f32 %v1179_v18, %v2375_v42  ;;  %1040 = vrot.lane.b32.xlu0 %v1030_v33, %s2676_s24 }
 0x414   :  { %v592_v36 = vsel %vm277_vm10, %v581_v26, %v591_v4  ;;  %v747_v0 = vrot.slane %v746_v11, 1  ;;  %v901_v49 = vadd.f32 %v900_v38, %v899_v37  ;;  %v738_v8 = vadd.f32 %v737_v63, %v736_v15 }
 0x415   :  { %1444 = vst.msk [vmem:[%s2677_s30 + $0x4] sm:$0x3] %vm279_vm11, %v592_v36  ;;  %v892_v31 = vrot.slane %v891_v28, 2  ;;  %v1187_v43 = vadd.f32 %v1186_v51, %v1181_v57  ;;  %v1336_v29 = vpop.permute.xlu1 %1335  ;;  %v1327_v15 = vmul.f32 %v1325_v3, %v2480_v30 }
 0x416   :  { %v748_v56 = vadd.f32 %v747_v0, %v746_v11  ;;  %v902_v50 = vrot.slane %v901_v49, 2  ;;  %v1338_v7 = vmul.f32 %v1336_v29, %v2480_v30 }
 0x417   :  { %v893_v35 = vadd.f32 %v892_v31, %v891_v28  ;;  %1197 = vrot.lane.b32.xlu1 %v1187_v43, %s2676_s24 }
 0x418   :  { %v749_v60 = vsel %vm277_vm10, %v738_v8, %v748_v56  ;;  %v903_v27 = vadd.f32 %v902_v50, %v901_v49  ;;  %v1344_v22 = vadd.f32 %v1343_v59, %v1338_v7 }
 0x419   :  { %1453 = vst.msk [vmem:[%s2677_s30 + $0x6] sm:$0x3] %vm279_vm11, %v749_v60  ;;  %v894_v9 = vrot.slane %v893_v35, 1 }
 0x41a   :  { %v904_v48 = vrot.slane %v903_v27, 1  ;;  %1354 = vrot.lane.b32.xlu0 %v1344_v22, %s2676_s24  ;;  %v1011_v52 = vpop.permute.xlu1 %1010 }
 0x41b   :  { %v895_v13 = vadd.f32 %v894_v9, %v893_v35  ;;  %v1013_v23 = vmul.f32 %v1011_v52, %v2403_v39 }
 0x41c   :  { %v905_v46 = vadd.f32 %v904_v48, %v903_v27 }
 0x41d   :  { %v1019_v14 = vadd.f32 %v1018_v16, %v1013_v23 }
 0x41e   :  { %v906_v12 = vsel %vm277_vm10, %v895_v13, %v905_v46  ;;  %v1168_v1 = vpop.permute.xlu1 %1167 }
 0x41f   :  { %1462 = vst.msk [vmem:[%s2677_s30 + $0x8] sm:$0x3] %vm279_vm11, %v906_v12  ;;  %v1170_v17 = vmul.f32 %v1168_v1, %v2375_v42 }
 0x422   :  { %v1173_v44 = vpop.permute.xlu1 %1172 }
 0x423   :  { %v1175_v62 = vmul.f32 %v1173_v44, %v2468_v41 }
 0x425   :  { %v1176_v58 = vadd.f32 %v1175_v62, %v1170_v17 }
 0x426   :  { %v1330_v6 = vpop.permute.xlu1 %1329 }
 0x427   :  { %v1332_v24 = vmul.f32 %v1330_v6, %v2397_v55 }
 0x429   :  { %v1333_v37 = vadd.f32 %v1332_v24, %v1327_v15 }
 0x45e   :  { %v1033_v19 = vpop.permute.xlu0 %1032 }
 0x467   :  { %v1037_v10 = vpop.permute.xlu1 %1036 }
 0x468   :  { %v1043_v34 = vsel %vm253_vm3, %v1033_v19, %v1037_v10 }
 0x469   :  { %v1044_v45 = vsel %vm255_vm7, %v1043_v34, %v1019_v14 }
 0x46c   :  { %v1190_v25 = vpop.permute.xlu0 %1189 }
 0x471   :  { %v1194_v61 = vpop.permute.xlu1 %1193 }
 0x472   :  { %v1200_v20 = vsel %vm253_vm3, %v1190_v25, %v1194_v61 }
 0x473   :  { %v1201_v2 = vsel %vm255_vm7, %v1200_v20, %v1176_v58 }
 0x476   :  { %v1347_v47 = vpop.permute.xlu0 %1346 }
 0x47f   :  { %v1351_v5 = vpop.permute.xlu1 %1350 }
 0x480   :  { %v1357_v41 = vsel %vm253_vm3, %v1347_v47, %v1351_v5 }
 0x481   :  { %v1358_v30 = vsel %vm255_vm7, %v1357_v41, %v1333_v37 }
 0x485   :  { %v1041_v54 = vpop.permute.xlu0 %1040 }
 0x486   :  { %v1045_v39 = vsel %vm257_vm8, %v1044_v45, %v1041_v54 }
 0x487   :  { %v1046_v21 = vsel %vm259_vm9, %v1045_v39, 0.0  ;;  %v1054_v40 = vrot.slane %v1045_v39, 4 }
 0x488   :  { %v1047_v32 = vrot.slane %v1046_v21, 4 }
 0x489   :  { %v1056_v42 = vsel %vm259_vm9, %v1054_v40, 0.0  ;;  %v1198_v26 = vpop.permute.xlu1 %1197 }
 0x48a   :  { %v1048_v55 = vadd.f32 %v1047_v32, %v1046_v21  ;;  %v1057_v33 = vrot.slane %v1056_v42, 4  ;;  %v1202_v18 = vsel %vm257_vm8, %v1201_v2, %v1198_v26 }
 0x48b   :  { %v1203_v4 = vsel %vm259_vm9, %v1202_v18, 0.0  ;;  %v1211_v63 = vrot.slane %v1202_v18, 4 }
 0x48c   :  { %v1049_v11 = vrot.slane %v1048_v55, 2  ;;  %v1058_v38 = vadd.f32 %v1057_v33, %v1056_v42  ;;  %v1204_v51 = vrot.slane %v1203_v4, 4  ;;  %v1355_v28 = vpop.permute.xlu0 %1354 }
 0x48d   :  { %v1213_v57 = vsel %vm259_vm9, %v1211_v63, 0.0  ;;  %v1359_v36 = vsel %vm257_vm8, %v1358_v30, %v1355_v28 }
 0x48e   :  { %v1050_v0 = vadd.f32 %v1049_v11, %v1048_v55  ;;  %v1059_v49 = vrot.slane %v1058_v38, 2  ;;  %v1205_v59 = vadd.f32 %v1204_v51, %v1203_v4  ;;  %v1214_v31 = vrot.slane %v1213_v57, 4 }
 0x48f   :  { %v1360_v43 = vsel %vm259_vm9, %v1359_v36, 0.0  ;;  %v1368_v29 = vrot.slane %v1359_v36, 4 }
 0x490   :  { %v1051_v8 = vrot.slane %v1050_v0, 1  ;;  %v1060_v56 = vadd.f32 %v1059_v49, %v1058_v38  ;;  %v1206_v50 = vrot.slane %v1205_v59, 2  ;;  %v1215_v7 = vadd.f32 %v1214_v31, %v1213_v57 }
 0x491   :  { %v1361_v35 = vrot.slane %v1360_v43, 4  ;;  %v1370_v60 = vsel %vm259_vm9, %v1368_v29, 0.0 }
 0x492   :  { %v1061_v27 = vrot.slane %v1060_v56, 1  ;;  %v1207_v22 = vadd.f32 %v1206_v50, %v1205_v59  ;;  %v1216_v9 = vrot.slane %v1215_v7, 2  ;;  %v1371_v13 = vrot.slane %v1370_v60, 4 }
 0x493   :  { %v1362_v48 = vadd.f32 %v1361_v35, %v1360_v43  ;;  %v1052_v46 = vadd.f32 %v1051_v8, %v1050_v0 }
 0x494   :  { %v1062_v12 = vadd.f32 %v1061_v27, %v1060_v56  ;;  %v1208_v52 = vrot.slane %v1207_v22, 1  ;;  %v1217_v1 = vadd.f32 %v1216_v9, %v1215_v7  ;;  %v1372_v44 = vadd.f32 %v1371_v13, %v1370_v60 }
 0x495   :  { %v1363_v53 = vrot.slane %v1362_v48, 2 }
 0x496   :  { %v1063_v3 = vsel %vm277_vm10, %v1052_v46, %v1062_v12  ;;  %v1218_v6 = vrot.slane %v1217_v1, 1  ;;  %v1373_v10 = vrot.slane %v1372_v44, 2  ;;  %v1209_v25 = vadd.f32 %v1208_v52, %v1207_v22 }
 0x497   :  { %1471 = vst.msk [vmem:[%s2677_s30 + $0xa] sm:$0x3] %vm279_vm11, %v1063_v3  ;;  %v1364_v19 = vadd.f32 %v1363_v53, %v1362_v48 }
 0x498   :  { %v1219_v23 = vadd.f32 %v1218_v6, %v1217_v1  ;;  %v1374_v61 = vadd.f32 %v1373_v10, %v1372_v44 }
 0x499   :  { %v1365_v16 = vrot.slane %v1364_v19, 1 }
 0x49a   :  { %v1220_v47 = vsel %vm277_vm10, %v1209_v25, %v1219_v23  ;;  %v1375_v34 = vrot.slane %v1374_v61, 1 }
 0x49b   :  { %1480 = vst.msk [vmem:[%s2677_s30 + $0xc] sm:$0x3] %vm279_vm11, %v1220_v47  ;;  %v1366_v14 = vadd.f32 %v1365_v16, %v1364_v19 }
 0x49c   :  { %v1376_v62 = vadd.f32 %v1375_v34, %v1374_v61 }
 0x49e   :  { %v1377_v17 = vsel %vm277_vm10, %v1366_v14, %v1376_v62 }
 0x49f   :  { %1489 = vst.msk [vmem:[%s2677_s30 + $0xe] sm:$0x3] %vm279_vm11, %v1377_v17 }
 0x4a0   :  { %1420 = vsyncpa [#allocation3], 1 }
 0x4a1   :  { %1421 = vsyncpa [#allocation5], 1 }
 0x4a2   :  { %1422 = vsyncpa [#allocation8], 1 }

</bundles_post_ra>
